<compile_context>
chip_gen: v5e
topology: v5e:2x2
jax: 0.10.0
libtpu: 0.0.40
codegen_flags: <defaults>
</compile_context>

<pallas_src>
import functools

import jax
import jax.numpy as jnp
import numpy as np
from jax import lax
from jax.experimental import pallas as pl
from jax.experimental.pallas import tpu as pltpu


# ---------------------------------------------------------------------------
# Fused bottleneck kernel (one grid step == one image).
# ---------------------------------------------------------------------------
def _bottleneck_kernel(*refs, stride, split, first_layer, H, W, Ho, Wo):
    if first_layer:
        (x_ref, w1_ref, b1_ref, w2_ref, b2_ref, w3_ref, b3_ref,
         wsc_ref, bsc_ref, o_ref, y1p_ref) = refs
    else:
        (x_ref, w1_ref, b1_ref, w2_ref, b2_ref, w3_ref, b3_ref,
         o_ref, y1p_ref) = refs
        wsc_ref = bsc_ref = None

    x = x_ref[0]                                   # (H, W, Cprev) f32
    Cprev = x.shape[-1]
    Cmid = w1_ref.shape[-1]
    C3 = w3_ref.shape[-1]

    # ---- stage 1: 1x1 conv (BN folded) + bias + ReLU on interior pixels ----
    x2d = x.reshape(H * W, Cprev)                  # f32, kept for shortcut
    y1 = jnp.dot(x2d.astype(jnp.bfloat16), w1_ref[...],
                 preferred_element_type=jnp.float32)
    y1 = jnp.maximum(y1 + b1_ref[...], 0.0)        # (H*W, Cmid)

    # Zero-padded bf16 activation lives in VMEM scratch; the border supplies
    # the conv's zero padding (zeroed every step: scratch is per-core, so a
    # program_id==0 init would be unsafe under megacore splitting).
    y1p_ref[...] = jnp.zeros_like(y1p_ref)
    y1p_ref[pl.ds(1, H), pl.ds(1, W), :] = (
        y1.reshape(H, W, Cmid).astype(y1p_ref.dtype))

    # ---- stage 2: 3x3/stride conv as 9 accumulating tap matmuls ------------
    acc = jnp.zeros((Ho * Wo, Cmid), jnp.float32)
    for kh in range(3):
        for kw in range(3):
            if stride == 1:
                tap = y1p_ref[pl.ds(kh, Ho), pl.ds(kw, Wo), :]
            else:
                # TODO(synk): for stride>1 prefer strided ref loads
                # (pl.ds(..., stride=s)) over a strided value-slice.
                tap = y1p_ref[pl.ds(kh, (Ho - 1) * stride + 1),
                              pl.ds(kw, (Wo - 1) * stride + 1), :]
                tap = lax.slice(tap, (0, 0, 0), tap.shape,
                                (stride, stride, 1))
            acc = acc + jnp.dot(tap.reshape(Ho * Wo, Cmid),
                                w2_ref[kh * 3 + kw],
                                preferred_element_type=jnp.float32)
    y2 = jnp.maximum(acc + b2_ref[...], 0.0)       # (Ho*Wo, Cmid)

    # ---- stage 3: 1x1 conv + bias + ReLU -----------------------------------
    y3 = jnp.dot(y2.astype(jnp.bfloat16), w3_ref[...],
                 preferred_element_type=jnp.float32)
    y3 = jnp.maximum(y3 + b3_ref[...], 0.0)        # (Ho*Wo, C3)

    # ---- shortcut path (stride-subsample of the input, f32) ----------------
    if stride == 1:
        x_in = x2d                                 # (H*W, Cprev)
    else:
        xs = lax.slice(x, (0, 0, 0),
                       ((Ho - 1) * stride + 1, (Wo - 1) * stride + 1, Cprev),
                       (stride, stride, 1))
        x_in = xs.reshape(Ho * Wo, Cprev)
    if first_layer:
        # f32 matmul keeps the residual branch full precision (tiny cost).
        sc = jnp.dot(x_in, wsc_ref[...], preferred_element_type=jnp.float32)
        sc = sc + bsc_ref[...]                     # (Ho*Wo, C3), no ReLU here
    else:
        sc = x_in                                  # identity (stride == 1)

    # ---- DPN merge: residual add + dense concat + final ReLU ---------------
    merged = jnp.concatenate(
        [sc[:, :split] + y3[:, :split], sc[:, split:], y3[:, split:]],
        axis=-1)
    merged = jnp.maximum(merged, 0.0)
    Cout = merged.shape[-1]
    # single lane-dense full-width store of the output block
    o_ref[...] = merged.reshape(1, Ho, Wo, Cout).astype(o_ref.dtype)


# ---------------------------------------------------------------------------
# Bottleneck forward (Pallas wrapper)
# ---------------------------------------------------------------------------
def bottleneck_forward(x_nchw, p, *, out_channel, stride, first_layer):
    x = jnp.transpose(x_nchw, (0, 2, 3, 1)).astype(jnp.float32)   # NCHW->NHWC
    N, H, W, Cprev = x.shape
    Cmid = p["w1"].shape[1]
    C3 = p["w3"].shape[1]
    Ho = (H - 1) // stride + 1
    Wo = (W - 1) // stride + 1
    split = out_channel
    Csc = C3 if first_layer else Cprev
    Cout = Csc + C3 - split
    if not first_layer:
        assert stride == 1 and Cprev >= split

    # Fold BN scale into the conv weights; matmul weights in bf16 (shortcut
    # weights stay f32 to keep the residual branch accurate).
    w1 = (p["w1"] * p["s1"][None, :]).astype(jnp.bfloat16)
    w2 = (p["w2"] * p["s2"][None, None, None, :])            # HWIO
    w2 = w2.reshape(9, Cmid, Cmid).astype(jnp.bfloat16)      # tap-major (kh,kw)
    w3 = (p["w3"] * p["s3"][None, :]).astype(jnp.bfloat16)
    b1 = p["b1"].reshape(1, Cmid).astype(jnp.float32)
    b2 = p["b2"].reshape(1, Cmid).astype(jnp.float32)
    b3 = p["b3"].reshape(1, C3).astype(jnp.float32)

    operands = [x, w1, b1, w2, b2, w3, b3]
    in_specs = [
        pl.BlockSpec((1, H, W, Cprev), lambda n: (n, 0, 0, 0)),
        pl.BlockSpec((Cprev, Cmid), lambda n: (0, 0)),
        pl.BlockSpec((1, Cmid), lambda n: (0, 0)),
        pl.BlockSpec((9, Cmid, Cmid), lambda n: (0, 0, 0)),
        pl.BlockSpec((1, Cmid), lambda n: (0, 0)),
        pl.BlockSpec((Cmid, C3), lambda n: (0, 0)),
        pl.BlockSpec((1, C3), lambda n: (0, 0)),
    ]
    if first_layer:
        wsc = (p["w_sc"] * p["s_sc"][None, :]).astype(jnp.float32)
        bsc = p["b_sc"].reshape(1, C3).astype(jnp.float32)
        operands += [wsc, bsc]
        in_specs += [
            pl.BlockSpec((Cprev, C3), lambda n: (0, 0)),
            pl.BlockSpec((1, C3), lambda n: (0, 0)),
        ]

    # Explicit VMEM budget (double-buffered I/O + weights + bf16 scratch),
    # capped at 64 MiB so the same configuration also fits v7x.
    est = (2 * H * W * Cprev * 4 +
           2 * Ho * Wo * Cout * 4 +
           (H + 2) * (W + 2) * Cmid * 2 +
           2 * (w1.size + w2.size + w3.size) * 2 +
           2 * (b1.size + b2.size + b3.size) * 4)
    if first_layer:
        est += 2 * (Cprev * C3 + C3) * 4
    vmem_limit = int(min(max(2 * est + (4 << 20), 8 << 20), 64 << 20))

    kernel = functools.partial(
        _bottleneck_kernel, stride=stride, split=split,
        first_layer=first_layer, H=H, W=W, Ho=Ho, Wo=Wo)

    out = pl.pallas_call(
        kernel,
        out_shape=jax.ShapeDtypeStruct((N, Ho, Wo, Cout), jnp.float32),
        grid=(N,),
        in_specs=in_specs,
        out_specs=pl.BlockSpec((1, Ho, Wo, Cout), lambda n: (n, 0, 0, 0)),
        scratch_shapes=[
            pltpu.VMEM((H + 2, W + 2, Cmid), jnp.bfloat16),  # padded stage-1 act
        ],
        compiler_params=pltpu.CompilerParams(
            dimension_semantics=("parallel",),
            vmem_limit_bytes=vmem_limit),
    )(*operands)
    return jnp.transpose(out, (0, 3, 1, 2))        # NHWC -> NCHW


# ---------------------------------------------------------------------------
# Pure-JAX reference (lax convs, f32 HIGHEST) for a silent sanity check
# ---------------------------------------------------------------------------
def reference_forward(x_nchw, p, *, out_channel, stride, first_layer):
    x = jnp.transpose(x_nchw, (0, 2, 3, 1))
    dn = ("NHWC", "HWIO", "NHWC")
    hp = lax.Precision.HIGHEST

    def pw(v, w, s=1):
        return lax.conv_general_dilated(v, w[None, None], (s, s), "VALID",
                                        dimension_numbers=dn, precision=hp)

    o = jnp.maximum(pw(x, p["w1"]) * p["s1"] + p["b1"], 0.0)
    o = lax.conv_general_dilated(o, p["w2"], (stride, stride),
                                 ((1, 1), (1, 1)), dimension_numbers=dn,
                                 precision=hp)
    o = jnp.maximum(o * p["s2"] + p["b2"], 0.0)
    o = jnp.maximum(pw(o, p["w3"]) * p["s3"] + p["b3"], 0.0)
    if first_layer:
        sc = pw(x, p["w_sc"], s=stride) * p["s_sc"] + p["b_sc"]
    else:
        sc = x
    split = out_channel
    merged = jnp.concatenate(
        [sc[..., :split] + o[..., :split], sc[..., split:], o[..., split:]],
        axis=-1)
    merged = jnp.maximum(merged, 0.0)
    return jnp.transpose(merged, (0, 3, 1, 2))


def fold_bn(gamma, beta, mean, var, eps=1e-5):
    scale = gamma * lax.rsqrt(var + eps)
    bias = beta - mean * scale
    return scale, bias


def make_params(key, prev_channel, in_channel, out_channel, dense_depth):
    c3 = out_channel + dense_depth
    ks = jax.random.split(key, 8)

    def bn(k, c):
        k1, k2, k3, k4 = jax.random.split(k, 4)
        gamma = 1.0 + 0.1 * jax.random.normal(k1, (c,), jnp.float32)
        beta = 0.1 * jax.random.normal(k2, (c,), jnp.float32)
        mean = 0.1 * jax.random.normal(k3, (c,), jnp.float32)
        var = jax.random.uniform(k4, (c,), jnp.float32, 0.5, 1.5)
        return fold_bn(gamma, beta, mean, var)

    s1, b1 = bn(ks[4], in_channel)
    s2, b2 = bn(ks[5], in_channel)
    s3, b3 = bn(ks[6], c3)
    ssc, bsc = bn(ks[7], c3)
    return {
        # conv weights stored as (Cin, Cout) for 1x1 and HWIO for 3x3
        "w1": 0.3 * jax.random.normal(ks[0], (prev_channel, in_channel), jnp.float32),
        "w2": 0.2 * jax.random.normal(ks[1], (3, 3, in_channel, in_channel), jnp.float32),
        "w3": 0.3 * jax.random.normal(ks[2], (in_channel, c3), jnp.float32),
        "w_sc": 0.3 * jax.random.normal(ks[3], (prev_channel, c3), jnp.float32),
        "s1": s1, "b1": b1, "s2": s2, "b2": b2, "s3": s3, "b3": b3,
        "s_sc": ssc, "b_sc": bsc,
    }


if __name__ == "__main__":
    # Bottleneck(prev_channel=4, in_channel=8, out_channel=16, dense_depth=4,
    #            stride=1, first_layer=True)
    prev_channel, in_channel, out_channel, dense_depth = 4, 8, 16, 4
    stride, first_layer = 1, True

    key = jax.random.PRNGKey(0)
    kx, kp = jax.random.split(key)
    x = jax.random.normal(kx, (2, prev_channel, 16, 16), jnp.float32)  # NCHW
    params = make_params(kp, prev_channel, in_channel, out_channel, dense_depth)

    fwd = jax.jit(functools.partial(
        bottleneck_forward, out_channel=out_channel, stride=stride,
        first_layer=first_layer))
    y = fwd(x, params)
    y = jax.block_until_ready(y)

    y_ref = reference_forward(x, params, out_channel=out_channel,
                              stride=stride, first_layer=first_layer)
    assert y.shape == (2, out_channel + 2 * dense_depth, 16, 16)
    # bf16 matmul operands (f32 accumulation) vs f32-HIGHEST reference.
    np.testing.assert_allclose(np.asarray(y), np.asarray(y_ref),
                               rtol=5e-2, atol=5e-2)
    print("KERNEL_OK")
</pallas_src>

<mosaic_0001>
module attributes {stable_mosaic.version = 11 : i64} {
  func.func @_bottleneck_kernel(%arg0: i32, %arg1: memref<1x16x16x4xf32, #tpu.memory_space<vmem>>, %arg2: memref<4x8xbf16, #tpu.memory_space<vmem>>, %arg3: memref<1x8xf32, #tpu.memory_space<vmem>>, %arg4: memref<9x8x8xbf16, #tpu.memory_space<vmem>>, %arg5: memref<1x8xf32, #tpu.memory_space<vmem>>, %arg6: memref<8x20xbf16, #tpu.memory_space<vmem>>, %arg7: memref<1x20xf32, #tpu.memory_space<vmem>>, %arg8: memref<4x20xf32, #tpu.memory_space<vmem>>, %arg9: memref<1x20xf32, #tpu.memory_space<vmem>>, %arg10: memref<1x16x16x24xf32, #tpu.memory_space<vmem>>, %arg11: memref<18x18x8xbf16, #tpu.memory_space<vmem>>) attributes {dimension_semantics = [#tpu.dimension_semantics<parallel>], iteration_bounds = array<i64: 2>, scalar_prefetch = 0 : i64, scratch_operands = 1 : i64, tpu.core_type = #tpu.core_type<tc>, window_params = [{transform_indices = @transform_0, window_bounds = array<i64: 1, 16, 16, 4>}, {pipeline_mode = #tpu.pipeline_mode<synchronous>, transform_indices = @transform_1, window_bounds = array<i64: 4, 8>}, {pipeline_mode = #tpu.pipeline_mode<synchronous>, transform_indices = @transform_2, window_bounds = array<i64: 1, 8>}, {pipeline_mode = #tpu.pipeline_mode<synchronous>, transform_indices = @transform_3, window_bounds = array<i64: 9, 8, 8>}, {pipeline_mode = #tpu.pipeline_mode<synchronous>, transform_indices = @transform_4, window_bounds = array<i64: 1, 8>}, {pipeline_mode = #tpu.pipeline_mode<synchronous>, transform_indices = @transform_5, window_bounds = array<i64: 8, 20>}, {pipeline_mode = #tpu.pipeline_mode<synchronous>, transform_indices = @transform_6, window_bounds = array<i64: 1, 20>}, {pipeline_mode = #tpu.pipeline_mode<synchronous>, transform_indices = @transform_7, window_bounds = array<i64: 4, 20>}, {pipeline_mode = #tpu.pipeline_mode<synchronous>, transform_indices = @transform_8, window_bounds = array<i64: 1, 20>}, {transform_indices = @transform_9, window_bounds = array<i64: 1, 16, 16, 24>}]} {
    %c0 = arith.constant 0 : index
    %c0_0 = arith.constant 0 : index
    %c0_1 = arith.constant 0 : index
    %c0_2 = arith.constant 0 : index
    %0 = vector.load %arg1[%c0, %c0_0, %c0_1, %c0_2] : memref<1x16x16x4xf32, #tpu.memory_space<vmem>>, vector<1x16x16x4xf32>
    %1 = vector.shape_cast %0 : vector<1x16x16x4xf32> to vector<16x16x4xf32>
    %2 = vector.shape_cast %1 : vector<16x16x4xf32> to vector<256x4xf32>
    %3 = arith.truncf %2 : vector<256x4xf32> to vector<256x4xbf16>
    %c0_3 = arith.constant 0 : index
    %c0_4 = arith.constant 0 : index
    %4 = vector.load %arg2[%c0_3, %c0_4] : memref<4x8xbf16, #tpu.memory_space<vmem>>, vector<4x8xbf16>
    %cst = arith.constant dense<0.000000e+00> : vector<256x8xf32>
    %5 = tpu.matmul %3, %4, %cst {dimension_numbers = #tpu.dot_dimension_numbers<[1], [0], [0], [1], [0, 0, 1, 1], [], []>} : vector<256x4xbf16>, vector<4x8xbf16>, vector<256x8xf32> -> vector<256x8xf32>
    %c0_5 = arith.constant 0 : index
    %c0_6 = arith.constant 0 : index
    %6 = vector.load %arg3[%c0_5, %c0_6] : memref<1x8xf32, #tpu.memory_space<vmem>>, vector<1x8xf32>
    %7 = vector.broadcast %6 : vector<1x8xf32> to vector<256x8xf32>
    %8 = arith.addf %5, %7 : vector<256x8xf32>
    %cst_7 = arith.constant 0.000000e+00 : f32
    %9 = vector.broadcast %cst_7 : f32 to vector<256x8xf32>
    %10 = arith.maximumf %8, %9 : vector<256x8xf32>
    %cst_8 = arith.constant 0.000000e+00 : bf16
    %11 = vector.broadcast %cst_8 : bf16 to vector<18x18x8xbf16>
    %c0_9 = arith.constant 0 : index
    %c0_10 = arith.constant 0 : index
    %c0_11 = arith.constant 0 : index
    %12 = vector.load %arg11[%c0_9, %c0_10, %c0_11] : memref<18x18x8xbf16, #tpu.memory_space<vmem>>, vector<18x18x8xbf16>
    tpu.vector_store %arg11[%c0_9, %c0_10, %c0_11], %11 {strides = array<i32>} : memref<18x18x8xbf16, #tpu.memory_space<vmem>>, vector<18x18x8xbf16>,
    %13 = vector.shape_cast %10 : vector<256x8xf32> to vector<16x16x8xf32>
    %14 = arith.truncf %13 : vector<16x16x8xf32> to vector<16x16x8xbf16>
    %c1 = arith.constant 1 : index
    %c1_12 = arith.constant 1 : index
    %c0_13 = arith.constant 0 : index
    %15 = vector.load %arg11[%c1, %c1_12, %c0_13] : memref<18x18x8xbf16, #tpu.memory_space<vmem>>, vector<16x16x8xbf16>
    tpu.vector_store %arg11[%c1, %c1_12, %c0_13], %14 {strides = array<i32>} : memref<18x18x8xbf16, #tpu.memory_space<vmem>>, vector<16x16x8xbf16>,
    %cst_14 = arith.constant 0.000000e+00 : f32
    %16 = vector.broadcast %cst_14 : f32 to vector<256x8xf32>
    %c0_15 = arith.constant 0 : index
    %c0_16 = arith.constant 0 : index
    %c0_17 = arith.constant 0 : index
    %17 = vector.load %arg11[%c0_15, %c0_16, %c0_17] : memref<18x18x8xbf16, #tpu.memory_space<vmem>>, vector<16x16x8xbf16>
    %18 = vector.shape_cast %17 : vector<16x16x8xbf16> to vector<256x8xbf16>
    %c0_18 = arith.constant 0 : index
    %c0_19 = arith.constant 0 : index
    %c0_20 = arith.constant 0 : index
    %19 = vector.load %arg4[%c0_18, %c0_19, %c0_20] : memref<9x8x8xbf16, #tpu.memory_space<vmem>>, vector<1x8x8xbf16>
    %20 = vector.shape_cast %19 : vector<1x8x8xbf16> to vector<8x8xbf16>
    %cst_21 = arith.constant dense<0.000000e+00> : vector<256x8xf32>
    %21 = tpu.matmul %18, %20, %cst_21 {dimension_numbers = #tpu.dot_dimension_numbers<[1], [0], [0], [1], [0, 0, 1, 1], [], []>} : vector<256x8xbf16>, vector<8x8xbf16>, vector<256x8xf32> -> vector<256x8xf32>
    %22 = arith.addf %16, %21 : vector<256x8xf32>
    %c0_22 = arith.constant 0 : index
    %c1_23 = arith.constant 1 : index
    %c0_24 = arith.constant 0 : index
    %23 = vector.load %arg11[%c0_22, %c1_23, %c0_24] : memref<18x18x8xbf16, #tpu.memory_space<vmem>>, vector<16x16x8xbf16>
    %24 = vector.shape_cast %23 : vector<16x16x8xbf16> to vector<256x8xbf16>
    %c1_25 = arith.constant 1 : index
    %c0_26 = arith.constant 0 : index
    %c0_27 = arith.constant 0 : index
    %25 = vector.load %arg4[%c1_25, %c0_26, %c0_27] : memref<9x8x8xbf16, #tpu.memory_space<vmem>>, vector<1x8x8xbf16>
    %26 = vector.shape_cast %25 : vector<1x8x8xbf16> to vector<8x8xbf16>
    %cst_28 = arith.constant dense<0.000000e+00> : vector<256x8xf32>
    %27 = tpu.matmul %24, %26, %cst_28 {dimension_numbers = #tpu.dot_dimension_numbers<[1], [0], [0], [1], [0, 0, 1, 1], [], []>} : vector<256x8xbf16>, vector<8x8xbf16>, vector<256x8xf32> -> vector<256x8xf32>
    %28 = arith.addf %22, %27 : vector<256x8xf32>
    %c0_29 = arith.constant 0 : index
    %c2 = arith.constant 2 : index
    %c0_30 = arith.constant 0 : index
    %29 = vector.load %arg11[%c0_29, %c2, %c0_30] : memref<18x18x8xbf16, #tpu.memory_space<vmem>>, vector<16x16x8xbf16>
    %30 = vector.shape_cast %29 : vector<16x16x8xbf16> to vector<256x8xbf16>
    %c2_31 = arith.constant 2 : index
    %c0_32 = arith.constant 0 : index
    %c0_33 = arith.constant 0 : index
    %31 = vector.load %arg4[%c2_31, %c0_32, %c0_33] : memref<9x8x8xbf16, #tpu.memory_space<vmem>>, vector<1x8x8xbf16>
    %32 = vector.shape_cast %31 : vector<1x8x8xbf16> to vector<8x8xbf16>
    %cst_34 = arith.constant dense<0.000000e+00> : vector<256x8xf32>
    %33 = tpu.matmul %30, %32, %cst_34 {dimension_numbers = #tpu.dot_dimension_numbers<[1], [0], [0], [1], [0, 0, 1, 1], [], []>} : vector<256x8xbf16>, vector<8x8xbf16>, vector<256x8xf32> -> vector<256x8xf32>
    %34 = arith.addf %28, %33 : vector<256x8xf32>
    %c1_35 = arith.constant 1 : index
    %c0_36 = arith.constant 0 : index
    %c0_37 = arith.constant 0 : index
    %35 = vector.load %arg11[%c1_35, %c0_36, %c0_37] : memref<18x18x8xbf16, #tpu.memory_space<vmem>>, vector<16x16x8xbf16>
    %36 = vector.shape_cast %35 : vector<16x16x8xbf16> to vector<256x8xbf16>
    %c3 = arith.constant 3 : index
    %c0_38 = arith.constant 0 : index
    %c0_39 = arith.constant 0 : index
    %37 = vector.load %arg4[%c3, %c0_38, %c0_39] : memref<9x8x8xbf16, #tpu.memory_space<vmem>>, vector<1x8x8xbf16>
    %38 = vector.shape_cast %37 : vector<1x8x8xbf16> to vector<8x8xbf16>
    %cst_40 = arith.constant dense<0.000000e+00> : vector<256x8xf32>
    %39 = tpu.matmul %36, %38, %cst_40 {dimension_numbers = #tpu.dot_dimension_numbers<[1], [0], [0], [1], [0, 0, 1, 1], [], []>} : vector<256x8xbf16>, vector<8x8xbf16>, vector<256x8xf32> -> vector<256x8xf32>
    %40 = arith.addf %34, %39 : vector<256x8xf32>
    %c1_41 = arith.constant 1 : index
    %c1_42 = arith.constant 1 : index
    %c0_43 = arith.constant 0 : index
    %41 = vector.load %arg11[%c1_41, %c1_42, %c0_43] : memref<18x18x8xbf16, #tpu.memory_space<vmem>>, vector<16x16x8xbf16>
    %42 = vector.shape_cast %41 : vector<16x16x8xbf16> to vector<256x8xbf16>
    %c4 = arith.constant 4 : index
    %c0_44 = arith.constant 0 : index
    %c0_45 = arith.constant 0 : index
    %43 = vector.load %arg4[%c4, %c0_44, %c0_45] : memref<9x8x8xbf16, #tpu.memory_space<vmem>>, vector<1x8x8xbf16>
    %44 = vector.shape_cast %43 : vector<1x8x8xbf16> to vector<8x8xbf16>
    %cst_46 = arith.constant dense<0.000000e+00> : vector<256x8xf32>
    %45 = tpu.matmul %42, %44, %cst_46 {dimension_numbers = #tpu.dot_dimension_numbers<[1], [0], [0], [1], [0, 0, 1, 1], [], []>} : vector<256x8xbf16>, vector<8x8xbf16>, vector<256x8xf32> -> vector<256x8xf32>
    %46 = arith.addf %40, %45 : vector<256x8xf32>
    %c1_47 = arith.constant 1 : index
    %c2_48 = arith.constant 2 : index
    %c0_49 = arith.constant 0 : index
    %47 = vector.load %arg11[%c1_47, %c2_48, %c0_49] : memref<18x18x8xbf16, #tpu.memory_space<vmem>>, vector<16x16x8xbf16>
    %48 = vector.shape_cast %47 : vector<16x16x8xbf16> to vector<256x8xbf16>
    %c5 = arith.constant 5 : index
    %c0_50 = arith.constant 0 : index
    %c0_51 = arith.constant 0 : index
    %49 = vector.load %arg4[%c5, %c0_50, %c0_51] : memref<9x8x8xbf16, #tpu.memory_space<vmem>>, vector<1x8x8xbf16>
    %50 = vector.shape_cast %49 : vector<1x8x8xbf16> to vector<8x8xbf16>
    %cst_52 = arith.constant dense<0.000000e+00> : vector<256x8xf32>
    %51 = tpu.matmul %48, %50, %cst_52 {dimension_numbers = #tpu.dot_dimension_numbers<[1], [0], [0], [1], [0, 0, 1, 1], [], []>} : vector<256x8xbf16>, vector<8x8xbf16>, vector<256x8xf32> -> vector<256x8xf32>
    %52 = arith.addf %46, %51 : vector<256x8xf32>
    %c2_53 = arith.constant 2 : index
    %c0_54 = arith.constant 0 : index
    %c0_55 = arith.constant 0 : index
    %53 = vector.load %arg11[%c2_53, %c0_54, %c0_55] : memref<18x18x8xbf16, #tpu.memory_space<vmem>>, vector<16x16x8xbf16>
    %54 = vector.shape_cast %53 : vector<16x16x8xbf16> to vector<256x8xbf16>
    %c6 = arith.constant 6 : index
    %c0_56 = arith.constant 0 : index
    %c0_57 = arith.constant 0 : index
    %55 = vector.load %arg4[%c6, %c0_56, %c0_57] : memref<9x8x8xbf16, #tpu.memory_space<vmem>>, vector<1x8x8xbf16>
    %56 = vector.shape_cast %55 : vector<1x8x8xbf16> to vector<8x8xbf16>
    %cst_58 = arith.constant dense<0.000000e+00> : vector<256x8xf32>
    %57 = tpu.matmul %54, %56, %cst_58 {dimension_numbers = #tpu.dot_dimension_numbers<[1], [0], [0], [1], [0, 0, 1, 1], [], []>} : vector<256x8xbf16>, vector<8x8xbf16>, vector<256x8xf32> -> vector<256x8xf32>
    %58 = arith.addf %52, %57 : vector<256x8xf32>
    %c2_59 = arith.constant 2 : index
    %c1_60 = arith.constant 1 : index
    %c0_61 = arith.constant 0 : index
    %59 = vector.load %arg11[%c2_59, %c1_60, %c0_61] : memref<18x18x8xbf16, #tpu.memory_space<vmem>>, vector<16x16x8xbf16>
    %60 = vector.shape_cast %59 : vector<16x16x8xbf16> to vector<256x8xbf16>
    %c7 = arith.constant 7 : index
    %c0_62 = arith.constant 0 : index
    %c0_63 = arith.constant 0 : index
    %61 = vector.load %arg4[%c7, %c0_62, %c0_63] : memref<9x8x8xbf16, #tpu.memory_space<vmem>>, vector<1x8x8xbf16>
    %62 = vector.shape_cast %61 : vector<1x8x8xbf16> to vector<8x8xbf16>
    %cst_64 = arith.constant dense<0.000000e+00> : vector<256x8xf32>
    %63 = tpu.matmul %60, %62, %cst_64 {dimension_numbers = #tpu.dot_dimension_numbers<[1], [0], [0], [1], [0, 0, 1, 1], [], []>} : vector<256x8xbf16>, vector<8x8xbf16>, vector<256x8xf32> -> vector<256x8xf32>
    %64 = arith.addf %58, %63 : vector<256x8xf32>
    %c2_65 = arith.constant 2 : index
    %c2_66 = arith.constant 2 : index
    %c0_67 = arith.constant 0 : index
    %65 = vector.load %arg11[%c2_65, %c2_66, %c0_67] : memref<18x18x8xbf16, #tpu.memory_space<vmem>>, vector<16x16x8xbf16>
    %66 = vector.shape_cast %65 : vector<16x16x8xbf16> to vector<256x8xbf16>
    %c8 = arith.constant 8 : index
    %c0_68 = arith.constant 0 : index
    %c0_69 = arith.constant 0 : index
    %67 = vector.load %arg4[%c8, %c0_68, %c0_69] : memref<9x8x8xbf16, #tpu.memory_space<vmem>>, vector<1x8x8xbf16>
    %68 = vector.shape_cast %67 : vector<1x8x8xbf16> to vector<8x8xbf16>
    %cst_70 = arith.constant dense<0.000000e+00> : vector<256x8xf32>
    %69 = tpu.matmul %66, %68, %cst_70 {dimension_numbers = #tpu.dot_dimension_numbers<[1], [0], [0], [1], [0, 0, 1, 1], [], []>} : vector<256x8xbf16>, vector<8x8xbf16>, vector<256x8xf32> -> vector<256x8xf32>
    %70 = arith.addf %64, %69 : vector<256x8xf32>
    %c0_71 = arith.constant 0 : index
    %c0_72 = arith.constant 0 : index
    %71 = vector.load %arg5[%c0_71, %c0_72] : memref<1x8xf32, #tpu.memory_space<vmem>>, vector<1x8xf32>
    %72 = vector.broadcast %71 : vector<1x8xf32> to vector<256x8xf32>
    %73 = arith.addf %70, %72 : vector<256x8xf32>
    %cst_73 = arith.constant 0.000000e+00 : f32
    %74 = vector.broadcast %cst_73 : f32 to vector<256x8xf32>
    %75 = arith.maximumf %73, %74 : vector<256x8xf32>
    %76 = arith.truncf %75 : vector<256x8xf32> to vector<256x8xbf16>
    %c0_74 = arith.constant 0 : index
    %c0_75 = arith.constant 0 : index
    %77 = vector.load %arg6[%c0_74, %c0_75] : memref<8x20xbf16, #tpu.memory_space<vmem>>, vector<8x20xbf16>
    %cst_76 = arith.constant dense<0.000000e+00> : vector<256x20xf32>
    %78 = tpu.matmul %76, %77, %cst_76 {dimension_numbers = #tpu.dot_dimension_numbers<[1], [0], [0], [1], [0, 0, 1, 1], [], []>} : vector<256x8xbf16>, vector<8x20xbf16>, vector<256x20xf32> -> vector<256x20xf32>
    %c0_77 = arith.constant 0 : index
    %c0_78 = arith.constant 0 : index
    %79 = vector.load %arg7[%c0_77, %c0_78] : memref<1x20xf32, #tpu.memory_space<vmem>>, vector<1x20xf32>
    %80 = vector.broadcast %79 : vector<1x20xf32> to vector<256x20xf32>
    %81 = arith.addf %78, %80 : vector<256x20xf32>
    %cst_79 = arith.constant 0.000000e+00 : f32
    %82 = vector.broadcast %cst_79 : f32 to vector<256x20xf32>
    %83 = arith.maximumf %81, %82 : vector<256x20xf32>
    %c0_80 = arith.constant 0 : index
    %c0_81 = arith.constant 0 : index
    %84 = vector.load %arg8[%c0_80, %c0_81] : memref<4x20xf32, #tpu.memory_space<vmem>>, vector<4x20xf32>
    %cst_82 = arith.constant dense<0.000000e+00> : vector<256x20xf32>
    %85 = tpu.matmul %2, %84, %cst_82 {dimension_numbers = #tpu.dot_dimension_numbers<[1], [0], [0], [1], [0, 0, 1, 1], [], []>} : vector<256x4xf32>, vector<4x20xf32>, vector<256x20xf32> -> vector<256x20xf32>
    %c0_83 = arith.constant 0 : index
    %c0_84 = arith.constant 0 : index
    %86 = vector.load %arg9[%c0_83, %c0_84] : memref<1x20xf32, #tpu.memory_space<vmem>>, vector<1x20xf32>
    %87 = vector.broadcast %86 : vector<1x20xf32> to vector<256x20xf32>
    %88 = arith.addf %85, %87 : vector<256x20xf32>
    %89 = vector.extract_strided_slice %88 {offsets = [0, 0], sizes = [256, 16], strides = [1, 1]} : vector<256x20xf32> to vector<256x16xf32>
    %90 = vector.extract_strided_slice %83 {offsets = [0, 0], sizes = [256, 16], strides = [1, 1]} : vector<256x20xf32> to vector<256x16xf32>
    %91 = arith.addf %89, %90 : vector<256x16xf32>
    %92 = vector.extract_strided_slice %88 {offsets = [0, 16], sizes = [256, 4], strides = [1, 1]} : vector<256x20xf32> to vector<256x4xf32>
    %93 = vector.extract_strided_slice %83 {offsets = [0, 16], sizes = [256, 4], strides = [1, 1]} : vector<256x20xf32> to vector<256x4xf32>
    %94 = tpu.concatenate %91, %92, %93 in 1 : vector<256x16xf32>, vector<256x4xf32>, vector<256x4xf32> -> vector<256x24xf32>
    %cst_85 = arith.constant 0.000000e+00 : f32
    %95 = vector.broadcast %cst_85 : f32 to vector<256x24xf32>
    %96 = arith.maximumf %94, %95 : vector<256x24xf32>
    %97 = vector.shape_cast %96 : vector<256x24xf32> to vector<1x16x16x24xf32>
    %c0_86 = arith.constant 0 : index
    %c0_87 = arith.constant 0 : index
    %c0_88 = arith.constant 0 : index
    %c0_89 = arith.constant 0 : index
    %98 = vector.load %arg10[%c0_86, %c0_87, %c0_88, %c0_89] : memref<1x16x16x24xf32, #tpu.memory_space<vmem>>, vector<1x16x16x24xf32>
    tpu.vector_store %arg10[%c0_86, %c0_87, %c0_88, %c0_89], %97 {strides = array<i32>} : memref<1x16x16x24xf32, #tpu.memory_space<vmem>>, vector<1x16x16x24xf32>,
    return
  }
  func.func @transform_0(%arg0: i32) -> (i32, i32, i32, i32) {
    %c0_i32 = arith.constant 0 : i32
    %c0_i32_0 = arith.constant 0 : i32
    %c0_i32_1 = arith.constant 0 : i32
    %c0_i32_2 = arith.constant 0 : i32
    return %arg0, %c0_i32, %c0_i32_0, %c0_i32_1 : i32, i32, i32, i32
  }
  func.func @transform_1(%arg0: i32) -> (i32, i32) {
    %c0_i32 = arith.constant 0 : i32
    %c0_i32_0 = arith.constant 0 : i32
    %c0_i32_1 = arith.constant 0 : i32
    return %c0_i32, %c0_i32_0 : i32, i32
  }
  func.func @transform_2(%arg0: i32) -> (i32, i32) {
    %c0_i32 = arith.constant 0 : i32
    %c0_i32_0 = arith.constant 0 : i32
    %c0_i32_1 = arith.constant 0 : i32
    return %c0_i32, %c0_i32_0 : i32, i32
  }
  func.func @transform_3(%arg0: i32) -> (i32, i32, i32) {
    %c0_i32 = arith.constant 0 : i32
    %c0_i32_0 = arith.constant 0 : i32
    %c0_i32_1 = arith.constant 0 : i32
    %c0_i32_2 = arith.constant 0 : i32
    return %c0_i32, %c0_i32_0, %c0_i32_1 : i32, i32, i32
  }
  func.func @transform_4(%arg0: i32) -> (i32, i32) {
    %c0_i32 = arith.constant 0 : i32
    %c0_i32_0 = arith.constant 0 : i32
    %c0_i32_1 = arith.constant 0 : i32
    return %c0_i32, %c0_i32_0 : i32, i32
  }
  func.func @transform_5(%arg0: i32) -> (i32, i32) {
    %c0_i32 = arith.constant 0 : i32
    %c0_i32_0 = arith.constant 0 : i32
    %c0_i32_1 = arith.constant 0 : i32
    return %c0_i32, %c0_i32_0 : i32, i32
  }
  func.func @transform_6(%arg0: i32) -> (i32, i32) {
    %c0_i32 = arith.constant 0 : i32
    %c0_i32_0 = arith.constant 0 : i32
    %c0_i32_1 = arith.constant 0 : i32
    return %c0_i32, %c0_i32_0 : i32, i32
  }
  func.func @transform_7(%arg0: i32) -> (i32, i32) {
    %c0_i32 = arith.constant 0 : i32
    %c0_i32_0 = arith.constant 0 : i32
    %c0_i32_1 = arith.constant 0 : i32
    return %c0_i32, %c0_i32_0 : i32, i32
  }
  func.func @transform_8(%arg0: i32) -> (i32, i32) {
    %c0_i32 = arith.constant 0 : i32
    %c0_i32_0 = arith.constant 0 : i32
    %c0_i32_1 = arith.constant 0 : i32
    return %c0_i32, %c0_i32_0 : i32, i32
  }
  func.func @transform_9(%arg0: i32) -> (i32, i32, i32, i32) {
    %c0_i32 = arith.constant 0 : i32
    %c0_i32_0 = arith.constant 0 : i32
    %c0_i32_1 = arith.constant 0 : i32
    %c0_i32_2 = arith.constant 0 : i32
    return %arg0, %c0_i32, %c0_i32_0, %c0_i32_1 : i32, i32, i32, i32
  }
}

</mosaic_0001>

<bundles_post_ra>
// kernel: bottleneck_forward.1
= control target key start
LH: loop header
LB: loop body
LE: loop exit
PB: predicated region body
PF: predicated region fallthrough
CT: control target
= control target key end

     0   :  { %14 = vsyncpa [#allocation4], 0  ;;  %s8963_s0 = inlined_call_operand.vmem [shape: f32[2,16,16,4], index: 0, kind: input, shape index: {}]   ;;  %s8964_s1 = inlined_call_operand.vmem [shape: bf16[4,8], index: 1, kind: input, shape index: {}]   ;;  %s8965_s2 = inlined_call_operand.vmem [shape: f32[1,8], index: 2, kind: input, shape index: {}]   ;;  %s8966_s3 = inlined_call_operand.vmem [shape: bf16[9,8,8], index: 3, kind: input, shape index: {}]   ;;  %s8967_s4 = inlined_call_operand.vmem [shape: f32[1,8], index: 4, kind: input, shape index: {}]   ;;  %s8968_s5 = inlined_call_operand.vmem [shape: bf16[8,20], index: 5, kind: input, shape index: {}]   ;;  %s8969_s6 = inlined_call_operand.vmem [shape: f32[1,20], index: 6, kind: input, shape index: {}]   ;;  %s8970_s7 = inlined_call_operand.vmem [shape: f32[4,20], index: 7, kind: input, shape index: {}]   ;;  %s8971_s8 = inlined_call_operand.vmem [shape: f32[1,20], index: 8, kind: input, shape index: {}]   ;;  %s8972_s9 = inlined_call_operand.hbm [shape: f32[2,16,16,24], index: 9, kind: output, shape index: {}]  }
   0x1   :  { %16 = vsyncpa [#allocation4 + $0x1], 0  ;;  %s6569_s30 = smov 0   ;;  %s6571_s10 = smov 0  }
   0x2   :  { %s6573_s11 = smov 0   ;;  %s6575_s12 = smov 0  }
   0x3 LB: > { %s6590_s13 = sadd.s32 4294967295, %s6513_s12   ;;  %s5845_s14 = sadd.s32 4294967294, %s6513_s12   ;;  %s6513_s12 = sphi %s6575_s12, %s9072_s12   ;;  %s6509_s11 = sphi %s6573_s11, %s9071_s11   ;;  %s6505_s10 = sphi %s6571_s10, %s9070_s10   ;;  %s6501_s30 = sphi %s6569_s30, %s9069_s30  }
   0x4   : > { %s6594_s15 = sadd.s32 1, %s6513_s12   ;;  %s223_s16 = sadd.s32 1, %s6509_s11 }
   0x5   : > { %s220_s17 = ssub.s32 %s6513_s12, %s6594_s15  ;;  %p233_p0 = scmp.ne.s32.totalorder %s6509_s11, %s6505_s10 }
   0x6   : > { %p221_p1 = scmp.eq.s32.totalorder %s220_s17, 0  ;;  %p234_p2 = scmp.eq.s32.totalorder %s6590_s13, 1 }
   0x7   : > { %p239_p3 = scmp.ne.s32.totalorder %s6505_s10, %s6501_s30  ;;  %p240_p4 = scmp.eq.s32.totalorder %s5845_s14, 1 }
   0x8   : > { %s6605_s18 = scalar_select %p221_p1, %s6509_s11, %s223_s16  }
   0x9   : > { %p6607_p5 = por %p234_p2, %p233_p0  ;;  %p6611_p6 = por %p240_p4, %p239_p3 }
   0xa   : > { %p5848_p7 = scmp.ge.s32.totalorder %s6513_s12, 1  ;;  %p290_p8 = scmp.lt.s32.totalorder %s6513_s12, 3 }
   0xc   : > { %p291_p9 = pnand %p5848_p7, %p290_p8 }
   0xe   : > { %294 = sbr.rel (%p291_p9) target bundleno = 1342 (0x53e), region = 56 }
  0x13   : > { %v380_v0 = vld [vmem:[%s8964_s1] sm:$0x3]  ;;  %vm434_vm0 = vcmask 1041408   ;;  %p326_p10 = scmp.lt.s32.totalorder %s6590_s13, 1  ;;  %vm385_vm1 = vcmask 31744   ;;  %vm559_vm2 = vcmask 60416  }
  0x14   : > { %v436_v1 = vsel %vm434_vm0, %v380_v0, 0  ;;  %v6515_v22 = vmov 0   ;;  %v1120_v26 = vld [vmem:[%s8966_s3] sm:$0xf]  ;;  %vm1623_vm3 = vcmask 1043456   ;;  %vm1574_vm4 = vcmask 64512  }
  0x15   : > { %445 = vmatpush.bf16.msra.mxu0 %v436_v1  ;;  %s327_s23 = scalar_select %p326_p10, %s6590_s13, 1  ;;  %564 = vst.msk [vmem:[#allocation2 + $0xc] sm:$0xf] %vm559_vm2, %v6515_v22  ;;  %v1845_v27 = vsel %vm1623_vm3, %v1120_v26, 0  ;;  %v5981_v28 = vld [vmem:[%s8966_s3 + $0x8] sm:$0xf] }
  0x16   : > { %560 = vst.msk [vmem:[#allocation2] sm:$0xf] %vm559_vm2, %v6515_v22  ;;  %1854 = vmatpush.bf16.msra.mxu2 %v1845_v27  ;;  %v2198_v30 = vsel %vm1623_vm3, %v5981_v28, 0  ;;  %v5868_v32 = vld [vmem:[%s8966_s3 + $0x4] sm:$0xf]  ;;  %vm562_vm5 = vcmask 57344  }
  0x17   : > { %s6314_s24 = sshll.u32 %s327_s23, 8  ;;  %561 = vst.msk [vmem:[#allocation2 + $0x4] sm:$0xf] %vm559_vm2, %v6515_v22  ;;  %2207 = vmatpush.bf16.msra.mxu3 %v2198_v30  ;;  %v1625_v33 = vsel %vm1623_vm3, %v5868_v32, 0  ;;  %v6731_v39 = vld [vmem:[%s8965_s2] ss:$0 sm:$0xff] }
  0x18   : > { %s6625_s27 = scalar_lea.vmem %s8963_s0, %s6314_s24  ;;  %565 = vst.msk [vmem:[#allocation2 + $0x10] sm:$0xf] %vm559_vm2, %v6515_v22  ;;  %1634 = vmatpush.bf16.msra.mxu1 %v1625_v33  ;;  %vm1984_vm6 = vcmask 1042432   ;;  %vm1985_vm7 = vcmask 1046532   ;;  %vm972_vm8 = vsmask.f32 7938 }
  0x19   : > { %v332_v2 = vld [vmem:[%s6625_s27] sm:$0xff]  ;;  %v333_v3 = vld [vmem:[%s6625_s27 + $0x8] sm:$0xff]  ;;  %v334_v5 = vld [vmem:[%s6625_s27 + $0x10] sm:$0xff]  ;;  %567 = vst.msk [vmem:[#allocation2 + $0x18] sm:$0xf] %vm559_vm2, %v6515_v22  ;;  %s6516_s29 = smov 4  }
  0x1a   : > { %v364_v4 = vpack.c.bf16 %v333_v3, %v332_v2  ;;  %v335_v6 = vld [vmem:[%s6625_s27 + $0x18] sm:$0xff]  ;;  %v336_v8 = vld [vmem:[%s6625_s27 + $0x20] sm:$0xff]  ;;  %v337_v9 = vld [vmem:[%s6625_s27 + $0x28] sm:$0xff]  ;;  %568 = vst.msk [vmem:[#allocation2 + $0x1c] sm:$0xf] %vm559_vm2, %v6515_v22  ;;  %s6363_s17 = sshll.u32 %s6590_s13, 8 }
  0x1b   : > { %v365_v7 = vpack.c.bf16 %v335_v6, %v334_v5  ;;  %v366_v10 = vpack.c.bf16 %v337_v9, %v336_v8  ;;  %v338_v11 = vld [vmem:[%s6625_s27 + $0x30] sm:$0xff]  ;;  %v339_v12 = vld [vmem:[%s6625_s27 + $0x38] sm:$0xff]  ;;  %v340_v14 = vld [vmem:[%s6625_s27 + $0x40] sm:$0xff]  ;;  %570 = vst.msk [vmem:[#allocation2 + $0x24] sm:$0xf] %vm559_vm2, %v6515_v22  ;;  %s5779_s23 = scalar_lea.hbm %s8972_s9, %s6363_s17  ;;  %s6471_s17 = scalar_lea.hbm %s8972_s9, 512 }
  0x1c   : > { %5852 = vmatmul.msk.bf16.vlgmr.msra.gmra.mxu0 %vm385_vm1, %v364_v4  ;;  %v367_v13 = vpack.c.bf16 %v339_v12, %v338_v11  ;;  %v341_v15 = vld [vmem:[%s6625_s27 + $0x48] sm:$0xff]  ;;  %v342_v17 = vld [vmem:[%s6625_s27 + $0x50] sm:$0xff]  ;;  %v343_v18 = vld [vmem:[%s6625_s27 + $0x58] sm:$0xff]  ;;  %571 = vst.msk [vmem:[#allocation2 + $0x28] sm:$0xf] %vm559_vm2, %v6515_v22  ;;  %s5782_s25 = sshll.u32 %s5779_s23, 4  ;;  %s5783_s25 = int_to_ptr.hbm [resolvable:$true] %s5782_s25 }
  0x1d   : > { %v368_v16 = vpack.c.bf16 %v341_v15, %v340_v14  ;;  %v369_v19 = vpack.c.bf16 %v343_v18, %v342_v17  ;;  %v344_v20 = vld [vmem:[%s6625_s27 + $0x60] sm:$0xff]  ;;  %v345_v21 = vld [vmem:[%s6625_s27 + $0x68] sm:$0xff]  ;;  %573 = vst.msk [vmem:[#allocation2 + $0x30] sm:$0xf] %vm559_vm2, %v6515_v22  ;;  %v346_v24 = vld [vmem:[%s6625_s27 + $0x70] sm:$0xff]  ;;  %s6465_s26 = sshra.s32 %s5783_s25, 4  ;;  %s6466_s26 = int_to_ptr.hbm [resolvable:$true] %s6465_s26 }
  0x1e   : > { %v370_v23 = vpack.c.bf16 %v345_v21, %v344_v20  ;;  %574 = vst.msk [vmem:[#allocation2 + $0x34] sm:$0xf] %vm559_vm2, %v6515_v22  ;;  %v347_v25 = vld [vmem:[%s6625_s27 + $0x78] sm:$0xff]  ;;  %v6315_v31 = vld [vmem:[#allocation2] sm:$0xff]  ;;  %v349_v36 = vld [vmem:[%s6625_s27 + $0x88] sm:$0xff]  ;;  %s6467_s28 = scalar_lea.hbm %s6466_s26, 256  ;;  %p6472_p0 = scmp.lt.s32.totalorder %s6466_s26, %s8972_s9 }
  0x1f   : > { %576 = vst.msk [vmem:[#allocation2 + $0x3c] sm:$0xf] %vm559_vm2, %v6515_v22  ;;  %v371_v29 = vpack.c.bf16 %v347_v25, %v346_v24  ;;  %5949 = vmatmul.msk.bf16.vlgmr.msra.gmra.mxu2 %vm1574_vm4, %v6315_v31  ;;  %v1088_v34 = vld [vmem:[#allocation2] sm:$0xf]  ;;  %v1089_v40 = vld [vmem:[#allocation2 + $0x4] sm:$0xf]  ;;  %vm6753_vm9 = vmor %vm1984_vm6, %vm1985_vm7  ;;  %p6468_p11 = scmp.ne.s32.totalorder %s6466_s26, %s6467_s28  ;;  %p6473_p1 = scmp.lt.s32.totalorder %s6471_s17, %s6467_s28 }
  0x20   : > { %577 = vst.msk [vmem:[#allocation2 + $0x40] sm:$0xf] %vm559_vm2, %v6515_v22  ;;  %v348_v35 = vld [vmem:[%s6625_s27 + $0x80] sm:$0xff]  ;;  %v1141_v37 = vshrl.u32 %v1088_v34, 16  ;;  %v1144_v38 = vshll.u32 %v1088_v34, 16  ;;  %v1150_v45 = vshll.u32 %v1089_v40, 16  ;;  %vm6784_vm13 = vmand %vm559_vm2, %vm972_vm8 }
  0x21   : > { %579 = vst.msk [vmem:[#allocation2 + $0x48] sm:$0xf] %vm559_vm2, %v6515_v22  ;;  %v372_v41 = vpack.c.bf16 %v349_v36, %v348_v35  ;;  %v1154_v46 = vshrl.u32 %v1089_v40, 16  ;;  %v1936_v48 = vld [vmem:[#allocation2] sm:$0xe]  ;;  %v1989_v50 = vrot.slane %v1089_v40, 5  ;;  %p6469_p12 = pnand %p6468_p11, %p6607_p5  ;;  %p6474_p2 = por %p6473_p1, %p6472_p0 }
  0x22   : > { %580 = vst.msk [vmem:[#allocation2 + $0x4c] sm:$0xf] %vm559_vm2, %v6515_v22  ;;  %v1143_v43 = vrot.slane %v1141_v37, 4  ;;  %v1146_v44 = vrot.slane %v1144_v38, 5  ;;  %v5965_v51 = vrot.slane %v1936_v48, 9  ;;  %v1152_v53 = vrot.slane %v1150_v45, 5 }
  0x23   : > { %582 = vst.msk [vmem:[#allocation2 + $0x54] sm:$0xf] %vm559_vm2, %v6515_v22  ;;  %v1156_v54 = vrot.slane %v1154_v46, 4  ;;  %vm1137_vm10 = vsmask.f32 3328  ;;  %v1991_v58 = vrot.slane %v1989_v50, 4  ;;  %p6470_p13 = pneg %p6469_p12 }
  0x24   : > { %583 = vst.msk [vmem:[#allocation2 + $0x58] sm:$0xf] %vm559_vm2, %v6515_v22  ;;  %v1147_v52 = vor.u32 %v1146_v44, %v1143_v43  ;;  %vm1138_vm11 = vsmask.f32 7440  ;;  %v5998_v59 = vld [vmem:[%s8966_s3 + $0xc] sm:$0xf]  ;;  %v1990_v61 = vsel %vm6753_vm9, %v5965_v51, %v1989_v50 }
  0x25   : > { %585 = vst.msk [vmem:[#allocation2 + $0x60] sm:$0xf] %vm559_vm2, %v6515_v22  ;;  %v1157_v63 = vor.u32 %v1156_v54, %v1152_v53  ;;  %v2484_v0 = vsel %vm1623_vm3, %v5998_v59, 0  ;;  %v6079_v1 = vld [vmem:[%s8966_s3 + $0x10] sm:$0xf]  ;;  %vm6777_vm12 = vmor %vm1137_vm10, %vm1138_vm11  ;;  %v351_v15 = vld [vmem:[%s6625_s27 + $0x98] sm:$0xff]  ;;  %p6475_p3 = pnand %p6474_p2, %p6470_p13 }
  0x26   : > { %586 = vst.msk [vmem:[#allocation2 + $0x64] sm:$0xf] %vm559_vm2, %v6515_v22  ;;  %v1148_v62 = vrot.slane %v1147_v52, 4  ;;  %2493 = vmatpush.bf16.msrb.mxu0 %v2484_v0  ;;  %v3138_v6 = vsel %vm1623_vm3, %v6079_v1, 0  ;;  %v974_v8 = vld [vmem:[#allocation2 + $0xc] sm:$0xf] }
  0x27   : > { %588 = vst.msk [vmem:[#allocation2 + $0x6c] sm:$0xf] %vm559_vm2, %v6515_v22  ;;  %3147 = vmatpush.bf16.msrb.mxu1 %v3138_v6  ;;  %v350_v14 = vld [vmem:[%s6625_s27 + $0x90] sm:$0xff]  ;;  %v1158_v17 = vrot.slane %v1157_v63, 4  ;;  %vm647_vm14 = vsmask.f32 256 }
  0x28   : > { %589 = vst.msk [vmem:[#allocation2 + $0x70] sm:$0xf] %vm559_vm2, %v6515_v22  ;;  %vm648_vm15 = vsmask.f32 4368  ;;  %v373_v26 = vpack.c.bf16 %v351_v15, %v350_v14  ;;  %vm6820_vm6 = vmand %vm562_vm5, %vm647_vm14  ;;  %v983_v54 = vld [vmem:[#allocation2 + $0x18] sm:$0xf] }
  0x29   : > { %591 = vst.msk [vmem:[#allocation2 + $0x78] sm:$0xf] %vm559_vm2, %v6515_v22  ;;  %vm6811_vm0 = vmor %vm647_vm14, %vm648_vm15 }
  0x2a   : > { %592 = vst.msk [vmem:[#allocation2 + $0x7c] sm:$0xf] %vm559_vm2, %v6515_v22 }
  0x2b   : > { %594 = vst.msk [vmem:[#allocation2 + $0x84] sm:$0xf] %vm559_vm2, %v6515_v22 }
  0x2c   : > { %5853 = vmatmul.msk.bf16.gmra.mxu0 %vm385_vm1, %v365_v7  ;;  %595 = vst.msk [vmem:[#allocation2 + $0x88] sm:$0xf] %vm559_vm2, %v6515_v22 }
  0x2d   : > { %597 = vst.msk [vmem:[#allocation2 + $0x90] sm:$0xf] %vm559_vm2, %v6515_v22 }
  0x2e   : > { %598 = vst.msk [vmem:[#allocation2 + $0x94] sm:$0xf] %vm559_vm2, %v6515_v22 }
  0x2f   : > { %600 = vst.msk [vmem:[#allocation2 + $0x9c] sm:$0xf] %vm559_vm2, %v6515_v22 }
  0x30   : > { %601 = vst.msk [vmem:[#allocation2 + $0xa0] sm:$0xf] %vm559_vm2, %v6515_v22 }
  0x31   : > { %603 = vst.msk [vmem:[#allocation2 + $0xa8] sm:$0xf] %vm559_vm2, %v6515_v22 }
  0x32   : > { %604 = vst.msk [vmem:[#allocation2 + $0xac] sm:$0xf] %vm559_vm2, %v6515_v22 }
  0x33   : > { %606 = vst.msk [vmem:[#allocation2 + $0xb4] sm:$0xf] %vm559_vm2, %v6515_v22 }
  0x34   : > { %607 = vst.msk [vmem:[#allocation2 + $0xb8] sm:$0xf] %vm559_vm2, %v6515_v22 }
  0x35   : > { %609 = vst.msk [vmem:[#allocation2 + $0xc0] sm:$0xf] %vm559_vm2, %v6515_v22 }
  0x36   : > { %610 = vst.msk [vmem:[#allocation2 + $0xc4] sm:$0xf] %vm559_vm2, %v6515_v22 }
  0x37   : > { %612 = vst.msk [vmem:[#allocation2 + $0xcc] sm:$0xf] %vm559_vm2, %v6515_v22 }
  0x38   : > { %613 = vst.msk [vmem:[#allocation2 + $0xd0] sm:$0xf] %vm559_vm2, %v6515_v22 }
  0x39   : > { %566 = vst.msk [vmem:[#allocation2 + $0x14] sm:$0x1] %vm562_vm5, %v6515_v22 }
  0x3a   : > { %563 = vst.msk [vmem:[#allocation2 + $0x8] sm:$0x1] %vm562_vm5, %v6515_v22 }
  0x3b   : > { %569 = vst.msk [vmem:[#allocation2 + $0x20] sm:$0x1] %vm562_vm5, %v6515_v22 }
  0x3c   : > { %5854 = vmatmul.msk.bf16.gmra.mxu0 %vm385_vm1, %v366_v10  ;;  %572 = vst.msk [vmem:[#allocation2 + $0x2c] sm:$0x1] %vm562_vm5, %v6515_v22 }
  0x3d   : > { %575 = vst.msk [vmem:[#allocation2 + $0x38] sm:$0x1] %vm562_vm5, %v6515_v22 }
  0x3e   : > { %578 = vst.msk [vmem:[#allocation2 + $0x44] sm:$0x1] %vm562_vm5, %v6515_v22 }
  0x3f   : > { %581 = vst.msk [vmem:[#allocation2 + $0x50] sm:$0x1] %vm562_vm5, %v6515_v22 }
  0x40   : > { %584 = vst.msk [vmem:[#allocation2 + $0x5c] sm:$0x1] %vm562_vm5, %v6515_v22  ;;  %v980_v38 = vld [vmem:[#allocation2 + $0x14] sm:$0x1] }
  0x41   : > { %587 = vst.msk [vmem:[#allocation2 + $0x68] sm:$0x1] %vm562_vm5, %v6515_v22  ;;  %v1121_v9 = vld [vmem:[#allocation2 + $0x8] sm:$0x1] }
  0x42   : > { %590 = vst.msk [vmem:[#allocation2 + $0x74] sm:$0x1] %vm562_vm5, %v6515_v22  ;;  %v1992_v12 = vrot.slane %v1121_v9, 5  ;;  %v1160_v18 = vshll.u32 %v1121_v9, 16 }
  0x43   : > { %593 = vst.msk [vmem:[#allocation2 + $0x80] sm:$0x1] %vm562_vm5, %v6515_v22 }
  0x44   : > { %596 = vst.msk [vmem:[#allocation2 + $0x8c] sm:$0x1] %vm562_vm5, %v6515_v22  ;;  %v1993_v21 = vsel %vm6753_vm9, %v1991_v58, %v1992_v12  ;;  %v1162_v24 = vrot.slane %v1160_v18, 5 }
  0x45   : > { %599 = vst.msk [vmem:[#allocation2 + $0x98] sm:$0x1] %vm562_vm5, %v6515_v22 }
  0x46   : > { %602 = vst.msk [vmem:[#allocation2 + $0xa4] sm:$0x1] %vm562_vm5, %v6515_v22  ;;  %v1163_v30 = vsel %vm6777_vm12, %v1158_v17, %v1162_v24  ;;  %v987_v24 = vld [vmem:[#allocation2 + $0x20] sm:$0x1] }
  0x47   : > { %605 = vst.msk [vmem:[#allocation2 + $0xb0] sm:$0x1] %vm562_vm5, %v6515_v22  ;;  %v1527_v35 = vunpack.c.l.b16 %v1163_v30 }
  0x48   : > { %608 = vst.msk [vmem:[#allocation2 + $0xbc] sm:$0x1] %vm562_vm5, %v6515_v22 }
  0x49   : > { %611 = vst.msk [vmem:[#allocation2 + $0xc8] sm:$0x1] %vm562_vm5, %v6515_v22 }
  0x4a   : > { %614 = vst.msk [vmem:[#allocation2 + $0xd4] sm:$0x1] %vm562_vm5, %v6515_v22 }
  0x4c   : > { %5855 = vmatmul.msk.bf16.gmra.mxu0 %vm385_vm1, %v367_v13  ;;  %v2101_v13 = vunpack.c.l.b16 %v1990_v61  ;;  %v352_v61 = vld [vmem:[%s6625_s27 + $0xa0] sm:$0xff] }
  0x5c   : > { %5856 = vmatmul.msk.bf16.gmra.mxu0 %vm385_vm1, %v368_v16  ;;  %v1153_v16 = vsel %vm6777_vm12, %v1148_v62, %v1152_v53  ;;  %v353_v62 = vld [vmem:[%s6625_s27 + $0xa8] sm:$0xff] }
  0x5d   : > { %v1526_v27 = vunpack.c.l.b16 %v1153_v16  ;;  %v374_v12 = vpack.c.bf16 %v353_v62, %v352_v61  ;;  %v354_v61 = vld [vmem:[%s6625_s27 + $0xb0] sm:$0xff]  ;;  %v355_v62 = vld [vmem:[%s6625_s27 + $0xb8] sm:$0xff] }
  0x5f   : > { %v1558_v43 = vpack.c.b16 %v1527_v35, %v1526_v27 }
  0x61   : > { %5869 = vmatmul.msk.bf16.vlgmr.msra.gmra.mxu1 %vm1574_vm4, %v1558_v43 }
  0x6c   : > { %5857 = vmatmul.msk.bf16.gmra.mxu0 %vm385_vm1, %v369_v19 }
  0x7c   : > { %5858 = vmatmul.msk.bf16.gmra.mxu0 %vm385_vm1, %v370_v23  ;;  %v2102_v23 = vunpack.c.l.b16 %v1993_v21 }
  0x7e   : > { %v2133_v28 = vpack.c.b16 %v2102_v23, %v2101_v13 }
  0x80   : > { %5982 = vmatmul.msk.bf16.vlgmr.msra.gmra.mxu3 %vm1574_vm4, %v2133_v28 }
  0x8c   : > { %5859 = vmatmul.msk.bf16.gmra.mxu0 %vm385_vm1, %v371_v29 }
  0x99   : > { %v447_v42 = vpop.f32.mrf.mxu0 }
  0x9a   : > { %v448_v47 = vadd.f32 %v6731_v39, %v447_v42 }
  0x9c   : > { %v527_v49 = vmax.f32 %v448_v47, 0.0  ;;  %5860 = vmatmul.msk.bf16.gmra.mxu0 %vm385_vm1, %v372_v41 }
  0x9e   : > { %v615_v55 = vpack.c.bf16 %v527_v49, %v527_v49 }
  0xa0   : > { %v651_v57 = vshrl.u32 %v615_v55, 16  ;;  %v654_v3 = vshll.u32 %v615_v55, 16 }
  0xa1   : > { %v449_v60 = vpop.f32.mrf.mxu0 }
  0xa2   : > { %v653_v2 = vrot.slane %v651_v57, 7  ;;  %v450_v4 = vadd.f32 %v6731_v39, %v449_v60 }
  0xa4   : > { %v656_v10 = vor.u32 %v654_v3, %v653_v2  ;;  %v528_v11 = vmax.f32 %v450_v4, 0.0  ;;  %v657_v36 = vrot.slane %v653_v2, 4 }
  0xa6   : > { %v975_v19 = vsel %vm6784_vm13, %v656_v10, %v974_v8  ;;  %v616_v20 = vpack.c.bf16 %v528_v11, %v528_v11 }
  0xa7   : > { %976 = vst [vmem:[#allocation2 + $0xc] sm:$0xf] %v975_v19 }
  0xa8   : > { %v659_v25 = vshrl.u32 %v616_v20, 16  ;;  %v662_v33 = vshll.u32 %v616_v20, 16 }
  0xa9   : > { %v452_v29 = vpop.f32.mrf.mxu0 }
  0xaa   : > { %v661_v32 = vrot.slane %v659_v25, 7  ;;  %v453_v34 = vadd.f32 %v6731_v39, %v452_v29 }
  0xac   : > { %v664_v40 = vor.u32 %v662_v33, %v661_v32  ;;  %v666_v41 = vrot.slane %v661_v32, 4  ;;  %v529_v42 = vmax.f32 %v453_v34, 0.0  ;;  %5861 = vmatmul.msk.bf16.gmra.mxu0 %vm385_vm1, %v373_v26 }
  0xae   : > { %v665_v44 = vsel %vm6811_vm0, %v657_v36, %v664_v40  ;;  %v981_v45 = vsel %vm6820_vm6, %v666_v41, %v980_v38  ;;  %v617_v46 = vpack.c.bf16 %v529_v42, %v529_v42  ;;  %v1090_v47 = vld [vmem:[#allocation2 + $0xc] sm:$0xf] }
  0xaf   : > { %977 = vst.msk [vmem:[#allocation2 + $0x10] sm:$0xf] %vm559_vm2, %v665_v44  ;;  %v1165_v48 = vshrl.u32 %v1090_v47, 16  ;;  %v1168_v50 = vshll.u32 %v1090_v47, 16  ;;  %v1937_v55 = vld [vmem:[#allocation2 + $0xc] sm:$0xe] }
  0xb0   : > { %982 = vst [vmem:[#allocation2 + $0x14] sm:$0x1] %v981_v45  ;;  %v668_v49 = vshrl.u32 %v617_v46, 16  ;;  %v671_v52 = vshll.u32 %v617_v46, 16  ;;  %v5966_v3 = vrot.slane %v1937_v55, 9 }
  0xb1   : > { %v454_v51 = vpop.f32.mrf.mxu0  ;;  %v1167_v57 = vrot.slane %v1165_v48, 4  ;;  %v1170_v58 = vrot.slane %v1168_v50, 5  ;;  %v990_v55 = vld [vmem:[#allocation2 + $0x24] sm:$0xf] }
  0xb2   : > { %v670_v22 = vrot.slane %v668_v49, 7  ;;  %v455_v53 = vadd.f32 %v6731_v39, %v454_v51 }
  0xb3   : > { %v1171_v8 = vor.u32 %v1170_v58, %v1167_v57 }
  0xb4   : > { %v673_v59 = vor.u32 %v671_v52, %v670_v22  ;;  %v530_v60 = vmax.f32 %v455_v53, 0.0  ;;  %v674_v10 = vrot.slane %v670_v22, 4 }
  0xb5   : > { %v1172_v27 = vrot.slane %v1171_v8, 4 }
  0xb6   : > { %v984_v63 = vsel %vm6784_vm13, %v673_v59, %v983_v54  ;;  %v618_v0 = vpack.c.bf16 %v530_v60, %v530_v60  ;;  %v6316_v1 = vld [vmem:[#allocation2 + $0xc] sm:$0xff] }
  0xb7   : > { %v1091_v2 = vld [vmem:[#allocation2 + $0x10] sm:$0xf]  ;;  %985 = vst [vmem:[#allocation2 + $0x18] sm:$0xf] %v984_v63  ;;  %v1122_v4 = vld [vmem:[#allocation2 + $0x14] sm:$0x1]  ;;  %5950 = vmatmul.msk.bf16.gmra.mxu2 %vm1574_vm4, %v6316_v1 }
  0xb8   : > { %v1996_v6 = vrot.slane %v1091_v2, 5  ;;  %v1174_v9 = vshll.u32 %v1091_v2, 16  ;;  %v676_v11 = vshrl.u32 %v618_v0, 16  ;;  %v1178_v13 = vshrl.u32 %v1091_v2, 16 }
  0xb9   : > { %v457_v14 = vpop.f32.mrf.mxu0  ;;  %v1999_v17 = vrot.slane %v1122_v4, 5  ;;  %v679_v20 = vshll.u32 %v618_v0, 16  ;;  %v1184_v28 = vshll.u32 %v1122_v4, 16 }
  0xba   : > { %v1997_v15 = vsel %vm6753_vm9, %v5966_v3, %v1996_v6  ;;  %v1998_v16 = vrot.slane %v1996_v6, 4  ;;  %v1176_v18 = vrot.slane %v1174_v9, 5  ;;  %v678_v19 = vrot.slane %v676_v11, 7 }
  0xbb   : > { %v458_v21 = vadd.f32 %v6731_v39, %v457_v14  ;;  %v1180_v23 = vrot.slane %v1178_v13, 4  ;;  %v2103_v26 = vunpack.c.l.b16 %v1997_v15  ;;  %v1186_v44 = vrot.slane %v1184_v28, 5 }
  0xbc   : > { %v2000_v25 = vsel %vm6753_vm9, %v1998_v16, %v1999_v17  ;;  %v681_v29 = vor.u32 %v679_v20, %v678_v19  ;;  %v683_v30 = vrot.slane %v678_v19, 4  ;;  %5862 = vmatmul.msk.bf16.gmra.mxu0 %vm385_vm1, %v374_v12  ;;  %v1177_v34 = vsel %vm6777_vm12, %v1172_v27, %v1176_v18 }
  0xbd   : > { %v531_v32 = vmax.f32 %v458_v21, 0.0  ;;  %v2104_v33 = vunpack.c.l.b16 %v2000_v25  ;;  %v1181_v35 = vor.u32 %v1180_v23, %v1176_v18  ;;  %v1528_v51 = vunpack.c.l.b16 %v1177_v34  ;;  %v994_v25 = vld [vmem:[#allocation2 + $0x2c] sm:$0x1] }
  0xbe   : > { %v682_v36 = vsel %vm6811_vm0, %v674_v10, %v681_v29  ;;  %v988_v38 = vsel %vm6820_vm6, %v683_v30, %v987_v24  ;;  %v1092_v42 = vld [vmem:[#allocation2 + $0x18] sm:$0xf]  ;;  %v375_v6 = vpack.c.bf16 %v355_v62, %v354_v61  ;;  %v356_v62 = vld [vmem:[%s6625_s27 + $0xc0] sm:$0xff] }
  0xbf   : > { %v619_v40 = vpack.c.bf16 %v531_v32, %v531_v32  ;;  %v2134_v41 = vpack.c.b16 %v2104_v33, %v2103_v26  ;;  %986 = vst.msk [vmem:[#allocation2 + $0x1c] sm:$0xf] %vm559_vm2, %v682_v36  ;;  %v1182_v43 = vrot.slane %v1181_v35, 4  ;;  %v1189_v46 = vshrl.u32 %v1092_v42, 16  ;;  %v1938_v63 = vld [vmem:[#allocation2 + $0x18] sm:$0xe] }
  0xc0   : > { %989 = vst [vmem:[#allocation2 + $0x20] sm:$0x1] %v988_v38  ;;  %v1192_v47 = vshll.u32 %v1092_v42, 16  ;;  %v5967_v9 = vrot.slane %v1938_v63, 9  ;;  %v357_v63 = vld [vmem:[%s6625_s27 + $0xc8] sm:$0xff] }
  0xc1   : > { %v685_v45 = vshrl.u32 %v619_v40, 16  ;;  %5983 = vmatmul.msk.bf16.gmra.mxu3 %vm1574_vm4, %v2134_v41  ;;  %v688_v48 = vshll.u32 %v619_v40, 16  ;;  %v459_v49 = vpop.f32.mrf.mxu0  ;;  %v1187_v50 = vsel %vm6777_vm12, %v1182_v43, %v1186_v44  ;;  %v1191_v54 = vrot.slane %v1189_v46, 4 }
  0xc2   : > { %v460_v52 = vadd.f32 %v6731_v39, %v459_v49  ;;  %v1529_v53 = vunpack.c.l.b16 %v1187_v50  ;;  %v1194_v57 = vrot.slane %v1192_v47, 5 }
  0xc3   : > { %v687_v22 = vrot.slane %v685_v45, 7 }
  0xc4   : > { %v532_v59 = vmax.f32 %v460_v52, 0.0  ;;  %v1559_v60 = vpack.c.b16 %v1529_v53, %v1528_v51  ;;  %v1195_v0 = vor.u32 %v1194_v57, %v1191_v54  ;;  %v997_v57 = vld [vmem:[#allocation2 + $0x30] sm:$0xf] }
  0xc5   : > { %v690_v58 = vor.u32 %v688_v48, %v687_v22  ;;  %v691_v11 = vrot.slane %v687_v22, 4 }
  0xc6   : > { %v620_v2 = vpack.c.bf16 %v532_v59, %v532_v59  ;;  %5870 = vmatmul.msk.bf16.gmra.mxu1 %vm1574_vm4, %v1559_v60  ;;  %v6317_v3 = vld [vmem:[#allocation2 + $0x18] sm:$0xff]  ;;  %v1196_v13 = vrot.slane %v1195_v0, 4 }
  0xc7   : > { %v991_v1 = vsel %vm6784_vm13, %v690_v58, %v990_v55  ;;  %v1093_v4 = vld [vmem:[#allocation2 + $0x1c] sm:$0xf]  ;;  %v1123_v8 = vld [vmem:[#allocation2 + $0x20] sm:$0x1]  ;;  %5951 = vmatmul.msk.bf16.gmra.mxu2 %vm1574_vm4, %v6317_v3 }
  0xc8   : > { %992 = vst [vmem:[#allocation2 + $0x24] sm:$0xf] %v991_v1  ;;  %v2003_v10 = vrot.slane %v1093_v4, 5  ;;  %v693_v12 = vshrl.u32 %v620_v2, 16  ;;  %v1198_v14 = vshll.u32 %v1093_v4, 16  ;;  %v2006_v18 = vrot.slane %v1123_v8, 5 }
  0xc9   : > { %v462_v15 = vpop.f32.mrf.mxu0  ;;  %v1202_v19 = vshrl.u32 %v1093_v4, 16  ;;  %v696_v21 = vshll.u32 %v620_v2, 16  ;;  %v1208_v29 = vshll.u32 %v1123_v8, 16  ;;  %v376_v8 = vpack.c.bf16 %v357_v63, %v356_v62  ;;  %v358_v63 = vld [vmem:[%s6625_s27 + $0xd0] sm:$0xff] }
  0xca   : > { %v2004_v16 = vsel %vm6753_vm9, %v5967_v9, %v2003_v10  ;;  %v2005_v17 = vrot.slane %v2003_v10, 4  ;;  %v695_v20 = vrot.slane %v693_v12, 7  ;;  %v463_v23 = vadd.f32 %v6731_v39, %v462_v15 }
  0xcb   : > { %v1200_v24 = vrot.slane %v1198_v14, 5  ;;  %v2105_v27 = vunpack.c.l.b16 %v2004_v16  ;;  %v1204_v28 = vrot.slane %v1202_v19, 4  ;;  %v1210_v45 = vrot.slane %v1208_v29, 5 }
  0xcc   : > { %v2007_v26 = vsel %vm6753_vm9, %v2005_v17, %v2006_v18  ;;  %v698_v30 = vor.u32 %v696_v21, %v695_v20  ;;  %v700_v32 = vrot.slane %v695_v20, 4  ;;  %v533_v33 = vmax.f32 %v463_v23, 0.0  ;;  %5863 = vmatmul.msk.bf16.gmra.mxu0 %vm385_vm1, %v375_v6 }
  0xcd   : > { %v2106_v34 = vunpack.c.l.b16 %v2007_v26  ;;  %v1201_v35 = vsel %vm6777_vm12, %v1196_v13, %v1200_v24  ;;  %v1205_v36 = vor.u32 %v1204_v28, %v1200_v24  ;;  %v1001_v26 = vld [vmem:[#allocation2 + $0x38] sm:$0x1] }
  0xce   : > { %v699_v38 = vsel %vm6811_vm0, %v691_v11, %v698_v30  ;;  %v995_v40 = vsel %vm6820_vm6, %v700_v32, %v994_v25  ;;  %v621_v41 = vpack.c.bf16 %v533_v33, %v533_v33  ;;  %v1530_v22 = vunpack.c.l.b16 %v1201_v35 }
  0xcf   : > { %v2135_v42 = vpack.c.b16 %v2106_v34, %v2105_v27  ;;  %v1094_v43 = vld [vmem:[#allocation2 + $0x24] sm:$0xf]  ;;  %993 = vst.msk [vmem:[#allocation2 + $0x28] sm:$0xf] %vm559_vm2, %v699_v38  ;;  %v1206_v44 = vrot.slane %v1205_v36, 4 }
  0xd0   : > { %996 = vst [vmem:[#allocation2 + $0x2c] sm:$0x1] %v995_v40  ;;  %v702_v46 = vshrl.u32 %v621_v41, 16  ;;  %v1213_v47 = vshrl.u32 %v1094_v43, 16  ;;  %v1216_v48 = vshll.u32 %v1094_v43, 16  ;;  %v705_v49 = vshll.u32 %v621_v41, 16 }
  0xd1   : > { %5984 = vmatmul.msk.bf16.gmra.mxu3 %vm1574_vm4, %v2135_v42  ;;  %v464_v50 = vpop.f32.mrf.mxu0  ;;  %v1211_v51 = vsel %vm6777_vm12, %v1206_v44, %v1210_v45  ;;  %v1939_v0 = vld [vmem:[#allocation2 + $0x24] sm:$0xe] }
  0xd2   : > { %v704_v52 = vrot.slane %v702_v46, 7  ;;  %v465_v53 = vadd.f32 %v6731_v39, %v464_v50  ;;  %v1531_v54 = vunpack.c.l.b16 %v1211_v51  ;;  %v1215_v55 = vrot.slane %v1213_v47, 4 }
  0xd3   : > { %v1218_v58 = vrot.slane %v1216_v48, 5  ;;  %v5968_v10 = vrot.slane %v1939_v0, 9  ;;  %v359_v0 = vld [vmem:[%s6625_s27 + $0xd8] sm:$0xff] }
  0xd4   : > { %v707_v59 = vor.u32 %v705_v49, %v704_v52  ;;  %v534_v60 = vmax.f32 %v465_v53, 0.0  ;;  %v1560_v61 = vpack.c.b16 %v1531_v54, %v1530_v22  ;;  %v708_v12 = vrot.slane %v704_v52, 4 }
  0xd5   : > { %v1219_v1 = vor.u32 %v1218_v58, %v1215_v55  ;;  %v1004_v58 = vld [vmem:[#allocation2 + $0x3c] sm:$0xf] }
  0xd6   : > { %v998_v2 = vsel %vm6784_vm13, %v707_v59, %v997_v57  ;;  %v622_v3 = vpack.c.bf16 %v534_v60, %v534_v60  ;;  %5871 = vmatmul.msk.bf16.gmra.mxu1 %vm1574_vm4, %v1560_v61  ;;  %v6318_v4 = vld [vmem:[#allocation2 + $0x24] sm:$0xff] }
  0xd7   : > { %v1095_v6 = vld [vmem:[#allocation2 + $0x28] sm:$0xf]  ;;  %999 = vst [vmem:[#allocation2 + $0x30] sm:$0xf] %v998_v2  ;;  %v1124_v9 = vld [vmem:[#allocation2 + $0x2c] sm:$0x1]  ;;  %5952 = vmatmul.msk.bf16.gmra.mxu2 %vm1574_vm4, %v6318_v4 }
  0xd8   : > { %v2010_v11 = vrot.slane %v1095_v6, 5  ;;  %v710_v13 = vshrl.u32 %v622_v3, 16  ;;  %v1220_v14 = vrot.slane %v1219_v1, 4  ;;  %v1222_v15 = vshll.u32 %v1095_v6, 16 }
  0xd9   : > { %v467_v16 = vpop.f32.mrf.mxu0  ;;  %v2013_v19 = vrot.slane %v1124_v9, 5  ;;  %v1226_v20 = vshrl.u32 %v1095_v6, 16  ;;  %v713_v23 = vshll.u32 %v622_v3, 16  ;;  %v1232_v30 = vshll.u32 %v1124_v9, 16 }
  0xda   : > { %v2011_v17 = vsel %vm6753_vm9, %v5968_v10, %v2010_v11  ;;  %v2012_v18 = vrot.slane %v2010_v11, 4  ;;  %v712_v21 = vrot.slane %v710_v13, 7  ;;  %v468_v24 = vadd.f32 %v6731_v39, %v467_v16 }
  0xdb   : > { %v1224_v25 = vrot.slane %v1222_v15, 5  ;;  %v2107_v28 = vunpack.c.l.b16 %v2011_v17  ;;  %v1228_v29 = vrot.slane %v1226_v20, 4  ;;  %v1234_v46 = vrot.slane %v1232_v30, 5 }
  0xdc   : > { %v2014_v27 = vsel %vm6753_vm9, %v2012_v18, %v2013_v19  ;;  %v715_v32 = vor.u32 %v713_v23, %v712_v21  ;;  %v717_v33 = vrot.slane %v712_v21, 4  ;;  %v535_v34 = vmax.f32 %v468_v24, 0.0  ;;  %5864 = vmatmul.msk.bf16.gmra.mxu0 %vm385_vm1, %v376_v8 }
  0xdd   : > { %v2108_v35 = vunpack.c.l.b16 %v2014_v27  ;;  %v1225_v36 = vsel %vm6777_vm12, %v1220_v14, %v1224_v25  ;;  %v1229_v38 = vor.u32 %v1228_v29, %v1224_v25  ;;  %v377_v9 = vpack.c.bf16 %v359_v0, %v358_v63  ;;  %v1008_v27 = vld [vmem:[#allocation2 + $0x44] sm:$0x1] }
  0xde   : > { %v716_v40 = vsel %vm6811_vm0, %v708_v12, %v715_v32  ;;  %v1002_v41 = vsel %vm6820_vm6, %v717_v33, %v1001_v26  ;;  %v623_v42 = vpack.c.bf16 %v535_v34, %v535_v34  ;;  %v1096_v44 = vld [vmem:[#allocation2 + $0x30] sm:$0xf]  ;;  %v1532_v52 = vunpack.c.l.b16 %v1225_v36  ;;  %v360_v0 = vld [vmem:[%s6625_s27 + $0xe0] sm:$0xff] }
  0xdf   : > { %v2136_v43 = vpack.c.b16 %v2108_v35, %v2107_v28  ;;  %1000 = vst.msk [vmem:[#allocation2 + $0x34] sm:$0xf] %vm559_vm2, %v716_v40  ;;  %v1230_v45 = vrot.slane %v1229_v38, 4  ;;  %v1237_v48 = vshrl.u32 %v1096_v44, 16  ;;  %v1240_v49 = vshll.u32 %v1096_v44, 16 }
  0xe0   : > { %1003 = vst [vmem:[#allocation2 + $0x38] sm:$0x1] %v1002_v41  ;;  %v719_v47 = vshrl.u32 %v623_v42, 16  ;;  %v722_v50 = vshll.u32 %v623_v42, 16  ;;  %v1940_v1 = vld [vmem:[#allocation2 + $0x30] sm:$0xe] }
  0xe1   : > { %5985 = vmatmul.msk.bf16.gmra.mxu3 %vm1574_vm4, %v2136_v43  ;;  %v469_v51 = vpop.f32.mrf.mxu0  ;;  %v1235_v22 = vsel %vm6777_vm12, %v1230_v45, %v1234_v46  ;;  %v1239_v57 = vrot.slane %v1237_v48, 4  ;;  %v1242_v59 = vrot.slane %v1240_v49, 5  ;;  %v5969_v11 = vrot.slane %v1940_v1, 9  ;;  %v361_v1 = vld [vmem:[%s6625_s27 + $0xe8] sm:$0xff] }
  0xe2   : > { %v721_v53 = vrot.slane %v719_v47, 7  ;;  %v470_v54 = vadd.f32 %v6731_v39, %v469_v51  ;;  %v1533_v55 = vunpack.c.l.b16 %v1235_v22 }
  0xe3   : > { %v1243_v2 = vor.u32 %v1242_v59, %v1239_v57  ;;  %v1011_v59 = vld [vmem:[#allocation2 + $0x48] sm:$0xf] }
  0xe4   : > { %v724_v60 = vor.u32 %v722_v50, %v721_v53  ;;  %v536_v61 = vmax.f32 %v470_v54, 0.0  ;;  %v1561_v62 = vpack.c.b16 %v1533_v55, %v1532_v52  ;;  %v725_v13 = vrot.slane %v721_v53, 4 }
  0xe5   : > { %v1244_v15 = vrot.slane %v1243_v2, 4 }
  0xe6   : > { %v1005_v3 = vsel %vm6784_vm13, %v724_v60, %v1004_v58  ;;  %v624_v4 = vpack.c.bf16 %v536_v61, %v536_v61  ;;  %5872 = vmatmul.msk.bf16.gmra.mxu1 %vm1574_vm4, %v1561_v62  ;;  %v6319_v6 = vld [vmem:[#allocation2 + $0x30] sm:$0xff] }
  0xe7   : > { %v1097_v8 = vld [vmem:[#allocation2 + $0x34] sm:$0xf]  ;;  %1006 = vst [vmem:[#allocation2 + $0x3c] sm:$0xf] %v1005_v3  ;;  %v1125_v10 = vld [vmem:[#allocation2 + $0x38] sm:$0x1]  ;;  %5953 = vmatmul.msk.bf16.gmra.mxu2 %vm1574_vm4, %v6319_v6 }
  0xe8   : > { %v2017_v12 = vrot.slane %v1097_v8, 5  ;;  %v727_v14 = vshrl.u32 %v624_v4, 16  ;;  %v1246_v16 = vshll.u32 %v1097_v8, 16  ;;  %v2020_v20 = vrot.slane %v1125_v10, 5 }
  0xe9   : > { %v472_v17 = vpop.f32.mrf.mxu0  ;;  %v1250_v21 = vshrl.u32 %v1097_v8, 16  ;;  %v730_v24 = vshll.u32 %v624_v4, 16  ;;  %v1256_v32 = vshll.u32 %v1125_v10, 16  ;;  %v378_v10 = vpack.c.bf16 %v361_v1, %v360_v0  ;;  %v362_v1 = vld [vmem:[%s6625_s27 + $0xf0] sm:$0xff] }
  0xea   : > { %v2018_v18 = vsel %vm6753_vm9, %v5969_v11, %v2017_v12  ;;  %v2019_v19 = vrot.slane %v2017_v12, 4  ;;  %v729_v23 = vrot.slane %v727_v14, 7  ;;  %v473_v25 = vadd.f32 %v6731_v39, %v472_v17 }
  0xeb   : > { %v1248_v26 = vrot.slane %v1246_v16, 5  ;;  %v2109_v29 = vunpack.c.l.b16 %v2018_v18  ;;  %v1252_v30 = vrot.slane %v1250_v21, 4  ;;  %v1258_v47 = vrot.slane %v1256_v32, 5 }
  0xec   : > { %v2021_v28 = vsel %vm6753_vm9, %v2019_v19, %v2020_v20  ;;  %v732_v33 = vor.u32 %v730_v24, %v729_v23  ;;  %v734_v34 = vrot.slane %v729_v23, 4  ;;  %v537_v35 = vmax.f32 %v473_v25, 0.0  ;;  %5865 = vmatmul.msk.bf16.gmra.mxu0 %vm385_vm1, %v377_v9 }
  0xed   : > { %v2110_v36 = vunpack.c.l.b16 %v2021_v28  ;;  %v1249_v38 = vsel %vm6777_vm12, %v1244_v15, %v1248_v26  ;;  %v1253_v40 = vor.u32 %v1252_v30, %v1248_v26  ;;  %v1015_v28 = vld [vmem:[#allocation2 + $0x50] sm:$0x1] }
  0xee   : > { %v733_v41 = vsel %vm6811_vm0, %v725_v13, %v732_v33  ;;  %v1009_v42 = vsel %vm6820_vm6, %v734_v34, %v1008_v27  ;;  %v625_v43 = vpack.c.bf16 %v537_v35, %v537_v35  ;;  %v1098_v45 = vld [vmem:[#allocation2 + $0x3c] sm:$0xf]  ;;  %v1534_v53 = vunpack.c.l.b16 %v1249_v38 }
  0xef   : > { %v2137_v44 = vpack.c.b16 %v2110_v36, %v2109_v29  ;;  %1007 = vst.msk [vmem:[#allocation2 + $0x40] sm:$0xf] %vm559_vm2, %v733_v41  ;;  %v1254_v46 = vrot.slane %v1253_v40, 4  ;;  %v1261_v49 = vshrl.u32 %v1098_v45, 16  ;;  %v1264_v50 = vshll.u32 %v1098_v45, 16 }
  0xf0   : > { %1010 = vst [vmem:[#allocation2 + $0x44] sm:$0x1] %v1009_v42  ;;  %v736_v48 = vshrl.u32 %v625_v43, 16  ;;  %v739_v51 = vshll.u32 %v625_v43, 16  ;;  %v1941_v2 = vld [vmem:[#allocation2 + $0x3c] sm:$0xe] }
  0xf1   : > { %5986 = vmatmul.msk.bf16.gmra.mxu3 %vm1574_vm4, %v2137_v44  ;;  %v474_v22 = vpop.f32.mrf.mxu0  ;;  %v1259_v52 = vsel %vm6777_vm12, %v1254_v46, %v1258_v47  ;;  %v1263_v58 = vrot.slane %v1261_v49, 4  ;;  %v1266_v60 = vrot.slane %v1264_v50, 5  ;;  %v5970_v12 = vrot.slane %v1941_v2, 9  ;;  %v363_v2 = vld [vmem:[%s6625_s27 + $0xf8] sm:$0xff] }
  0xf2   : > { %v738_v54 = vrot.slane %v736_v48, 7  ;;  %v475_v55 = vadd.f32 %v6731_v39, %v474_v22  ;;  %v1535_v57 = vunpack.c.l.b16 %v1259_v52 }
  0xf3   : > { %v1267_v3 = vor.u32 %v1266_v60, %v1263_v58  ;;  %v1018_v60 = vld [vmem:[#allocation2 + $0x54] sm:$0xf] }
  0xf4   : > { %v741_v61 = vor.u32 %v739_v51, %v738_v54  ;;  %v538_v62 = vmax.f32 %v475_v55, 0.0  ;;  %v1562_v63 = vpack.c.b16 %v1535_v57, %v1534_v53  ;;  %v742_v14 = vrot.slane %v738_v54, 4 }
  0xf5   : > { %v1268_v16 = vrot.slane %v1267_v3, 4 }
  0xf6   : > { %v1012_v4 = vsel %vm6784_vm13, %v741_v61, %v1011_v59  ;;  %v626_v6 = vpack.c.bf16 %v538_v62, %v538_v62  ;;  %5873 = vmatmul.msk.bf16.gmra.mxu1 %vm1574_vm4, %v1562_v63  ;;  %v6320_v8 = vld [vmem:[#allocation2 + $0x3c] sm:$0xff] }
  0xf7   : > { %v1099_v9 = vld [vmem:[#allocation2 + $0x40] sm:$0xf]  ;;  %1013 = vst [vmem:[#allocation2 + $0x48] sm:$0xf] %v1012_v4  ;;  %v1126_v11 = vld [vmem:[#allocation2 + $0x44] sm:$0x1]  ;;  %5954 = vmatmul.msk.bf16.gmra.mxu2 %vm1574_vm4, %v6320_v8 }
  0xf8   : > { %v2024_v13 = vrot.slane %v1099_v9, 5  ;;  %v744_v15 = vshrl.u32 %v626_v6, 16  ;;  %v1270_v17 = vshll.u32 %v1099_v9, 16  ;;  %v2027_v21 = vrot.slane %v1126_v11, 5 }
  0xf9   : > { %v477_v18 = vpop.f32.mrf.mxu0  ;;  %v1274_v23 = vshrl.u32 %v1099_v9, 16  ;;  %v747_v25 = vshll.u32 %v626_v6, 16  ;;  %v1280_v33 = vshll.u32 %v1126_v11, 16  ;;  %v379_v11 = vpack.c.bf16 %v363_v2, %v362_v1 }
  0xfa   : > { %v2025_v19 = vsel %vm6753_vm9, %v5970_v12, %v2024_v13  ;;  %v2026_v20 = vrot.slane %v2024_v13, 4  ;;  %v746_v24 = vrot.slane %v744_v15, 7  ;;  %v478_v26 = vadd.f32 %v6731_v39, %v477_v18 }
  0xfb   : > { %v1272_v27 = vrot.slane %v1270_v17, 5  ;;  %v2111_v30 = vunpack.c.l.b16 %v2025_v19  ;;  %v1276_v32 = vrot.slane %v1274_v23, 4  ;;  %v1282_v48 = vrot.slane %v1280_v33, 5 }
  0xfc   : > { %v2028_v29 = vsel %vm6753_vm9, %v2026_v20, %v2027_v21  ;;  %v749_v34 = vor.u32 %v747_v25, %v746_v24  ;;  %v751_v35 = vrot.slane %v746_v24, 4  ;;  %v539_v36 = vmax.f32 %v478_v26, 0.0  ;;  %5866 = vmatmul.msk.bf16.gmra.mxu0 %vm385_vm1, %v378_v10 }
  0xfd   : > { %v2112_v38 = vunpack.c.l.b16 %v2028_v29  ;;  %v1273_v40 = vsel %vm6777_vm12, %v1268_v16, %v1272_v27  ;;  %v1277_v41 = vor.u32 %v1276_v32, %v1272_v27  ;;  %v1022_v29 = vld [vmem:[#allocation2 + $0x5c] sm:$0x1] }
  0xfe   : > { %v750_v42 = vsel %vm6811_vm0, %v742_v14, %v749_v34  ;;  %v1016_v43 = vsel %vm6820_vm6, %v751_v35, %v1015_v28  ;;  %v627_v44 = vpack.c.bf16 %v539_v36, %v539_v36  ;;  %v1100_v46 = vld [vmem:[#allocation2 + $0x48] sm:$0xf]  ;;  %v1536_v54 = vunpack.c.l.b16 %v1273_v40 }
  0xff   : > { %v2138_v45 = vpack.c.b16 %v2112_v38, %v2111_v30  ;;  %1014 = vst.msk [vmem:[#allocation2 + $0x4c] sm:$0xf] %vm559_vm2, %v750_v42  ;;  %v1278_v47 = vrot.slane %v1277_v41, 4  ;;  %v1285_v50 = vshrl.u32 %v1100_v46, 16  ;;  %v1288_v51 = vshll.u32 %v1100_v46, 16 }
 0x100   : > { %1017 = vst [vmem:[#allocation2 + $0x50] sm:$0x1] %v1016_v43  ;;  %v753_v49 = vshrl.u32 %v627_v44, 16  ;;  %v756_v22 = vshll.u32 %v627_v44, 16  ;;  %v1942_v3 = vld [vmem:[#allocation2 + $0x48] sm:$0xe] }
 0x101   : > { %5987 = vmatmul.msk.bf16.gmra.mxu3 %vm1574_vm4, %v2138_v45  ;;  %v479_v52 = vpop.f32.mrf.mxu0  ;;  %v1283_v53 = vsel %vm6777_vm12, %v1278_v47, %v1282_v48  ;;  %v1287_v59 = vrot.slane %v1285_v50, 4  ;;  %v1290_v61 = vrot.slane %v1288_v51, 5  ;;  %v5971_v13 = vrot.slane %v1942_v3, 9 }
 0x102   : > { %v755_v55 = vrot.slane %v753_v49, 7  ;;  %v480_v57 = vadd.f32 %v6731_v39, %v479_v52  ;;  %v1537_v58 = vunpack.c.l.b16 %v1283_v53 }
 0x103   : > { %v1291_v4 = vor.u32 %v1290_v61, %v1287_v59  ;;  %v1025_v61 = vld [vmem:[#allocation2 + $0x60] sm:$0xf] }
 0x104   : > { %v758_v62 = vor.u32 %v756_v22, %v755_v55  ;;  %v540_v63 = vmax.f32 %v480_v57, 0.0  ;;  %v1563_v0 = vpack.c.b16 %v1537_v58, %v1536_v54  ;;  %v759_v15 = vrot.slane %v755_v55, 4 }
 0x105   : > { %v1292_v17 = vrot.slane %v1291_v4, 4 }
 0x106   : > { %v1019_v6 = vsel %vm6784_vm13, %v758_v62, %v1018_v60  ;;  %v628_v8 = vpack.c.bf16 %v540_v63, %v540_v63  ;;  %5874 = vmatmul.msk.bf16.gmra.mxu1 %vm1574_vm4, %v1563_v0  ;;  %v6321_v9 = vld [vmem:[#allocation2 + $0x48] sm:$0xff] }
 0x107   : > { %v1101_v10 = vld [vmem:[#allocation2 + $0x4c] sm:$0xf]  ;;  %1020 = vst [vmem:[#allocation2 + $0x54] sm:$0xf] %v1019_v6  ;;  %v1127_v12 = vld [vmem:[#allocation2 + $0x50] sm:$0x1]  ;;  %5955 = vmatmul.msk.bf16.gmra.mxu2 %vm1574_vm4, %v6321_v9 }
 0x108   : > { %v2031_v14 = vrot.slane %v1101_v10, 5  ;;  %v761_v16 = vshrl.u32 %v628_v8, 16  ;;  %v1294_v18 = vshll.u32 %v1101_v10, 16  ;;  %v2034_v23 = vrot.slane %v1127_v12, 5 }
 0x109   : > { %v482_v19 = vpop.f32.mrf.mxu0  ;;  %v1298_v24 = vshrl.u32 %v1101_v10, 16  ;;  %v764_v26 = vshll.u32 %v628_v8, 16  ;;  %v1304_v34 = vshll.u32 %v1127_v12, 16 }
 0x10a   : > { %v2032_v20 = vsel %vm6753_vm9, %v5971_v13, %v2031_v14  ;;  %v2033_v21 = vrot.slane %v2031_v14, 4  ;;  %v763_v25 = vrot.slane %v761_v16, 7  ;;  %v483_v27 = vadd.f32 %v6731_v39, %v482_v19 }
 0x10b   : > { %v1296_v28 = vrot.slane %v1294_v18, 5  ;;  %v2113_v32 = vunpack.c.l.b16 %v2032_v20  ;;  %v1300_v33 = vrot.slane %v1298_v24, 4  ;;  %v1306_v49 = vrot.slane %v1304_v34, 5  ;;  %v6985_v24 = vld [vmem:[%s8965_s2] ss:$0 sm:$0xff] }
 0x10c   : > { %v2035_v30 = vsel %vm6753_vm9, %v2033_v21, %v2034_v23  ;;  %v766_v35 = vor.u32 %v764_v26, %v763_v25  ;;  %v768_v36 = vrot.slane %v763_v25, 4  ;;  %v541_v38 = vmax.f32 %v483_v27, 0.0  ;;  %5867 = vmatmul.msk.bf16.gmra.mxu0 %vm385_vm1, %v379_v11  ;;  %v6331_v26 = vld [vmem:[#allocation2 + $0xc] sm:$0xff] }
 0x10d   : > { %v2114_v40 = vunpack.c.l.b16 %v2035_v30  ;;  %v1297_v41 = vsel %vm6777_vm12, %v1292_v17, %v1296_v28  ;;  %v1301_v42 = vor.u32 %v1300_v33, %v1296_v28  ;;  %v1029_v28 = vld [vmem:[#allocation2 + $0x68] sm:$0x1] }
 0x10e   : > { %v767_v43 = vsel %vm6811_vm0, %v759_v15, %v766_v35  ;;  %v1023_v44 = vsel %vm6820_vm6, %v768_v36, %v1022_v29  ;;  %v629_v45 = vpack.c.bf16 %v541_v38, %v541_v38  ;;  %v1102_v47 = vld [vmem:[#allocation2 + $0x54] sm:$0xf]  ;;  %v1538_v55 = vunpack.c.l.b16 %v1297_v41 }
 0x10f   : > { %v2139_v46 = vpack.c.b16 %v2114_v40, %v2113_v32  ;;  %1021 = vst.msk [vmem:[#allocation2 + $0x58] sm:$0xf] %vm559_vm2, %v767_v43  ;;  %v1302_v48 = vrot.slane %v1301_v42, 4  ;;  %v1309_v51 = vshrl.u32 %v1102_v47, 16  ;;  %v1312_v22 = vshll.u32 %v1102_v47, 16 }
 0x110   : > { %1024 = vst [vmem:[#allocation2 + $0x5c] sm:$0x1] %v1023_v44  ;;  %v770_v50 = vshrl.u32 %v629_v45, 16  ;;  %v773_v52 = vshll.u32 %v629_v45, 16  ;;  %v1943_v2 = vld [vmem:[#allocation2 + $0x54] sm:$0xe] }
 0x111   : > { %5988 = vmatmul.msk.bf16.gmra.mxu3 %vm1574_vm4, %v2139_v46  ;;  %v484_v53 = vpop.f32.mrf.mxu0  ;;  %v1307_v54 = vsel %vm6777_vm12, %v1302_v48, %v1306_v49  ;;  %v1311_v60 = vrot.slane %v1309_v51, 4  ;;  %v1314_v62 = vrot.slane %v1312_v22, 5 }
 0x112   : > { %v772_v57 = vrot.slane %v770_v50, 7  ;;  %v485_v58 = vadd.f32 %v6731_v39, %v484_v53  ;;  %v1539_v59 = vunpack.c.l.b16 %v1307_v54  ;;  %v5972_v39 = vrot.slane %v1943_v2, 9 }
 0x113   : > { %v1315_v3 = vor.u32 %v1314_v62, %v1311_v60 }
 0x114   : > { %v775_v63 = vor.u32 %v773_v52, %v772_v57  ;;  %v542_v0 = vmax.f32 %v485_v58, 0.0  ;;  %v1564_v1 = vpack.c.b16 %v1539_v59, %v1538_v55  ;;  %v776_v12 = vrot.slane %v772_v57, 4  ;;  %v1032_v59 = vld [vmem:[#allocation2 + $0x6c] sm:$0xf] }
 0x115   : > { %v1316_v14 = vrot.slane %v1315_v3, 4 }
 0x116   : > { %v1026_v4 = vsel %vm6784_vm13, %v775_v63, %v1025_v61  ;;  %v630_v6 = vpack.c.bf16 %v542_v0, %v542_v0  ;;  %5875 = vmatmul.msk.bf16.gmra.mxu1 %vm1574_vm4, %v1564_v1  ;;  %v6322_v8 = vld [vmem:[#allocation2 + $0x54] sm:$0xff] }
 0x117   : > { %v1103_v9 = vld [vmem:[#allocation2 + $0x58] sm:$0xf]  ;;  %1027 = vst [vmem:[#allocation2 + $0x60] sm:$0xf] %v1026_v4  ;;  %v1128_v10 = vld [vmem:[#allocation2 + $0x5c] sm:$0x1]  ;;  %5956 = vmatmul.msk.bf16.gmra.mxu2 %vm1574_vm4, %v6322_v8  ;;  %v1856_v8 = vpop.f32.mrf.mxu2 }
 0x118   : > { %v2038_v11 = vrot.slane %v1103_v9, 5  ;;  %v778_v13 = vshrl.u32 %v630_v6, 16  ;;  %v1318_v15 = vshll.u32 %v1103_v9, 16  ;;  %v2041_v19 = vrot.slane %v1128_v10, 5 }
 0x119   : > { %v487_v16 = vpop.f32.mrf.mxu0  ;;  %v1322_v20 = vshrl.u32 %v1103_v9, 16  ;;  %v781_v23 = vshll.u32 %v630_v6, 16  ;;  %v1328_v33 = vshll.u32 %v1128_v10, 16 }
 0x11a   : > { %v2039_v17 = vsel %vm6753_vm9, %v5972_v39, %v2038_v11  ;;  %v2040_v18 = vrot.slane %v2038_v11, 4  ;;  %v780_v21 = vrot.slane %v778_v13, 7  ;;  %v488_v25 = vadd.f32 %v6985_v24, %v487_v16 }
 0x11b   : > { %v1320_v27 = vrot.slane %v1318_v15, 5  ;;  %v2115_v30 = vunpack.c.l.b16 %v2039_v17  ;;  %v1324_v32 = vrot.slane %v1322_v20, 4  ;;  %v1330_v48 = vrot.slane %v1328_v33, 5 }
 0x11c   : > { %v2042_v29 = vsel %vm6753_vm9, %v2040_v18, %v2041_v19  ;;  %v783_v34 = vor.u32 %v781_v23, %v780_v21  ;;  %v785_v35 = vrot.slane %v780_v21, 4  ;;  %v543_v36 = vmax.f32 %v488_v25, 0.0  ;;  %6063 = vmatmul.msk.bf16.vlgmr.msrb.gmra.mxu0 %vm1574_vm4, %v6331_v26  ;;  %v6332_v21 = vld [vmem:[#allocation2 + $0x18] sm:$0xff] }
 0x11d   : > { %v2116_v38 = vunpack.c.l.b16 %v2042_v29  ;;  %v1321_v40 = vsel %vm6777_vm12, %v1316_v14, %v1320_v27  ;;  %v1325_v41 = vor.u32 %v1324_v32, %v1320_v27  ;;  %v1036_v27 = vld [vmem:[#allocation2 + $0x74] sm:$0x1] }
 0x11e   : > { %v784_v42 = vsel %vm6811_vm0, %v776_v12, %v783_v34  ;;  %v1030_v43 = vsel %vm6820_vm6, %v785_v35, %v1029_v28  ;;  %v631_v44 = vpack.c.bf16 %v543_v36, %v543_v36  ;;  %v1104_v46 = vld [vmem:[#allocation2 + $0x60] sm:$0xf]  ;;  %v1540_v53 = vunpack.c.l.b16 %v1321_v40  ;;  %v1636_v28 = vpop.f32.mrf.mxu1 }
 0x11f   : > { %v2140_v45 = vpack.c.b16 %v2116_v38, %v2115_v30  ;;  %1028 = vst.msk [vmem:[#allocation2 + $0x64] sm:$0xf] %vm559_vm2, %v784_v42  ;;  %v1326_v47 = vrot.slane %v1325_v41, 4  ;;  %v1333_v50 = vshrl.u32 %v1104_v46, 16  ;;  %v1336_v51 = vshll.u32 %v1104_v46, 16 }
 0x120   : > { %1031 = vst [vmem:[#allocation2 + $0x68] sm:$0x1] %v1030_v43  ;;  %v787_v49 = vshrl.u32 %v631_v44, 16  ;;  %v790_v55 = vshll.u32 %v631_v44, 16  ;;  %v1944_v1 = vld [vmem:[#allocation2 + $0x60] sm:$0xe]  ;;  %v1857_v36 = vadd.f32 %v1856_v8, %v1636_v28 }
 0x121   : > { %5989 = vmatmul.msk.bf16.gmra.mxu3 %vm1574_vm4, %v2140_v45  ;;  %v489_v22 = vpop.f32.mrf.mxu0  ;;  %v1331_v52 = vsel %vm6777_vm12, %v1326_v47, %v1330_v48  ;;  %v1335_v60 = vrot.slane %v1333_v50, 4  ;;  %v1338_v0 = vrot.slane %v1336_v51, 5  ;;  %v5973_v11 = vrot.slane %v1944_v1, 9  ;;  %v2209_v45 = vpop.f32.mrf.mxu3  ;;  %v1039_v1 = vld [vmem:[#allocation2 + $0x78] sm:$0xf] }
 0x122   : > { %v789_v54 = vrot.slane %v787_v49, 7  ;;  %v490_v57 = vadd.f32 %v6985_v24, %v489_v22  ;;  %v1541_v58 = vunpack.c.l.b16 %v1331_v52  ;;  %v7017_v48 = vadd.f32 %v2209_v45, %v1857_v36  ;;  %v6333_v36 = vld [vmem:[#allocation2 + $0x24] sm:$0xff] }
 0x123   : > { %v1339_v12 = vor.u32 %v1338_v0, %v1335_v60 }
 0x124   : > { %v792_v61 = vor.u32 %v790_v55, %v789_v54  ;;  %v544_v62 = vmax.f32 %v490_v57, 0.0  ;;  %v1565_v63 = vpack.c.b16 %v1541_v58, %v1540_v53  ;;  %v793_v26 = vrot.slane %v789_v54, 4  ;;  %v6112_v53 = vld [vmem:[%s8966_s3 + $0x14] sm:$0xf]  ;;  %v1858_v55 = vpop.f32.mrf.mxu2 }
 0x125   : > { %v1340_v46 = vrot.slane %v1339_v12, 4  ;;  %v3536_v58 = vsel %vm1623_vm3, %v6112_v53, 0 }
 0x126   : > { %v1033_v2 = vsel %vm6784_vm13, %v792_v61, %v1032_v59  ;;  %v632_v3 = vpack.c.bf16 %v544_v62, %v544_v62  ;;  %5876 = vmatmul.msk.bf16.gmra.mxu1 %vm1574_vm4, %v1565_v63  ;;  %v6323_v4 = vld [vmem:[#allocation2 + $0x60] sm:$0xff]  ;;  %3545 = vmatpush.bf16.msrb.mxu2 %v3536_v58 }
 0x127   : > { %v1105_v6 = vld [vmem:[#allocation2 + $0x64] sm:$0xf]  ;;  %1034 = vst [vmem:[#allocation2 + $0x6c] sm:$0xf] %v1033_v2  ;;  %v1129_v9 = vld [vmem:[#allocation2 + $0x68] sm:$0x1]  ;;  %5957 = vmatmul.msk.bf16.gmra.mxu2 %vm1574_vm4, %v6323_v4  ;;  %v1638_v2 = vpop.f32.mrf.mxu1 }
 0x128   : > { %v2045_v10 = vrot.slane %v1105_v6, 5  ;;  %v795_v39 = vshrl.u32 %v632_v3, 16  ;;  %v1342_v13 = vshll.u32 %v1105_v6, 16  ;;  %v798_v14 = vshll.u32 %v632_v3, 16 }
 0x129   : > { %v492_v15 = vpop.f32.mrf.mxu0  ;;  %v2048_v17 = vrot.slane %v1129_v9, 5  ;;  %v1346_v18 = vshrl.u32 %v1105_v6, 16  ;;  %v1352_v32 = vshll.u32 %v1129_v9, 16  ;;  %v1859_v9 = vadd.f32 %v1858_v55, %v1638_v2 }
 0x12a   : > { %v2047_v16 = vrot.slane %v2045_v10, 4  ;;  %v797_v19 = vrot.slane %v795_v39, 7  ;;  %v493_v20 = vadd.f32 %v6985_v24, %v492_v15  ;;  %v2046_v23 = vsel %vm6753_vm9, %v5973_v11, %v2045_v10 }
 0x12b   : > { %v1344_v25 = vrot.slane %v1342_v13, 5  ;;  %v1348_v30 = vrot.slane %v1346_v18, 4  ;;  %v2117_v38 = vunpack.c.l.b16 %v2046_v23  ;;  %v1354_v51 = vrot.slane %v1352_v32, 5 }
 0x12c   : > { %v2049_v29 = vsel %vm6753_vm9, %v2047_v16, %v2048_v17  ;;  %v800_v33 = vor.u32 %v798_v14, %v797_v19  ;;  %v802_v34 = vrot.slane %v797_v19, 4  ;;  %v545_v35 = vmax.f32 %v493_v20, 0.0  ;;  %6064 = vmatmul.msk.bf16.gmra.mxu0 %vm1574_vm4, %v6332_v21  ;;  %v2211_v14 = vpop.f32.mrf.mxu3 }
 0x12d   : > { %v2118_v40 = vunpack.c.l.b16 %v2049_v29  ;;  %v1349_v41 = vor.u32 %v1348_v30, %v1344_v25  ;;  %v1345_v52 = vsel %vm6777_vm12, %v1340_v46, %v1344_v25  ;;  %v7031_v17 = vadd.f32 %v2211_v14, %v1859_v9 }
 0x12e   : > { %v801_v42 = vsel %vm6811_vm0, %v793_v26, %v800_v33  ;;  %v1037_v43 = vsel %vm6820_vm6, %v802_v34, %v1036_v27  ;;  %v633_v44 = vpack.c.bf16 %v545_v35, %v545_v35  ;;  %v1106_v47 = vld [vmem:[#allocation2 + $0x6c] sm:$0xf]  ;;  %v1542_v3 = vunpack.c.l.b16 %v1345_v52 }
 0x12f   : > { %1035 = vst.msk [vmem:[#allocation2 + $0x70] sm:$0xf] %vm559_vm2, %v801_v42  ;;  %v2141_v49 = vpack.c.b16 %v2118_v40, %v2117_v38  ;;  %v1350_v50 = vrot.slane %v1349_v41, 4  ;;  %v1357_v59 = vshrl.u32 %v1106_v47, 16  ;;  %v1360_v60 = vshll.u32 %v1106_v47, 16 }
 0x130   : > { %1038 = vst [vmem:[#allocation2 + $0x74] sm:$0x1] %v1037_v43  ;;  %v804_v22 = vshrl.u32 %v633_v44, 16  ;;  %v807_v62 = vshll.u32 %v633_v44, 16  ;;  %v1945_v10 = vld [vmem:[#allocation2 + $0x6c] sm:$0xe] }
 0x131   : > { %5990 = vmatmul.msk.bf16.gmra.mxu3 %vm1574_vm4, %v2141_v49  ;;  %v494_v54 = vpop.f32.mrf.mxu0  ;;  %v1355_v57 = vsel %vm6777_vm12, %v1350_v50, %v1354_v51  ;;  %v1359_v4 = vrot.slane %v1357_v59, 4  ;;  %v1362_v39 = vrot.slane %v1360_v60, 5  ;;  %v5974_v19 = vrot.slane %v1945_v10, 9  ;;  %v1043_v40 = vld [vmem:[#allocation2 + $0x80] sm:$0x1] }
 0x132   : > { %v806_v61 = vrot.slane %v804_v22, 7  ;;  %v495_v63 = vadd.f32 %v6985_v24, %v494_v54  ;;  %v1543_v0 = vunpack.c.l.b16 %v1355_v57 }
 0x133   : > { %v1363_v25 = vor.u32 %v1362_v39, %v1359_v4 }
 0x134   : > { %v809_v6 = vor.u32 %v807_v62, %v806_v61  ;;  %v546_v8 = vmax.f32 %v495_v63, 0.0  ;;  %v1566_v11 = vpack.c.b16 %v1543_v0, %v1542_v3  ;;  %v810_v21 = vrot.slane %v806_v61, 4 }
 0x135   : > { %v1364_v51 = vrot.slane %v1363_v25, 4 }
 0x136   : > { %v1040_v12 = vsel %vm6784_vm13, %v809_v6, %v1039_v1  ;;  %v634_v13 = vpack.c.bf16 %v546_v8, %v546_v8  ;;  %v6324_v15 = vld [vmem:[#allocation2 + $0x6c] sm:$0xff]  ;;  %5877 = vmatmul.msk.bf16.gmra.mxu1 %vm1574_vm4, %v1566_v11  ;;  %v1046_v8 = vld [vmem:[#allocation2 + $0x84] sm:$0xf] }
 0x137   : > { %v1107_v16 = vld [vmem:[#allocation2 + $0x70] sm:$0xf]  ;;  %1041 = vst [vmem:[#allocation2 + $0x78] sm:$0xf] %v1040_v12  ;;  %v1130_v18 = vld [vmem:[#allocation2 + $0x74] sm:$0x1]  ;;  %5958 = vmatmul.msk.bf16.gmra.mxu2 %vm1574_vm4, %v6324_v15 }
 0x138   : > { %v2052_v20 = vrot.slane %v1107_v16, 5  ;;  %v812_v23 = vshrl.u32 %v634_v13, 16  ;;  %v1366_v26 = vshll.u32 %v1107_v16, 16  ;;  %v2055_v30 = vrot.slane %v1130_v18, 5 }
 0x139   : > { %v497_v27 = vpop.f32.mrf.mxu0  ;;  %v1370_v32 = vshrl.u32 %v1107_v16, 16  ;;  %v815_v34 = vshll.u32 %v634_v13, 16  ;;  %v1376_v45 = vshll.u32 %v1130_v18, 16 }
 0x13a   : > { %v2053_v28 = vsel %vm6753_vm9, %v5974_v19, %v2052_v20  ;;  %v2054_v29 = vrot.slane %v2052_v20, 4  ;;  %v814_v33 = vrot.slane %v812_v23, 7  ;;  %v498_v35 = vadd.f32 %v6985_v24, %v497_v27  ;;  %v1861_v41 = vpop.f32.mrf.mxu2 }
 0x13b   : > { %v1368_v38 = vrot.slane %v1366_v26, 5  ;;  %v2119_v43 = vunpack.c.l.b16 %v2053_v28  ;;  %v1372_v44 = vrot.slane %v1370_v32, 4  ;;  %v1378_v59 = vrot.slane %v1376_v45, 5 }
 0x13c   : > { %v2056_v42 = vsel %vm6753_vm9, %v2054_v29, %v2055_v30  ;;  %v817_v46 = vor.u32 %v815_v34, %v814_v33  ;;  %v819_v47 = vrot.slane %v814_v33, 4  ;;  %v547_v49 = vmax.f32 %v498_v35, 0.0  ;;  %6065 = vmatmul.msk.bf16.gmra.mxu0 %vm1574_vm4, %v6333_v36 }
 0x13d   : > { %v2120_v50 = vunpack.c.l.b16 %v2056_v42  ;;  %v1373_v22 = vor.u32 %v1372_v44, %v1368_v38  ;;  %v1369_v61 = vsel %vm6777_vm12, %v1364_v51, %v1368_v38 }
 0x13e   : > { %v818_v52 = vsel %vm6811_vm0, %v810_v21, %v817_v46  ;;  %v1044_v53 = vsel %vm6820_vm6, %v819_v47, %v1043_v40  ;;  %v635_v54 = vpack.c.bf16 %v547_v49, %v547_v49  ;;  %v1108_v57 = vld [vmem:[#allocation2 + $0x78] sm:$0xf]  ;;  %v1544_v39 = vunpack.c.l.b16 %v1369_v61  ;;  %v1050_v47 = vld [vmem:[#allocation2 + $0x8c] sm:$0x1] }
 0x13f   : > { %v2142_v55 = vpack.c.b16 %v2120_v50, %v2119_v43  ;;  %1042 = vst.msk [vmem:[#allocation2 + $0x7c] sm:$0xf] %vm559_vm2, %v818_v52  ;;  %v1374_v58 = vrot.slane %v1373_v22, 4  ;;  %v1381_v62 = vshrl.u32 %v1108_v57, 16  ;;  %v1384_v63 = vshll.u32 %v1108_v57, 16  ;;  %v6334_v43 = vld [vmem:[#allocation2 + $0x30] sm:$0xff] }
 0x140   : > { %1045 = vst [vmem:[#allocation2 + $0x80] sm:$0x1] %v1044_v53  ;;  %v821_v60 = vshrl.u32 %v635_v54, 16  ;;  %v824_v3 = vshll.u32 %v635_v54, 16  ;;  %v1946_v19 = vld [vmem:[#allocation2 + $0x78] sm:$0xe] }
 0x141   : > { %5991 = vmatmul.msk.bf16.gmra.mxu3 %vm1574_vm4, %v2142_v55  ;;  %v499_v0 = vpop.f32.mrf.mxu0  ;;  %v1379_v1 = vsel %vm6777_vm12, %v1374_v58, %v1378_v59  ;;  %v1383_v11 = vrot.slane %v1381_v62, 4  ;;  %v1386_v16 = vrot.slane %v1384_v63, 5  ;;  %v5975_v30 = vrot.slane %v1946_v19, 9  ;;  %v1053_v19 = vld [vmem:[#allocation2 + $0x90] sm:$0xf] }
 0x142   : > { %v823_v2 = vrot.slane %v821_v60, 7  ;;  %v500_v4 = vadd.f32 %v6985_v24, %v499_v0  ;;  %v1545_v6 = vunpack.c.l.b16 %v1379_v1  ;;  %v1863_v15 = vpop.f32.mrf.mxu2 }
 0x143   : > { %v1641_v9 = vpop.f32.mrf.mxu1  ;;  %v1387_v32 = vor.u32 %v1386_v16, %v1383_v11 }
 0x144   : > { %v2214_v10 = vpop.f32.mrf.mxu3  ;;  %v826_v12 = vor.u32 %v824_v3, %v823_v2  ;;  %v548_v13 = vmax.f32 %v500_v4, 0.0  ;;  %v1862_v14 = vadd.f32 %v1861_v41, %v1641_v9  ;;  %v1567_v18 = vpack.c.b16 %v1545_v6, %v1544_v39 }
 0x145   : > { %v827_v46 = vrot.slane %v823_v2, 4  ;;  %v1388_v61 = vrot.slane %v1387_v32, 4 }
 0x146   : > { %v1047_v20 = vsel %vm6784_vm13, %v826_v12, %v1046_v8  ;;  %v636_v21 = vpack.c.bf16 %v548_v13, %v548_v13  ;;  %v7054_v23 = vadd.f32 %v2214_v10, %v1862_v14  ;;  %v6325_v25 = vld [vmem:[#allocation2 + $0x78] sm:$0xff]  ;;  %5878 = vmatmul.msk.bf16.gmra.mxu1 %vm1574_vm4, %v1567_v18 }
 0x147   : > { %v1109_v26 = vld [vmem:[#allocation2 + $0x7c] sm:$0xf]  ;;  %1048 = vst [vmem:[#allocation2 + $0x84] sm:$0xf] %v1047_v20  ;;  %v1131_v27 = vld [vmem:[#allocation2 + $0x80] sm:$0x1]  ;;  %5959 = vmatmul.msk.bf16.gmra.mxu2 %vm1574_vm4, %v6325_v25 }
 0x148   : > { %v2059_v28 = vrot.slane %v1109_v26, 5  ;;  %v829_v29 = vshrl.u32 %v636_v21, 16  ;;  %v1390_v33 = vshll.u32 %v1109_v26, 16  ;;  %v832_v34 = vshll.u32 %v636_v21, 16 }
 0x149   : > { %v502_v35 = vpop.f32.mrf.mxu0  ;;  %v2062_v38 = vrot.slane %v1131_v27, 5  ;;  %v1394_v40 = vshrl.u32 %v1109_v26, 16  ;;  %v1400_v52 = vshll.u32 %v1131_v27, 16 }
 0x14a   : > { %v2061_v36 = vrot.slane %v2059_v28, 4  ;;  %v831_v41 = vrot.slane %v829_v29, 7  ;;  %v503_v42 = vadd.f32 %v6985_v24, %v502_v35  ;;  %v2060_v44 = vsel %vm6753_vm9, %v5975_v30, %v2059_v28  ;;  %v1866_v58 = vpop.f32.mrf.mxu2 }
 0x14b   : > { %v1392_v45 = vrot.slane %v1390_v33, 5  ;;  %v1643_v49 = vpop.f32.mrf.mxu1  ;;  %v1396_v22 = vrot.slane %v1394_v40, 4  ;;  %v2121_v59 = vunpack.c.l.b16 %v2060_v44  ;;  %v1402_v8 = vrot.slane %v1400_v52, 5 }
 0x14c   : > { %v2216_v50 = vpop.f32.mrf.mxu3  ;;  %v2063_v51 = vsel %vm6753_vm9, %v2061_v36, %v2062_v38  ;;  %v834_v53 = vor.u32 %v832_v34, %v831_v41  ;;  %v836_v54 = vrot.slane %v831_v41, 4  ;;  %v549_v55 = vmax.f32 %v503_v42, 0.0  ;;  %6066 = vmatmul.msk.bf16.gmra.mxu0 %vm1574_vm4, %v6334_v43 }
 0x14d   : > { %v1864_v57 = vadd.f32 %v1863_v15, %v1643_v49  ;;  %v2122_v60 = vunpack.c.l.b16 %v2063_v51  ;;  %v1397_v62 = vor.u32 %v1396_v22, %v1392_v45  ;;  %v1393_v10 = vsel %vm6777_vm12, %v1388_v61, %v1392_v45 }
 0x14e   : > { %v835_v63 = vsel %vm6811_vm0, %v827_v46, %v834_v53  ;;  %v1051_v0 = vsel %vm6820_vm6, %v836_v54, %v1050_v47  ;;  %v637_v1 = vpack.c.bf16 %v549_v55, %v549_v55  ;;  %v1110_v3 = vld [vmem:[#allocation2 + $0x84] sm:$0xf]  ;;  %v1546_v25 = vunpack.c.l.b16 %v1393_v10  ;;  %v6335_v55 = vld [vmem:[#allocation2 + $0x3c] sm:$0xff] }
 0x14f   : > { %v7068_v2 = vadd.f32 %v2216_v50, %v1864_v57  ;;  %1049 = vst.msk [vmem:[#allocation2 + $0x88] sm:$0xf] %vm559_vm2, %v835_v63  ;;  %v2143_v4 = vpack.c.b16 %v2122_v60, %v2121_v59  ;;  %v1398_v6 = vrot.slane %v1397_v62, 4  ;;  %v1405_v39 = vshrl.u32 %v1110_v3, 16  ;;  %v1947_v34 = vld [vmem:[#allocation2 + $0x84] sm:$0xe] }
 0x150   : > { %1052 = vst [vmem:[#allocation2 + $0x8c] sm:$0x1] %v1051_v0  ;;  %v838_v9 = vshrl.u32 %v637_v1, 16  ;;  %v1408_v11 = vshll.u32 %v1110_v3, 16  ;;  %v841_v15 = vshll.u32 %v637_v1, 16  ;;  %v5976_v45 = vrot.slane %v1947_v34, 9 }
 0x151   : > { %5992 = vmatmul.msk.bf16.gmra.mxu3 %vm1574_vm4, %v2143_v4  ;;  %v504_v12 = vpop.f32.mrf.mxu0  ;;  %v1403_v13 = vsel %vm6777_vm12, %v1398_v6, %v1402_v8  ;;  %v1407_v26 = vrot.slane %v1405_v39, 4  ;;  %v1057_v60 = vld [vmem:[#allocation2 + $0x98] sm:$0x1] }
 0x152   : > { %v840_v14 = vrot.slane %v838_v9, 7  ;;  %v505_v16 = vadd.f32 %v6985_v24, %v504_v12  ;;  %v1547_v18 = vunpack.c.l.b16 %v1403_v13  ;;  %v1868_v30 = vpop.f32.mrf.mxu2  ;;  %v1410_v32 = vrot.slane %v1408_v11, 5 }
 0x153   : > { %v1646_v20 = vpop.f32.mrf.mxu1 }
 0x154   : > { %v2219_v21 = vpop.f32.mrf.mxu3  ;;  %v843_v27 = vor.u32 %v841_v15, %v840_v14  ;;  %v550_v28 = vmax.f32 %v505_v16, 0.0  ;;  %v1867_v29 = vadd.f32 %v1866_v58, %v1646_v20  ;;  %v1568_v33 = vpack.c.b16 %v1547_v18, %v1546_v25 }
 0x155   : > { %v1411_v46 = vor.u32 %v1410_v32, %v1407_v26  ;;  %v844_v59 = vrot.slane %v840_v14, 4 }
 0x156   : > { %v1054_v35 = vsel %vm6784_vm13, %v843_v27, %v1053_v19  ;;  %v638_v36 = vpack.c.bf16 %v550_v28, %v550_v28  ;;  %v7079_v38 = vadd.f32 %v2219_v21, %v1867_v29  ;;  %v6326_v40 = vld [vmem:[#allocation2 + $0x84] sm:$0xff]  ;;  %5879 = vmatmul.msk.bf16.gmra.mxu1 %vm1574_vm4, %v1568_v33 }
 0x157   : > { %v1111_v41 = vld [vmem:[#allocation2 + $0x88] sm:$0xf]  ;;  %1055 = vst [vmem:[#allocation2 + $0x90] sm:$0xf] %v1054_v35  ;;  %v1132_v42 = vld [vmem:[#allocation2 + $0x8c] sm:$0x1]  ;;  %5960 = vmatmul.msk.bf16.gmra.mxu2 %vm1574_vm4, %v6326_v40 }
 0x158   : > { %v2066_v43 = vrot.slane %v1111_v41, 5  ;;  %v846_v44 = vshrl.u32 %v638_v36, 16  ;;  %v1414_v47 = vshll.u32 %v1111_v41, 16  ;;  %v849_v49 = vshll.u32 %v638_v36, 16  ;;  %v1060_v36 = vld [vmem:[#allocation2 + $0x9c] sm:$0xf] }
 0x159   : > { %v507_v50 = vpop.f32.mrf.mxu0  ;;  %v2069_v22 = vrot.slane %v1132_v42, 5  ;;  %v1418_v52 = vshrl.u32 %v1111_v41, 16  ;;  %v1424_v1 = vshll.u32 %v1132_v42, 16  ;;  %v1412_v11 = vrot.slane %v1411_v46, 4 }
 0x15a   : > { %v2068_v51 = vrot.slane %v2066_v43, 4  ;;  %v848_v53 = vrot.slane %v846_v44, 7  ;;  %v508_v54 = vadd.f32 %v6985_v24, %v507_v50  ;;  %v2067_v57 = vsel %vm6753_vm9, %v5976_v45, %v2066_v43  ;;  %v1871_v9 = vpop.f32.mrf.mxu2 }
 0x15b   : > { %v1416_v58 = vrot.slane %v1414_v47, 5  ;;  %v1648_v61 = vpop.f32.mrf.mxu1  ;;  %v1420_v0 = vrot.slane %v1418_v52, 4  ;;  %v2123_v10 = vunpack.c.l.b16 %v2067_v57  ;;  %v1426_v21 = vrot.slane %v1424_v1, 5 }
 0x15c   : > { %v2221_v62 = vpop.f32.mrf.mxu3  ;;  %v2070_v63 = vsel %vm6753_vm9, %v2068_v51, %v2069_v22  ;;  %v851_v3 = vor.u32 %v849_v49, %v848_v53  ;;  %v853_v4 = vrot.slane %v848_v53, 4  ;;  %v551_v6 = vmax.f32 %v508_v54, 0.0  ;;  %6067 = vmatmul.msk.bf16.gmra.mxu0 %vm1574_vm4, %v6335_v55 }
 0x15d   : > { %v1869_v8 = vadd.f32 %v1868_v30, %v1648_v61  ;;  %v2124_v39 = vunpack.c.l.b16 %v2070_v63  ;;  %v1421_v12 = vor.u32 %v1420_v0, %v1416_v58  ;;  %v1417_v26 = vsel %vm6777_vm12, %v1412_v11, %v1416_v58 }
 0x15e   : > { %v852_v13 = vsel %vm6811_vm0, %v844_v59, %v851_v3  ;;  %v1058_v14 = vsel %vm6820_vm6, %v853_v4, %v1057_v60  ;;  %v639_v15 = vpack.c.bf16 %v551_v6, %v551_v6  ;;  %v1112_v18 = vld [vmem:[#allocation2 + $0x90] sm:$0xf]  ;;  %v1548_v42 = vunpack.c.l.b16 %v1417_v26 }
 0x15f   : > { %v7093_v16 = vadd.f32 %v2221_v62, %v1869_v8  ;;  %1056 = vst.msk [vmem:[#allocation2 + $0x94] sm:$0xf] %vm559_vm2, %v852_v13  ;;  %v2144_v19 = vpack.c.b16 %v2124_v39, %v2123_v10  ;;  %v1422_v20 = vrot.slane %v1421_v12, 4  ;;  %v1429_v27 = vshrl.u32 %v1112_v18, 16  ;;  %v1948_v51 = vld [vmem:[#allocation2 + $0x90] sm:$0xe] }
 0x160   : > { %1059 = vst [vmem:[#allocation2 + $0x98] sm:$0x1] %v1058_v14  ;;  %v855_v25 = vshrl.u32 %v639_v15, 16  ;;  %v1432_v28 = vshll.u32 %v1112_v18, 16  ;;  %v858_v33 = vshll.u32 %v639_v15, 16  ;;  %v5977_v60 = vrot.slane %v1948_v51, 9 }
 0x161   : > { %5993 = vmatmul.msk.bf16.gmra.mxu3 %vm1574_vm4, %v2144_v19  ;;  %v509_v29 = vpop.f32.mrf.mxu0  ;;  %v1427_v30 = vsel %vm6777_vm12, %v1422_v20, %v1426_v21  ;;  %v1431_v43 = vrot.slane %v1429_v27, 4  ;;  %v1064_v12 = vld [vmem:[#allocation2 + $0xa4] sm:$0x1] }
 0x162   : > { %v857_v32 = vrot.slane %v855_v25, 7  ;;  %v510_v34 = vadd.f32 %v6985_v24, %v509_v29  ;;  %v1549_v35 = vunpack.c.l.b16 %v1427_v30  ;;  %v1873_v47 = vpop.f32.mrf.mxu2  ;;  %v1434_v49 = vrot.slane %v1432_v28, 5 }
 0x163   : > { %v1651_v40 = vpop.f32.mrf.mxu1 }
 0x164   : > { %v2224_v41 = vpop.f32.mrf.mxu3  ;;  %v860_v44 = vor.u32 %v858_v33, %v857_v32  ;;  %v552_v45 = vmax.f32 %v510_v34, 0.0  ;;  %v1872_v46 = vadd.f32 %v1871_v9, %v1651_v40  ;;  %v1569_v50 = vpack.c.b16 %v1549_v35, %v1548_v42  ;;  %v6336_v9 = vld [vmem:[#allocation2 + $0x48] sm:$0xff] }
 0x165   : > { %v1435_v61 = vor.u32 %v1434_v49, %v1431_v43  ;;  %v861_v11 = vrot.slane %v857_v32, 4 }
 0x166   : > { %v1061_v22 = vsel %vm6784_vm13, %v860_v44, %v1060_v36  ;;  %v640_v52 = vpack.c.bf16 %v552_v45, %v552_v45  ;;  %v7104_v53 = vadd.f32 %v2224_v41, %v1872_v46  ;;  %v6327_v54 = vld [vmem:[#allocation2 + $0x90] sm:$0xff]  ;;  %5880 = vmatmul.msk.bf16.gmra.mxu1 %vm1574_vm4, %v1569_v50 }
 0x167   : > { %v1113_v55 = vld [vmem:[#allocation2 + $0x94] sm:$0xf]  ;;  %1062 = vst [vmem:[#allocation2 + $0x9c] sm:$0xf] %v1061_v22  ;;  %v1133_v57 = vld [vmem:[#allocation2 + $0x98] sm:$0x1]  ;;  %5961 = vmatmul.msk.bf16.gmra.mxu2 %vm1574_vm4, %v6327_v54 }
 0x168   : > { %v2073_v58 = vrot.slane %v1113_v55, 5  ;;  %v863_v59 = vshrl.u32 %v640_v52, 16  ;;  %v1438_v62 = vshll.u32 %v1113_v55, 16  ;;  %v866_v63 = vshll.u32 %v640_v52, 16 }
 0x169   : > { %v512_v0 = vpop.f32.mrf.mxu0  ;;  %v2076_v3 = vrot.slane %v1133_v57, 5  ;;  %v1442_v4 = vshrl.u32 %v1113_v55, 16  ;;  %v1448_v19 = vshll.u32 %v1133_v57, 16  ;;  %v1436_v30 = vrot.slane %v1435_v61, 4  ;;  %v1067_v55 = vld [vmem:[#allocation2 + $0xa8] sm:$0xf] }
 0x16a   : > { %v2075_v1 = vrot.slane %v2073_v58, 4  ;;  %v865_v6 = vrot.slane %v863_v59, 7  ;;  %v513_v8 = vadd.f32 %v6985_v24, %v512_v0  ;;  %v2074_v10 = vsel %vm6753_vm9, %v5977_v60, %v2073_v58  ;;  %v1876_v27 = vpop.f32.mrf.mxu2 }
 0x16b   : > { %v1440_v39 = vrot.slane %v1438_v62, 5  ;;  %v1653_v13 = vpop.f32.mrf.mxu1  ;;  %v1444_v18 = vrot.slane %v1442_v4, 4  ;;  %v2125_v28 = vunpack.c.l.b16 %v2074_v10  ;;  %v1450_v43 = vrot.slane %v1448_v19, 5 }
 0x16c   : > { %v2226_v14 = vpop.f32.mrf.mxu3  ;;  %v2077_v15 = vsel %vm6753_vm9, %v2075_v1, %v2076_v3  ;;  %v868_v20 = vor.u32 %v866_v63, %v865_v6  ;;  %v870_v21 = vrot.slane %v865_v6, 4  ;;  %v553_v25 = vmax.f32 %v513_v8, 0.0  ;;  %6068 = vmatmul.msk.bf16.gmra.mxu0 %vm1574_vm4, %v6336_v9 }
 0x16d   : > { %v1874_v26 = vadd.f32 %v1873_v47, %v1653_v13  ;;  %v2126_v29 = vunpack.c.l.b16 %v2077_v15  ;;  %v1445_v33 = vor.u32 %v1444_v18, %v1440_v39  ;;  %v1441_v45 = vsel %vm6777_vm12, %v1436_v30, %v1440_v39 }
 0x16e   : > { %v869_v32 = vsel %vm6811_vm0, %v861_v11, %v868_v20  ;;  %v1065_v34 = vsel %vm6820_vm6, %v870_v21, %v1064_v12  ;;  %v641_v35 = vpack.c.bf16 %v553_v25, %v553_v25  ;;  %v1114_v40 = vld [vmem:[#allocation2 + $0x9c] sm:$0xf]  ;;  %v1550_v59 = vunpack.c.l.b16 %v1441_v45 }
 0x16f   : > { %v7118_v36 = vadd.f32 %v2226_v14, %v1874_v26  ;;  %1063 = vst.msk [vmem:[#allocation2 + $0xa0] sm:$0xf] %vm559_vm2, %v869_v32  ;;  %v2145_v41 = vpack.c.b16 %v2126_v29, %v2125_v28  ;;  %v1446_v42 = vrot.slane %v1445_v33, 4  ;;  %v1453_v46 = vshrl.u32 %v1114_v40, 16  ;;  %v1949_v4 = vld [vmem:[#allocation2 + $0x9c] sm:$0xe] }
 0x170   : > { %1066 = vst [vmem:[#allocation2 + $0xa4] sm:$0x1] %v1065_v34  ;;  %v872_v44 = vshrl.u32 %v641_v35, 16  ;;  %v1456_v47 = vshll.u32 %v1114_v40, 16  ;;  %v875_v22 = vshll.u32 %v641_v35, 16  ;;  %v5978_v14 = vrot.slane %v1949_v4, 9 }
 0x171   : > { %5994 = vmatmul.msk.bf16.gmra.mxu3 %vm1574_vm4, %v2145_v41  ;;  %v514_v49 = vpop.f32.mrf.mxu0  ;;  %v1451_v50 = vsel %vm6777_vm12, %v1446_v42, %v1450_v43  ;;  %v1455_v60 = vrot.slane %v1453_v46, 4  ;;  %v6337_v29 = vld [vmem:[#allocation2 + $0x54] sm:$0xff]  ;;  %v1071_v34 = vld [vmem:[#allocation2 + $0xb0] sm:$0x1] }
 0x172   : > { %v874_v51 = vrot.slane %v872_v44, 7  ;;  %v515_v52 = vadd.f32 %v6985_v24, %v514_v49  ;;  %v1551_v54 = vunpack.c.l.b16 %v1451_v50  ;;  %v1878_v0 = vpop.f32.mrf.mxu2  ;;  %v1458_v1 = vrot.slane %v1456_v47, 5 }
 0x173   : > { %v1656_v57 = vpop.f32.mrf.mxu1 }
 0x174   : > { %v2229_v58 = vpop.f32.mrf.mxu3  ;;  %v877_v61 = vor.u32 %v875_v22, %v874_v51  ;;  %v554_v62 = vmax.f32 %v515_v52, 0.0  ;;  %v1877_v63 = vadd.f32 %v1876_v27, %v1656_v57  ;;  %v1570_v3 = vpack.c.b16 %v1551_v54, %v1550_v59 }
 0x175   : > { %v1459_v15 = vor.u32 %v1458_v1, %v1455_v60  ;;  %v878_v32 = vrot.slane %v874_v51, 4 }
 0x176   : > { %v1068_v6 = vsel %vm6784_vm13, %v877_v61, %v1067_v55  ;;  %v642_v8 = vpack.c.bf16 %v554_v62, %v554_v62  ;;  %v7129_v9 = vadd.f32 %v2229_v58, %v1877_v63  ;;  %v6328_v10 = vld [vmem:[#allocation2 + $0x9c] sm:$0xff]  ;;  %5881 = vmatmul.msk.bf16.gmra.mxu1 %vm1574_vm4, %v1570_v3 }
 0x177   : > { %v1115_v39 = vld [vmem:[#allocation2 + $0xa0] sm:$0xf]  ;;  %1069 = vst [vmem:[#allocation2 + $0xa8] sm:$0xf] %v1068_v6  ;;  %v1134_v11 = vld [vmem:[#allocation2 + $0xa4] sm:$0x1]  ;;  %5962 = vmatmul.msk.bf16.gmra.mxu2 %vm1574_vm4, %v6328_v10 }
 0x178   : > { %v2080_v12 = vrot.slane %v1115_v39, 5  ;;  %v880_v13 = vshrl.u32 %v642_v8, 16  ;;  %v1462_v18 = vshll.u32 %v1115_v39, 16  ;;  %v883_v19 = vshll.u32 %v642_v8, 16 }
 0x179   : > { %v517_v20 = vpop.f32.mrf.mxu0  ;;  %v2083_v25 = vrot.slane %v1134_v11, 5  ;;  %v1466_v26 = vshrl.u32 %v1115_v39, 16  ;;  %v1472_v43 = vshll.u32 %v1134_v11, 16  ;;  %v1460_v52 = vrot.slane %v1459_v15, 4 }
 0x17a   : > { %v2082_v21 = vrot.slane %v2080_v12, 4  ;;  %v882_v27 = vrot.slane %v880_v13, 7  ;;  %v518_v28 = vadd.f32 %v6985_v24, %v517_v20  ;;  %v2081_v30 = vsel %vm6753_vm9, %v5978_v14, %v2080_v12  ;;  %v1881_v49 = vpop.f32.mrf.mxu2  ;;  %v1074_v12 = vld [vmem:[#allocation2 + $0xb4] sm:$0xf] }
 0x17b   : > { %v1464_v33 = vrot.slane %v1462_v18, 5  ;;  %v1658_v35 = vpop.f32.mrf.mxu1  ;;  %v1468_v42 = vrot.slane %v1466_v26, 4  ;;  %v2127_v50 = vunpack.c.l.b16 %v2081_v30  ;;  %v1474_v62 = vrot.slane %v1472_v43, 5 }
 0x17c   : > { %v2231_v40 = vpop.f32.mrf.mxu3  ;;  %v2084_v41 = vsel %vm6753_vm9, %v2082_v21, %v2083_v25  ;;  %v885_v44 = vor.u32 %v883_v19, %v882_v27  ;;  %v887_v45 = vrot.slane %v882_v27, 4  ;;  %v555_v46 = vmax.f32 %v518_v28, 0.0  ;;  %6069 = vmatmul.msk.bf16.gmra.mxu0 %vm1574_vm4, %v6337_v29  ;;  %v7155_v27 = vld [vmem:[#allocation2 + $0x10] sm:$0xf] }
 0x17d   : > { %v1879_v47 = vadd.f32 %v1878_v0, %v1658_v35  ;;  %v2128_v22 = vunpack.c.l.b16 %v2084_v41  ;;  %v1469_v54 = vor.u32 %v1468_v42, %v1464_v33  ;;  %v1465_v0 = vsel %vm6777_vm12, %v1460_v52, %v1464_v33 }
 0x17e   : > { %v886_v51 = vsel %vm6811_vm0, %v878_v32, %v885_v44  ;;  %v1072_v55 = vsel %vm6820_vm6, %v887_v45, %v1071_v34  ;;  %v643_v57 = vpack.c.bf16 %v555_v46, %v555_v46  ;;  %v1116_v59 = vld [vmem:[#allocation2 + $0xa8] sm:$0xf]  ;;  %v1552_v15 = vunpack.c.l.b16 %v1465_v0 }
 0x17f   : > { %v7143_v58 = vadd.f32 %v2231_v40, %v1879_v47  ;;  %1070 = vst.msk [vmem:[#allocation2 + $0xac] sm:$0xf] %vm559_vm2, %v886_v51  ;;  %v2146_v60 = vpack.c.b16 %v2128_v22, %v2127_v50  ;;  %v1470_v61 = vrot.slane %v1469_v54, 4  ;;  %v1477_v1 = vshrl.u32 %v1116_v59, 16  ;;  %v1950_v29 = vld [vmem:[#allocation2 + $0xa8] sm:$0xe] }
 0x180   : > { %1073 = vst [vmem:[#allocation2 + $0xb0] sm:$0x1] %v1072_v55  ;;  %v889_v63 = vshrl.u32 %v643_v57, 16  ;;  %v1480_v3 = vshll.u32 %v1116_v59, 16  ;;  %v892_v10 = vshll.u32 %v643_v57, 16  ;;  %v3327_v43 = vrot.slane %v7155_v27, 5 }
 0x181   : > { %5995 = vmatmul.msk.bf16.gmra.mxu3 %vm1574_vm4, %v2146_v60  ;;  %v519_v4 = vpop.f32.mrf.mxu0  ;;  %v1475_v6 = vsel %vm6777_vm12, %v1470_v61, %v1474_v62  ;;  %v1479_v18 = vrot.slane %v1477_v1, 4  ;;  %v5979_v46 = vrot.slane %v1950_v29, 9  ;;  %v6338_v57 = vld [vmem:[#allocation2 + $0x60] sm:$0xff]  ;;  %v1078_v61 = vld [vmem:[#allocation2 + $0xbc] sm:$0x1] }
 0x182   : > { %v7151_v8 = vrot.slane %v889_v63, 7  ;;  %v520_v39 = vadd.f32 %v6985_v24, %v519_v4  ;;  %v1553_v11 = vunpack.c.l.b16 %v1475_v6  ;;  %v1482_v19 = vrot.slane %v1480_v3, 5  ;;  %v1883_v26 = vpop.f32.mrf.mxu2 }
 0x183   : > { %v1661_v13 = vpop.f32.mrf.mxu1 }
 0x184   : > { %v2234_v14 = vpop.f32.mrf.mxu3  ;;  %v894_v20 = vor.u32 %v892_v10, %v7151_v8  ;;  %v556_v21 = vmax.f32 %v520_v39, 0.0  ;;  %v1882_v25 = vadd.f32 %v1881_v49, %v1661_v13  ;;  %v1571_v28 = vpack.c.b16 %v1553_v11, %v1552_v15 }
 0x185   : > { %v1483_v42 = vor.u32 %v1482_v19, %v1479_v18  ;;  %v895_v44 = vrot.slane %v7151_v8, 4 }
 0x186   : > { %v1075_v30 = vsel %vm6784_vm13, %v894_v20, %v1074_v12  ;;  %v644_v33 = vpack.c.bf16 %v556_v21, %v556_v21  ;;  %v7159_v32 = vadd.f32 %v2234_v14, %v1882_v25  ;;  %v6329_v34 = vld [vmem:[#allocation2 + $0xa8] sm:$0xff]  ;;  %5882 = vmatmul.msk.bf16.gmra.mxu1 %vm1574_vm4, %v1571_v28 }
 0x187   : > { %v1117_v35 = vld [vmem:[#allocation2 + $0xac] sm:$0xf]  ;;  %1076 = vst [vmem:[#allocation2 + $0xb4] sm:$0xf] %v1075_v30  ;;  %v1135_v40 = vld [vmem:[#allocation2 + $0xb0] sm:$0x1]  ;;  %5963 = vmatmul.msk.bf16.gmra.mxu2 %vm1574_vm4, %v6329_v34 }
 0x188   : > { %v2087_v41 = vrot.slane %v1117_v35, 5  ;;  %v897_v45 = vshrl.u32 %v644_v33, 16  ;;  %v1486_v47 = vshll.u32 %v1117_v35, 16  ;;  %v900_v49 = vshll.u32 %v644_v33, 16  ;;  %v7186_v34 = vld [vmem:[#allocation2 + $0xc] sm:$0xf] }
 0x189   : > { %v522_v50 = vpop.f32.mrf.mxu0  ;;  %v2090_v52 = vrot.slane %v1135_v40, 5  ;;  %v1490_v54 = vshrl.u32 %v1117_v35, 16  ;;  %v1484_v1 = vrot.slane %v1483_v42, 4  ;;  %v1496_v4 = vshll.u32 %v1135_v40, 16 }
 0x18a   : > { %v2089_v22 = vrot.slane %v2087_v41, 4  ;;  %v899_v51 = vrot.slane %v897_v45, 7  ;;  %v523_v55 = vadd.f32 %v6985_v24, %v522_v50  ;;  %v2088_v59 = vsel %vm6753_vm9, %v5979_v46, %v2087_v41  ;;  %v1886_v11 = vpop.f32.mrf.mxu2  ;;  %v6129_v24 = vld [vmem:[%s8966_s3 + $0x18] sm:$0xf] }
 0x18b   : > { %v1488_v60 = vrot.slane %v1486_v47, 5  ;;  %v1663_v62 = vpop.f32.mrf.mxu1  ;;  %v1492_v3 = vrot.slane %v1490_v54, 4  ;;  %v2129_v12 = vunpack.c.l.b16 %v2088_v59  ;;  %v3823_v15 = vsel %vm1623_vm3, %v6129_v24, 0  ;;  %v6412_v47 = vld [vmem:[%s8965_s2] ss:$0 sm:$0xff] }
 0x18c   : > { %v2236_v63 = vpop.f32.mrf.mxu3  ;;  %v2091_v0 = vsel %vm6753_vm9, %v2089_v22, %v2090_v52  ;;  %v902_v6 = vor.u32 %v900_v49, %v899_v51  ;;  %v904_v8 = vrot.slane %v899_v51, 4  ;;  %v557_v10 = vmax.f32 %v523_v55, 0.0  ;;  %6070 = vmatmul.msk.bf16.gmra.mxu0 %vm1574_vm4, %v6338_v57  ;;  %3832 = vmatpush.bf16.msrb.mxu3 %v3823_v15  ;;  %v1081_v54 = vld [vmem:[#allocation2 + $0xc0] sm:$0xf] }
 0x18d   : > { %v1884_v39 = vadd.f32 %v1883_v26, %v1663_v62  ;;  %v2130_v13 = vunpack.c.l.b16 %v2091_v0  ;;  %v1493_v14 = vor.u32 %v1492_v3, %v1488_v60  ;;  %v7181_v26 = vld [vmem:[#allocation2 + $0xc] sm:$0xe]  ;;  %v1489_v29 = vsel %vm6777_vm12, %v1484_v1, %v1488_v60 }
 0x18e   : > { %v903_v18 = vsel %vm6811_vm0, %v895_v44, %v902_v6  ;;  %v1079_v19 = vsel %vm6820_vm6, %v904_v8, %v1078_v61  ;;  %v645_v20 = vpack.c.bf16 %v557_v10, %v557_v10  ;;  %v1118_v25 = vld [vmem:[#allocation2 + $0xb4] sm:$0xf]  ;;  %v1498_v33 = vrot.slane %v1496_v4, 5  ;;  %v6210_v8 = vld [vmem:[%s8966_s3 + $0x1c] sm:$0xf] }
 0x18f   : > { %v7179_v21 = vadd.f32 %v2236_v63, %v1884_v39  ;;  %1077 = vst.msk [vmem:[#allocation2 + $0xb8] sm:$0xf] %vm559_vm2, %v903_v18  ;;  %v2147_v28 = vpack.c.b16 %v2130_v13, %v2129_v12  ;;  %v1494_v30 = vrot.slane %v1493_v14, 4  ;;  %v1501_v41 = vshrl.u32 %v1118_v25, 16  ;;  %v1951_v22 = vld [vmem:[#allocation2 + $0xb4] sm:$0xe] }
 0x190   : > { %1080 = vst [vmem:[#allocation2 + $0xbc] sm:$0x1] %v1079_v19  ;;  %v906_v35 = vshrl.u32 %v645_v20, 16  ;;  %v909_v40 = vshll.u32 %v645_v20, 16  ;;  %v1504_v42 = vshll.u32 %v1118_v25, 16  ;;  %v6096_v52 = vrot.slane %v7181_v26, 9 }
 0x191   : > { %5996 = vmatmul.msk.bf16.gmra.mxu3 %vm1574_vm4, %v2147_v28  ;;  %v524_v44 = vpop.f32.mrf.mxu0  ;;  %v1499_v45 = vsel %vm6777_vm12, %v1494_v30, %v1498_v33  ;;  %v1554_v57 = vunpack.c.l.b16 %v1489_v29  ;;  %v1503_v59 = vrot.slane %v1501_v41, 4  ;;  %v7199_v60 = vrot.slane %v3327_v43, 4  ;;  %v6243_v30 = vld [vmem:[%s8966_s3 + $0x20] sm:$0xf] }
 0x192   : > { %v7191_v46 = vrot.slane %v906_v35, 7  ;;  %v525_v49 = vadd.f32 %v6412_v47, %v524_v44  ;;  %v1555_v50 = vunpack.c.l.b16 %v1499_v45  ;;  %v2656_v61 = vshrl.u32 %v7186_v34, 16  ;;  %v1888_v1 = vpop.f32.mrf.mxu2 }
 0x193   : > { %v1666_v51 = vpop.f32.mrf.mxu1  ;;  %v1506_v3 = vrot.slane %v1504_v42, 5  ;;  %v5980_v6 = vrot.slane %v1951_v22, 9  ;;  %v2665_v10 = vshll.u32 %v7155_v27, 16  ;;  %v2669_v39 = vshrl.u32 %v7155_v27, 16  ;;  %v1085_v22 = vld [vmem:[#allocation2 + $0xc8] sm:$0x1] }
 0x194   : > { %v2239_v55 = vpop.f32.mrf.mxu3  ;;  %v911_v62 = vor.u32 %v909_v40, %v7191_v46  ;;  %v558_v63 = vmax.f32 %v525_v49, 0.0  ;;  %v1887_v0 = vadd.f32 %v1886_v11, %v1666_v51  ;;  %v1572_v4 = vpack.c.b16 %v1555_v50, %v1554_v57  ;;  %v2609_v50 = vld [vmem:[#allocation2 + $0x14] sm:$0x1] }
 0x195   : > { %v4477_v15 = vsel %vm1623_vm3, %v6210_v8, 0  ;;  %v912_v18 = vrot.slane %v7191_v46, 4  ;;  %v1507_v7 = vor.u32 %v1506_v3, %v1503_v59  ;;  %v6339_v46 = vld [vmem:[#allocation2 + $0x6c] sm:$0xff]  ;;  %v7241_v31 = vrot.slane %v2665_v10, 5 }
 0x196   : > { %v1082_v24 = vsel %vm6784_vm13, %v911_v62, %v1081_v54  ;;  %v646_v12 = vpack.c.bf16 %v558_v63, %v558_v63  ;;  %v7210_v13 = vadd.f32 %v2239_v55, %v1887_v0  ;;  %v6330_v14 = vld [vmem:[#allocation2 + $0xb4] sm:$0xff]  ;;  %5883 = vmatmul.msk.bf16.gmra.mxu1 %vm1574_vm4, %v1572_v4  ;;  %4486 = vmatpush.bf16.msra.mxu0 %v4477_v15  ;;  %v4875_v62 = vsel %vm1623_vm3, %v6243_v30, 0 }
 0x197   : > { %v1119_v11 = vld [vmem:[#allocation2 + $0xb8] sm:$0xf]  ;;  %1083 = vst [vmem:[#allocation2 + $0xc0] sm:$0xf] %v1082_v24  ;;  %v1136_v19 = vld [vmem:[#allocation2 + $0xbc] sm:$0x1]  ;;  %5964 = vmatmul.msk.bf16.gmra.mxu2 %vm1574_vm4, %v6330_v14  ;;  %4884 = vmatpush.bf16.msra.mxu1 %v4875_v62 }
 0x198   : > { %v2094_v20 = vrot.slane %v1119_v11, 5  ;;  %v914_v25 = vshrl.u32 %v646_v12, 16  ;;  %v917_v28 = vshll.u32 %v646_v12, 16  ;;  %v1510_v29 = vshll.u32 %v1119_v11, 16 }
 0x199   : > { %v2495_v33 = vpop.f32.mrf.mxu0  ;;  %v2097_v41 = vrot.slane %v1136_v19, 5  ;;  %v1514_v42 = vshrl.u32 %v1119_v11, 16  ;;  %v1520_v49 = vshll.u32 %v1136_v19, 16  ;;  %v3330_v24 = vrot.slane %v2609_v50, 5 }
 0x19a   : > { %v2095_v35 = vsel %vm6753_vm9, %v5980_v6, %v2094_v20  ;;  %v2096_v40 = vrot.slane %v2094_v20, 4  ;;  %v916_v44 = vrot.slane %v914_v25, 7  ;;  %v7222_v45 = vadd.f32 %v2495_v33, %v7017_v48  ;;  %v1891_v4 = vpop.f32.mrf.mxu2 }
 0x19b   : > { %v1512_v47 = vrot.slane %v1510_v29, 5  ;;  %v1668_v54 = vpop.f32.mrf.mxu1  ;;  %v2131_v57 = vunpack.c.l.b16 %v2095_v35  ;;  %v1516_v59 = vrot.slane %v1514_v42, 4  ;;  %v1508_v6 = vrot.slane %v1507_v7, 4 }
 0x19c   : > { %v2241_v51 = vpop.f32.mrf.mxu3  ;;  %v2098_v55 = vsel %vm6753_vm9, %v2096_v40, %v2097_v41  ;;  %v919_v63 = vor.u32 %v917_v28, %v916_v44  ;;  %v921_v0 = vrot.slane %v916_v44, 4  ;;  %v1889_v3 = vadd.f32 %v1888_v1, %v1668_v54  ;;  %6071 = vmatmul.msk.bf16.gmra.mxu0 %vm1574_vm4, %v6339_v46 }
 0x19d   : > { %v2132_v48 = vunpack.c.l.b16 %v2098_v55  ;;  %v1517_v8 = vor.u32 %v1516_v59, %v1512_v47  ;;  %v2659_v12 = vshll.u32 %v7186_v34, 16  ;;  %v1513_v1 = vsel %vm6777_vm12, %v1508_v6, %v1512_v47  ;;  %v2611_v47 = vld [vmem:[#allocation2 + $0x1c] sm:$0xf]  ;;  %v3262_v59 = vld [vmem:[#allocation2 + $0x18] sm:$0xe] }
 0x19e   : > { %v920_v14 = vsel %vm6811_vm0, %v912_v18, %v919_v63  ;;  %v1086_v11 = vsel %vm6820_vm6, %v921_v0, %v1085_v22  ;;  %v7233_v15 = vadd.f32 %v2241_v51, %v1889_v3  ;;  %v1522_v25 = vrot.slane %v1520_v49, 5  ;;  %v6340_v51 = vld [vmem:[#allocation2 + $0x78] sm:$0xff] }
 0x19f   : > { %v2148_v19 = vpack.c.b16 %v2132_v48, %v2131_v57  ;;  %1084 = vst.msk [vmem:[#allocation2 + $0xc4] sm:$0xf] %vm559_vm2, %v920_v14  ;;  %v1518_v20 = vrot.slane %v1517_v8, 4  ;;  %v3331_v28 = vsel %vm6753_vm9, %v7199_v60, %v3330_v24  ;;  %v2671_v18 = vrot.slane %v2669_v39, 4  ;;  %v7265_v57 = vld [vmem:[#allocation2 + $0x20] sm:$0x1] }
 0x1a0   : > { %1087 = vst [vmem:[#allocation2 + $0xc8] sm:$0x1] %v1086_v11  ;;  %v3328_v29 = vsel %vm6753_vm9, %v6096_v52, %v3327_v43  ;;  %v1556_v60 = vunpack.c.l.b16 %v1513_v1  ;;  %v3440_v33 = vunpack.c.l.b16 %v3331_v28  ;;  %v2658_v40 = vrot.slane %v2656_v61, 4  ;;  %v2610_v6 = vld [vmem:[#allocation2 + $0x18] sm:$0xf] }
 0x1a1   : > { %5997 = vmatmul.msk.bf16.gmra.mxu3 %vm1574_vm4, %v2148_v19  ;;  %v2497_v37 = vpop.f32.mrf.mxu0  ;;  %v1523_v7 = vsel %vm6777_vm12, %v1518_v20, %v1522_v25  ;;  %v2661_v41 = vrot.slane %v2659_v12, 5  ;;  %v3439_v46 = vunpack.c.l.b16 %v3328_v29  ;;  %v2672_v26 = vor.u32 %v2671_v18, %v7241_v31  ;;  %v7271_v14 = vld [vmem:[#allocation2 + $0x1c] sm:$0xf]  ;;  %v4600_v1 = vld [vmem:[#allocation2 + $0x18] sm:$0xe] }
 0x1a2   : > { %v7253_v30 = vadd.f32 %v2497_v37, %v7031_v17  ;;  %v1557_v10 = vunpack.c.l.b16 %v1523_v7  ;;  %v1893_v27 = vpop.f32.mrf.mxu2  ;;  %v2675_v52 = vshll.u32 %v2609_v50, 16  ;;  %v3334_v22 = vrot.slane %v2611_v47, 5  ;;  %v6347_v20 = vld [vmem:[#allocation2 + $0x18] sm:$0xff] }
 0x1a3   : > { %v1671_v39 = vpop.f32.mrf.mxu1  ;;  %v3471_v17 = vpack.c.b16 %v3440_v33, %v3439_v46  ;;  %v2662_v49 = vor.u32 %v2661_v41, %v2658_v40  ;;  %v2673_v34 = vrot.slane %v2672_v26, 4  ;;  %v2689_v8 = vshll.u32 %v2611_v47, 16  ;;  %v4601_v46 = vld [vmem:[#allocation2 + $0x24] sm:$0xe] }
 0x1a4   : > { %v2244_v35 = vpop.f32.mrf.mxu3  ;;  %v1892_v42 = vadd.f32 %v1891_v4, %v1671_v39  ;;  %v1573_v44 = vpack.c.b16 %v1557_v10, %v1556_v60  ;;  %v2677_v55 = vrot.slane %v2675_v52, 5  ;;  %v3336_v50 = vrot.slane %v3334_v22, 4  ;;  %v7284_v10 = vld [vmem:[#allocation2 + $0x20] sm:$0x1] }
 0x1a5   : > { %v2663_v0 = vrot.slane %v2662_v49, 4  ;;  %v6097_v24 = vrot.slane %v3262_v59, 9  ;;  %v3337_v12 = vrot.slane %v7265_v57, 5  ;;  %v2680_v37 = vshrl.u32 %v2610_v6, 16 }
 0x1a6   : > { %v7258_v43 = vadd.f32 %v2244_v35, %v1892_v42  ;;  %5884 = vmatmul.msk.bf16.gmra.mxu1 %vm1574_vm4, %v1573_v44  ;;  %v2678_v48 = vsel %vm6777_vm12, %v2673_v34, %v2677_v55  ;;  %v2683_v7 = vshll.u32 %v2610_v6, 16  ;;  %v7282_v29 = vrot.slane %v2689_v8, 5  ;;  %v7288_v35 = vld [vmem:[#allocation2 + $0x28] sm:$0xf]  ;;  %v7300_v55 = vld [vmem:[#allocation2 + $0x2c] sm:$0x1] }
 0x1a7   : > { %6113 = vmatmul.msk.bf16.vlgmr.msrb.gmra.mxu2 %vm1574_vm4, %v3471_v17  ;;  %v2668_v19 = vsel %vm6777_vm12, %v2663_v0, %v7241_v31  ;;  %v3042_v25 = vunpack.c.l.b16 %v2678_v48  ;;  %v3335_v28 = vsel %vm6753_vm9, %v6097_v24, %v3334_v22  ;;  %v3338_v18 = vsel %vm6753_vm9, %v3336_v50, %v3337_v12  ;;  %v7309_v12 = vld [vmem:[#allocation2 + $0x34] sm:$0xf] }
 0x1a8   : > { %v4666_v33 = vrot.slane %v7271_v14, 5  ;;  %v3041_v39 = vunpack.c.l.b16 %v2668_v19  ;;  %v6227_v40 = vrot.slane %v4600_v1, 9  ;;  %v3441_v42 = vunpack.c.l.b16 %v3335_v28 }
 0x1a9   : > { %v2500_v61 = vpop.f32.mrf.mxu0  ;;  %v3442_v44 = vunpack.c.l.b16 %v3338_v18  ;;  %v4669_v52 = vrot.slane %v7284_v10, 5  ;;  %v2682_v34 = vrot.slane %v2680_v37, 4  ;;  %v6228_v0 = vrot.slane %v4601_v46, 9 }
 0x1aa   : > { %v7263_v54 = vadd.f32 %v2500_v61, %v7054_v23  ;;  %v1896_v4 = vpop.f32.mrf.mxu2  ;;  %v2693_v23 = vshrl.u32 %v2611_v47, 16  ;;  %v3073_v26 = vpack.c.b16 %v3042_v25, %v3041_v39  ;;  %v4667_v47 = vsel %vm6753_vm9, %v6227_v40, %v4666_v33  ;;  %v7315_v25 = vld [vmem:[#allocation2 + $0x2c] sm:$0x1]  ;;  %v6341_v39 = vld [vmem:[#allocation2 + $0x84] sm:$0xff] }
 0x1ab   : > { %v1673_v62 = vpop.f32.mrf.mxu1  ;;  %v4668_v17 = vrot.slane %v4666_v33, 4  ;;  %v2685_v61 = vrot.slane %v2683_v7, 5  ;;  %v2699_v48 = vshll.u32 %v7265_v57, 16  ;;  %v4778_v6 = vunpack.c.l.b16 %v4667_v47  ;;  %v7321_v7 = vld [vmem:[#allocation2 + $0x38] sm:$0x1] }
 0x1ac   : > { %v2246_v63 = vpop.f32.mrf.mxu3  ;;  %v1894_v3 = vadd.f32 %v1893_v27, %v1673_v62  ;;  %6072 = vmatmul.msk.bf16.gmra.mxu0 %vm1574_vm4, %v6340_v51  ;;  %v2695_v60 = vrot.slane %v2693_v23, 4  ;;  %v7293_v27 = vld [vmem:[#allocation2 + $0x28] sm:$0xf]  ;;  %v4602_v23 = vld [vmem:[#allocation2 + $0x30] sm:$0xe]  ;;  %v4676_v1 = vrot.slane %v7300_v55, 5 }
 0x1ad   : > { %v4673_v50 = vrot.slane %v7293_v27, 5  ;;  %v6229_v33 = vrot.slane %v4602_v23, 9  ;;  %v3263_v40 = vld [vmem:[#allocation2 + $0x24] sm:$0xe]  ;;  %v4680_v46 = vrot.slane %v7309_v12, 5  ;;  %v3344_v47 = vrot.slane %v7315_v25, 5 }
 0x1ae   : > { %v7273_v11 = vadd.f32 %v2246_v63, %v1894_v3  ;;  %v2696_v51 = vor.u32 %v2695_v60, %v7282_v29  ;;  %v4670_v63 = vsel %vm6753_vm9, %v4668_v17, %v4669_v52  ;;  %v3472_v3 = vpack.c.b16 %v3442_v44, %v3441_v42  ;;  %v2613_v17 = vld [vmem:[#allocation2 + $0x24] sm:$0xf] }
 0x1af   : > { %v4779_v8 = vunpack.c.l.b16 %v4670_v63  ;;  %v4675_v19 = vrot.slane %v4673_v50, 4  ;;  %v2713_v52 = vshll.u32 %v7288_v35, 16  ;;  %vm5669_vm2 = vcmask 162816  }
 0x1b0   : > { %v2697_v18 = vrot.slane %v2696_v51, 4  ;;  %v4682_v51 = vrot.slane %v4680_v46, 4 }
 0x1b1   : > { %6194 = vmatmul.msk.bf16.vlgmr.msrb.gmra.mxu3 %vm1574_vm4, %v6347_v20  ;;  %v2502_v31 = vpop.f32.mrf.mxu0  ;;  %v2686_v20 = vor.u32 %v2685_v61, %v2682_v34  ;;  %v7317_v57 = vpack.c.b16 %v4779_v8, %v4778_v6  ;;  %v4677_v60 = vsel %vm6753_vm9, %v4675_v19, %v4676_v1  ;;  %v4681_v61 = vsel %vm6753_vm9, %v6229_v33, %v4680_v46  ;;  %v6348_v19 = vld [vmem:[#allocation2 + $0x24] sm:$0xff] }
 0x1b2   : > { %v7291_v41 = vadd.f32 %v2502_v31, %v7068_v2  ;;  %v3341_v2 = vrot.slane %v7288_v35, 5  ;;  %v1898_v62 = vpop.f32.mrf.mxu2  ;;  %v4781_v44 = vunpack.c.l.b16 %v4677_v60  ;;  %v2704_v8 = vshrl.u32 %v2613_v17, 16 }
 0x1b3   : > { %v1676_v49 = vpop.f32.mrf.mxu1  ;;  %8992 = vst [vmem:[#allocation6_spill] sm:$0xff] %v7317_v57  ;;  %v2707_v1 = vshll.u32 %v2613_v17, 16 }
 0x1b4   : > { %v2249_v22 = vpop.f32.mrf.mxu3  ;;  %v1897_v59 = vadd.f32 %v1896_v4, %v1676_v49  ;;  %v4674_v4 = vsel %vm6753_vm9, %v6228_v0, %v4673_v50  ;;  %v3343_v37 = vrot.slane %v3341_v2, 4  ;;  %v2717_v49 = vshrl.u32 %v7288_v35, 16 }
 0x1b5   : > { %v4780_v42 = vunpack.c.l.b16 %v4674_v4  ;;  %v2687_v50 = vrot.slane %v2686_v20, 4  ;;  %v7349_v20 = vrot.slane %v2713_v52, 5 }
 0x1b6   : > { %v7306_v24 = vadd.f32 %v2249_v22, %v1897_v59  ;;  %6080 = vmatmul.msk.bf16.vlgmr.msrb.gmra.mxu1 %vm1574_vm4, %v3073_v26  ;;  %v2701_v26 = vrot.slane %v2699_v48, 5  ;;  %v4683_v59 = vrot.slane %v7321_v7, 5  ;;  %v3345_v6 = vsel %vm6753_vm9, %v3343_v37, %v3344_v47 }
 0x1b7   : > { %6114 = vmatmul.msk.bf16.gmra.mxu2 %vm1574_vm4, %v3472_v3  ;;  %v6098_v3 = vrot.slane %v3263_v40, 9 }
 0x1b8   : > { %v2702_v48 = vsel %vm6777_vm12, %v2697_v18, %v2701_v26  ;;  %v4684_v23 = vsel %vm6753_vm9, %v4682_v51, %v4683_v59  ;;  %v2719_v18 = vrot.slane %v2717_v49, 4  ;;  %v2709_v26 = vrot.slane %v2707_v1, 5  ;;  %v7363_v51 = vld [vmem:[#allocation2 + $0x40] sm:$0xf]  ;;  %v4603_v59 = vld [vmem:[#allocation2 + $0x3c] sm:$0xe] }
 0x1b9   : > { %v2505_v28 = vpop.f32.mrf.mxu0  ;;  %v4783_v60 = vunpack.c.l.b16 %v4684_v23  ;;  %v3044_v33 = vunpack.c.l.b16 %v2702_v48  ;;  %v7368_v48 = vld [vmem:[#allocation2 + $0x44] sm:$0x1] }
 0x1ba   : > { %v7326_v31 = vadd.f32 %v2505_v28, %v7079_v38  ;;  %v7333_v38 = vpack.c.b16 %v4781_v44, %v4780_v42  ;;  %v1901_v0 = vpop.f32.mrf.mxu2  ;;  %v4782_v28 = vunpack.c.l.b16 %v4681_v61  ;;  %v3444_v44 = vunpack.c.l.b16 %v3345_v6 }
 0x1bb   : > { %v1678_v22 = vpop.f32.mrf.mxu1  ;;  %v2720_v49 = vor.u32 %v2719_v18, %v7349_v20  ;;  %v4690_v18 = vrot.slane %v7368_v48, 5 }
 0x1bc   : > { %v2251_v34 = vpop.f32.mrf.mxu3  ;;  %6073 = vmatmul.msk.bf16.gmra.mxu0 %vm1574_vm4, %v6341_v39  ;;  %8993 = vst [vmem:[#allocation7_spill] sm:$0xff] %v7333_v38  ;;  %v1899_v63 = vadd.f32 %v1898_v62, %v1678_v22  ;;  %v2692_v62 = vsel %vm6777_vm12, %v2687_v50, %v7282_v29  ;;  %v3342_v39 = vsel %vm6753_vm9, %v6098_v3, %v3341_v2  ;;  %v2706_v29 = vrot.slane %v2704_v8, 4  ;;  %v2617_v22 = vld [vmem:[#allocation2 + $0x34] sm:$0xf] }
 0x1bd   : > { %v7356_v40 = vpack.c.b16 %v4783_v60, %v4782_v28  ;;  %v3043_v46 = vunpack.c.l.b16 %v2692_v62  ;;  %v3443_v52 = vunpack.c.l.b16 %v3342_v39  ;;  %v2723_v2 = vshll.u32 %v7315_v25, 16  ;;  %v6342_v28 = vld [vmem:[#allocation2 + $0x90] sm:$0xff] }
 0x1be   : > { %v7344_v4 = vadd.f32 %v2251_v34, %v1899_v63  ;;  %v2710_v50 = vor.u32 %v2709_v26, %v2706_v29  ;;  %v3348_v3 = vrot.slane %v2617_v22, 5  ;;  %v2721_v6 = vrot.slane %v2720_v49, 4  ;;  %v2616_v49 = vld [vmem:[#allocation2 + $0x30] sm:$0xf] }
 0x1bf   : > { %8994 = vst [vmem:[#allocation8_spill] sm:$0xff] %v7356_v40  ;;  %v3074_v61 = vpack.c.b16 %v3044_v33, %v3043_v46  ;;  %v4687_v8 = vrot.slane %v7363_v51, 5  ;;  %v2725_v25 = vrot.slane %v2723_v2, 5  ;;  %v3264_v33 = vld [vmem:[#allocation2 + $0x30] sm:$0xe]  ;;  %v2737_v26 = vshll.u32 %v2617_v22, 16 }
 0x1c0   : > { %v3350_v39 = vrot.slane %v3348_v3, 4  ;;  %v6350_v40 = vld [vmem:[#allocation2 + $0x3c] sm:$0xff] }
 0x1c1   : > { %6195 = vmatmul.msk.bf16.gmra.mxu3 %vm1574_vm4, %v6348_v19  ;;  %v2507_v37 = vpop.f32.mrf.mxu0  ;;  %v7372_v19 = vld [vmem:[#allocation2 + $0x38] sm:$0x1]  ;;  %v4689_v62 = vrot.slane %v4687_v8, 4  ;;  %v2726_v29 = vsel %vm6777_vm12, %v2721_v6, %v2725_v25 }
 0x1c2   : > { %v7359_v42 = vadd.f32 %v2507_v37, %v7093_v16  ;;  %v1903_v35 = vpop.f32.mrf.mxu2  ;;  %v3473_v16 = vpack.c.b16 %v3444_v44, %v3443_v52  ;;  %v2711_v37 = vrot.slane %v2710_v50, 4  ;;  %v6349_v50 = vld [vmem:[#allocation2 + $0x30] sm:$0xff] }
 0x1c3   : > { %v1681_v47 = vpop.f32.mrf.mxu1 }
 0x1c4   : > { %8995 = vst [vmem:[#allocation9_spill] sm:$0xff] %v7359_v42  ;;  %v2254_v17 = vpop.f32.mrf.mxu3  ;;  %v1902_v34 = vadd.f32 %v1901_v0, %v1681_v47  ;;  %v6230_v0 = vrot.slane %v4603_v59, 9  ;;  %v4691_v47 = vsel %vm6753_vm9, %v4689_v62, %v4690_v18  ;;  %v6099_v59 = vrot.slane %v3264_v33, 9  ;;  %v2620_v33 = vld [vmem:[#allocation2 + $0x40] sm:$0xf] }
 0x1c5   : > { %v4785_v2 = vunpack.c.l.b16 %v4691_v47  ;;  %v2716_v6 = vsel %vm6777_vm12, %v2711_v37, %v7349_v20 }
 0x1c6   : > { %v7365_v63 = vadd.f32 %v2254_v17, %v1902_v34  ;;  %6081 = vmatmul.msk.bf16.gmra.mxu1 %vm1574_vm4, %v3074_v61  ;;  %v4688_v60 = vsel %vm6753_vm9, %v6230_v0, %v4687_v8  ;;  %v2741_v34 = vshrl.u32 %v2617_v22, 16  ;;  %v3349_v25 = vsel %vm6753_vm9, %v6099_v59, %v3348_v3  ;;  %v3960_v59 = vld [vmem:[#allocation2 + $0x50] sm:$0x1] }
 0x1c7   : > { %6115 = vmatmul.msk.bf16.gmra.mxu2 %vm1574_vm4, %v3473_v16  ;;  %v4784_v61 = vunpack.c.l.b16 %v4688_v60  ;;  %v7398_v60 = vrot.slane %v2737_v26, 5  ;;  %v3045_v20 = vunpack.c.l.b16 %v2716_v6  ;;  %v7404_v26 = vld [vmem:[#allocation2 + $0x4c] sm:$0xf] }
 0x1c8   : > { %v2743_v62 = vrot.slane %v2741_v34, 4  ;;  %v4604_v34 = vld [vmem:[#allocation2 + $0x48] sm:$0xe] }
 0x1c9   : > { %v2510_v23 = vpop.f32.mrf.mxu0  ;;  %v7393_v8 = vpack.c.b16 %v4785_v2, %v4784_v61  ;;  %v6231_v6 = vrot.slane %v4604_v34, 9 }
 0x1ca   : > { %v7375_v1 = vadd.f32 %v2510_v23, %v7104_v53  ;;  %v3351_v53 = vrot.slane %v7372_v19, 5  ;;  %v1906_v52 = vpop.f32.mrf.mxu2  ;;  %v3046_v23 = vunpack.c.l.b16 %v2726_v29  ;;  %v3445_v29 = vunpack.c.l.b16 %v3349_v25 }
 0x1cb   : > { %v1683_v44 = vpop.f32.mrf.mxu1  ;;  %8997 = vst [vmem:[#allocation11_spill] sm:$0xff] %v7393_v8  ;;  %v2744_v3 = vor.u32 %v2743_v62, %v7398_v60  ;;  %v6343_v62 = vld [vmem:[#allocation2 + $0x9c] sm:$0xff] }
 0x1cc   : > { %8996 = vst [vmem:[#allocation10_spill] sm:$0xff] %v7375_v1  ;;  %v2256_v46 = vpop.f32.mrf.mxu3  ;;  %6074 = vmatmul.msk.bf16.gmra.mxu0 %vm1574_vm4, %v6342_v28  ;;  %v1904_v17 = vadd.f32 %v1903_v35, %v1683_v44  ;;  %v3352_v0 = vsel %vm6753_vm9, %v3350_v39, %v3351_v53  ;;  %v2728_v35 = vshrl.u32 %v2616_v49, 16  ;;  %v2731_v28 = vshll.u32 %v2616_v49, 16 }
 0x1cd   : > { %v3446_v37 = vunpack.c.l.b16 %v3352_v0  ;;  %v3355_v49 = vrot.slane %v2620_v33, 5 }
 0x1ce   : > { %v7386_v16 = vadd.f32 %v2256_v46, %v1904_v17  ;;  %v3075_v46 = vpack.c.b16 %v3046_v23, %v3045_v20  ;;  %v2730_v53 = vrot.slane %v2728_v35, 4  ;;  %v2733_v61 = vrot.slane %v2731_v28, 5 }
 0x1cf   : > { %v3474_v2 = vpack.c.b16 %v3446_v37, %v3445_v29  ;;  %v2745_v35 = vrot.slane %v2744_v3, 4  ;;  %v3357_v25 = vrot.slane %v3355_v49, 4 }
 0x1d0   : > { %v2734_v23 = vor.u32 %v2733_v61, %v2730_v53  ;;  %v2761_v61 = vshll.u32 %v2620_v33, 16 }
 0x1d1   : > { %6196 = vmatmul.msk.bf16.gmra.mxu3 %vm1574_vm4, %v6349_v50  ;;  %v2512_v22 = vpop.f32.mrf.mxu0  ;;  %v2747_v50 = vshll.u32 %v7372_v19, 16 }
 0x1d2   : > { %v7401_v18 = vadd.f32 %v2512_v22, %v7118_v36  ;;  %v1908_v17 = vpop.f32.mrf.mxu2  ;;  %v7412_v22 = vld [vmem:[#allocation2 + $0x44] sm:$0x1] }
 0x1d3   : > { %v1686_v39 = vpop.f32.mrf.mxu1  ;;  %v2749_v29 = vrot.slane %v2747_v50, 5  ;;  %v3358_v53 = vrot.slane %v7412_v22, 5 }
 0x1d4   : > { %8998 = vst [vmem:[#allocation12_spill] sm:$0xff] %v7401_v18  ;;  %v2259_v44 = vpop.f32.mrf.mxu3  ;;  %v1907_v47 = vadd.f32 %v1906_v52, %v1686_v39  ;;  %v4694_v52 = vrot.slane %v7404_v26, 5  ;;  %v4697_v39 = vrot.slane %v3960_v59, 5 }
 0x1d5   : > { %v2750_v59 = vsel %vm6777_vm12, %v2745_v35, %v2749_v29  ;;  %v3359_v50 = vsel %vm6753_vm9, %v3357_v25, %v3358_v53 }
 0x1d6   : > { %v7406_v36 = vadd.f32 %v2259_v44, %v1907_v47  ;;  %6082 = vmatmul.msk.bf16.gmra.mxu1 %vm1574_vm4, %v3075_v46  ;;  %v4695_v20 = vsel %vm6753_vm9, %v6231_v6, %v4694_v52  ;;  %v4696_v37 = vrot.slane %v4694_v52, 4  ;;  %v3265_v44 = vld [vmem:[#allocation2 + $0x3c] sm:$0xe]  ;;  %v2735_v52 = vrot.slane %v2734_v23, 4 }
 0x1d7   : > { %6116 = vmatmul.msk.bf16.gmra.mxu2 %vm1574_vm4, %v3474_v2  ;;  %v2619_v47 = vld [vmem:[#allocation2 + $0x3c] sm:$0xf]  ;;  %v2765_v2 = vshrl.u32 %v2620_v33, 16  ;;  %v6100_v8 = vrot.slane %v3265_v44, 9  ;;  %v3048_v23 = vunpack.c.l.b16 %v2750_v59  ;;  %v7451_v59 = vld [vmem:[#allocation2 + $0x50] sm:$0x1] }
 0x1d8   : > { %v2752_v38 = vshrl.u32 %v2619_v47, 16  ;;  %v2755_v57 = vshll.u32 %v2619_v47, 16  ;;  %v2740_v33 = vsel %vm6777_vm12, %v2735_v52, %v7398_v60  ;;  %v2623_v47 = vld [vmem:[#allocation2 + $0x4c] sm:$0xf] }
 0x1d9   : > { %v2515_v0 = vpop.f32.mrf.mxu0  ;;  %v3356_v35 = vsel %vm6753_vm9, %v6100_v8, %v3355_v49  ;;  %v2767_v25 = vrot.slane %v2765_v2, 4  ;;  %v3047_v44 = vunpack.c.l.b16 %v2740_v33  ;;  %v7443_v8 = vld [vmem:[#allocation2 + $0x58] sm:$0xf]  ;;  %v2622_v2 = vld [vmem:[#allocation2 + $0x48] sm:$0xf] }
 0x1da   : > { %v7415_v28 = vadd.f32 %v2515_v0, %v7129_v9  ;;  %v4698_v9 = vsel %vm6753_vm9, %v4696_v37, %v4697_v39  ;;  %v1911_v34 = vpop.f32.mrf.mxu2  ;;  %v4786_v0 = vunpack.c.l.b16 %v4695_v20  ;;  %v7437_v20 = vrot.slane %v2761_v61, 5 }
 0x1db   : > { %v1688_v19 = vpop.f32.mrf.mxu1  ;;  %v4787_v6 = vunpack.c.l.b16 %v4698_v9  ;;  %v3448_v39 = vunpack.c.l.b16 %v3359_v50  ;;  %v3447_v60 = vunpack.c.l.b16 %v3356_v35  ;;  %v7453_v50 = vld [vmem:[#allocation2 + $0x5c] sm:$0x1]  ;;  %v2789_v35 = vshrl.u32 %v2623_v47, 16 }
 0x1dc   : > { %8999 = vst [vmem:[#allocation13_spill] sm:$0xff] %v7415_v28  ;;  %v2261_v46 = vpop.f32.mrf.mxu3  ;;  %6075 = vmatmul.msk.bf16.gmra.mxu0 %vm1574_vm4, %v6343_v62  ;;  %v1909_v3 = vadd.f32 %v1908_v17, %v1688_v19  ;;  %v2754_v19 = vrot.slane %v2752_v38, 4  ;;  %v2771_v38 = vshll.u32 %v7412_v22, 16 }
 0x1dd   : > { %v7429_v28 = vpack.c.b16 %v4787_v6, %v4786_v0  ;;  %v2768_v0 = vor.u32 %v2767_v25, %v7437_v20  ;;  %v3475_v49 = vpack.c.b16 %v3448_v39, %v3447_v60  ;;  %v4605_v25 = vld [vmem:[#allocation2 + $0x54] sm:$0xe]  ;;  %v2779_v60 = vshll.u32 %v2622_v2, 16 }
 0x1de   : > { %v7427_v62 = vadd.f32 %v2261_v46, %v1909_v3  ;;  %v2757_v46 = vrot.slane %v2755_v57, 5  ;;  %v3076_v3 = vpack.c.b16 %v3048_v23, %v3047_v44  ;;  %v3362_v57 = vrot.slane %v2623_v47, 5 }
 0x1df   : > { %9000 = vst [vmem:[#allocation14_spill] sm:$0xff] %v7429_v28  ;;  %v2769_v52 = vrot.slane %v2768_v0, 4  ;;  %v2785_v23 = vshll.u32 %v2623_v47, 16  ;;  %v2773_v39 = vrot.slane %v2771_v38, 5  ;;  %v3365_v47 = vrot.slane %v7451_v59, 5 }
 0x1e0   : > { %v3364_v44 = vrot.slane %v3362_v57, 4 }
 0x1e1   : > { %6197 = vmatmul.msk.bf16.gmra.mxu3 %vm1574_vm4, %v6350_v40  ;;  %v2517_v17 = vpop.f32.mrf.mxu0 }
 0x1e2   : > { %v7440_v37 = vadd.f32 %v2517_v17, %v7143_v58  ;;  %v1913_v9 = vpop.f32.mrf.mxu2  ;;  %v2758_v58 = vor.u32 %v2757_v46, %v2754_v19  ;;  %v6344_v17 = vld [vmem:[#allocation2 + $0xa8] sm:$0xff] }
 0x1e3   : > { %v1691_v29 = vpop.f32.mrf.mxu1 }
 0x1e4   : > { %9001 = vst [vmem:[#allocation15_spill] sm:$0xff] %v7440_v37  ;;  %v2264_v53 = vpop.f32.mrf.mxu3  ;;  %v1912_v40 = vadd.f32 %v1911_v34, %v1691_v29  ;;  %v4701_v34 = vrot.slane %v7443_v8, 5  ;;  %v2759_v22 = vrot.slane %v2758_v58, 4  ;;  %v3266_v29 = vld [vmem:[#allocation2 + $0x48] sm:$0xe]  ;;  %v6232_v58 = vrot.slane %v4605_v25, 9 }
 0x1e5   : > { %v2781_v37 = vrot.slane %v2779_v60, 5 }
 0x1e6   : > { %v7445_v61 = vadd.f32 %v2264_v53, %v1912_v40  ;;  %6083 = vmatmul.msk.bf16.gmra.mxu1 %vm1574_vm4, %v3076_v3  ;;  %v2776_v53 = vshrl.u32 %v2622_v2, 16  ;;  %v4703_v40 = vrot.slane %v4701_v34, 4  ;;  %v4704_v3 = vrot.slane %v7453_v50, 5 }
 0x1e7   : > { %6117 = vmatmul.msk.bf16.gmra.mxu2 %vm1574_vm4, %v3475_v49  ;;  %v2774_v49 = vsel %vm6777_vm12, %v2769_v52, %v2773_v39  ;;  %v2764_v38 = vsel %vm6777_vm12, %v2759_v22, %v7437_v20  ;;  %v3366_v52 = vsel %vm6753_vm9, %v3364_v44, %v3365_v47  ;;  %v4702_v25 = vsel %vm6753_vm9, %v6232_v58, %v4701_v34  ;;  %v2626_v20 = vld [vmem:[#allocation2 + $0x58] sm:$0xf] }
 0x1e8   : > { %v4705_v2 = vsel %vm6753_vm9, %v4703_v40, %v4704_v3  ;;  %v3050_v39 = vunpack.c.l.b16 %v2774_v49  ;;  %v3049_v22 = vunpack.c.l.b16 %v2764_v38  ;;  %v3450_v40 = vunpack.c.l.b16 %v3366_v52  ;;  %v2625_v3 = vld [vmem:[#allocation2 + $0x54] sm:$0xf] }
 0x1e9   : > { %v2520_v6 = vpop.f32.mrf.mxu0  ;;  %v4788_v34 = vunpack.c.l.b16 %v4702_v25  ;;  %v3267_v25 = vld [vmem:[#allocation2 + $0x54] sm:$0xe] }
 0x1ea   : > { %v7456_v33 = vadd.f32 %v2520_v6, %v7159_v32  ;;  %v1916_v32 = vpop.f32.mrf.mxu2  ;;  %v7466_v6 = vrot.slane %v2785_v23, 5  ;;  %v4789_v23 = vunpack.c.l.b16 %v4705_v2  ;;  %v3077_v49 = vpack.c.b16 %v3050_v39, %v3049_v22 }
 0x1eb   : > { %v1693_v19 = vpop.f32.mrf.mxu1  ;;  %v2809_v39 = vshll.u32 %v2626_v20, 16  ;;  %v2813_v22 = vshrl.u32 %v2626_v20, 16 }
 0x1ec   : > { %9002 = vst [vmem:[#allocation16_spill] sm:$0xff] %v7456_v33  ;;  %v2266_v46 = vpop.f32.mrf.mxu3  ;;  %6076 = vmatmul.msk.bf16.gmra.mxu0 %vm1574_vm4, %v6344_v17  ;;  %v1914_v0 = vadd.f32 %v1913_v9, %v1693_v19  ;;  %v2791_v17 = vrot.slane %v2789_v35, 4  ;;  %v6351_v9 = vld [vmem:[#allocation2 + $0x48] sm:$0xff]  ;;  %v6101_v19 = vrot.slane %v3266_v29, 9  ;;  %v2778_v33 = vrot.slane %v2776_v53, 4 }
 0x1ed   : > { %v7483_v2 = vpack.c.b16 %v4789_v23, %v4788_v34  ;;  %v6102_v34 = vrot.slane %v3267_v25, 9 }
 0x1ee   : > { %v7470_v28 = vadd.f32 %v2266_v46, %v1914_v0  ;;  %v3363_v46 = vsel %vm6753_vm9, %v6101_v19, %v3362_v57  ;;  %v2792_v44 = vor.u32 %v2791_v17, %v7466_v6  ;;  %v3369_v0 = vrot.slane %v2626_v20, 5 }
 0x1ef   : > { %v3449_v47 = vunpack.c.l.b16 %v3363_v46  ;;  %v2782_v58 = vor.u32 %v2781_v37, %v2778_v33  ;;  %9004 = vst [vmem:[#allocation18_spill] sm:$0xff] %v7483_v2  ;;  %v2795_v57 = vshll.u32 %v7451_v59, 16  ;;  %v2800_v19 = vshrl.u32 %v2625_v3, 16 }
 0x1f0   : > { %v2793_v52 = vrot.slane %v2792_v44, 4  ;;  %v3371_v18 = vrot.slane %v3369_v0, 4  ;;  %v6345_v44 = vld [vmem:[#allocation2 + $0xb4] sm:$0xff] }
 0x1f1   : > { %6198 = vmatmul.msk.bf16.gmra.mxu3 %vm1574_vm4, %v6351_v9  ;;  %v2522_v35 = vpop.f32.mrf.mxu0  ;;  %v2783_v37 = vrot.slane %v2782_v58, 4  ;;  %v2802_v59 = vrot.slane %v2800_v19, 4 }
 0x1f2   : > { %v7480_v29 = vadd.f32 %v2522_v35, %v7179_v21  ;;  %v1918_v9 = vpop.f32.mrf.mxu2  ;;  %v2803_v21 = vshll.u32 %v2625_v3, 16  ;;  %v3476_v35 = vpack.c.b16 %v3450_v40, %v3449_v47 }
 0x1f3   : > { %v1696_v53 = vpop.f32.mrf.mxu1  ;;  %v2788_v3 = vsel %vm6777_vm12, %v2783_v37, %v7466_v6  ;;  %v3370_v6 = vsel %vm6753_vm9, %v6102_v34, %v3369_v0 }
 0x1f4   : > { %9003 = vst [vmem:[#allocation17_spill] sm:$0xff] %v7480_v29  ;;  %v2269_v60 = vpop.f32.mrf.mxu3  ;;  %v1917_v38 = vadd.f32 %v1916_v32, %v1696_v53  ;;  %v2627_v29 = vld [vmem:[#allocation2 + $0x5c] sm:$0x1]  ;;  %v2797_v32 = vrot.slane %v2795_v57, 5  ;;  %v2805_v46 = vrot.slane %v2803_v21, 5 }
 0x1f5   : > { %v3372_v23 = vrot.slane %v2627_v29, 5  ;;  %v3946_v21 = vld [vmem:[#allocation2 + $0x18] sm:$0xf] }
 0x1f6   : > { %v7486_v17 = vadd.f32 %v2269_v60, %v1917_v38  ;;  %6084 = vmatmul.msk.bf16.gmra.mxu1 %vm1574_vm4, %v3077_v49  ;;  %v2798_v20 = vsel %vm6777_vm12, %v2793_v52, %v2797_v32  ;;  %v2811_v60 = vrot.slane %v2809_v39, 5  ;;  %v2815_v49 = vrot.slane %v2813_v22, 4  ;;  %v6352_v22 = vld [vmem:[#allocation2 + $0x54] sm:$0xff] }
 0x1f7   : > { %6118 = vmatmul.msk.bf16.gmra.mxu2 %vm1574_vm4, %v3476_v35  ;;  %v3373_v53 = vsel %vm6753_vm9, %v3371_v18, %v3372_v23  ;;  %v2806_v19 = vor.u32 %v2805_v46, %v2802_v59  ;;  %v7505_v35 = vld [vmem:[#allocation2 + $0x64] sm:$0xf]  ;;  %v3051_v52 = vunpack.c.l.b16 %v2788_v3  ;;  %v3052_v25 = vunpack.c.l.b16 %v2798_v20  ;;  %v7513_v3 = vld [vmem:[#allocation2 + $0x68] sm:$0x1] }
 0x1f8   : > { %9005 = vst [vmem:[#allocation19_spill] sm:$0xff] %v7486_v17  ;;  %v3452_v18 = vunpack.c.l.b16 %v3373_v53  ;;  %v2816_v37 = vor.u32 %v2815_v49, %v2811_v60  ;;  %v3451_v23 = vunpack.c.l.b16 %v3370_v6  ;;  %v4004_v46 = vshll.u32 %v7271_v14, 16  ;;  %v7518_v53 = vld [vmem:[#allocation2 + $0x68] sm:$0x1]  ;;  %v3268_v49 = vld [vmem:[#allocation2 + $0x60] sm:$0xe] }
 0x1f9   : > { %v2525_v33 = vpop.f32.mrf.mxu0  ;;  %9007 = vst [vmem:[#allocation21_spill] sm:$0xff] %v7505_v35  ;;  %v2807_v59 = vrot.slane %v2806_v19, 4  ;;  %v3078_v20 = vpack.c.b16 %v3052_v25, %v3051_v52  ;;  %v4711_v52 = vrot.slane %v7513_v3, 5 }
 0x1fa   : > { %v7491_v40 = vadd.f32 %v2525_v33, %v7210_v13  ;;  %v7501_v13 = vld [vmem:[#allocation2 + $0x64] sm:$0xf]  ;;  %v1921_v57 = vpop.f32.mrf.mxu2  ;;  %v2819_v33 = vshll.u32 %v2627_v29, 16  ;;  %9009 = vst [vmem:[#allocation23_spill] sm:$0xff] %v7513_v3  ;;  %v3477_v29 = vpack.c.b16 %v3452_v18, %v3451_v23  ;;  %v2817_v6 = vrot.slane %v2816_v37, 4 }
 0x1fb   : > { %v1698_v47 = vpop.f32.mrf.mxu1  ;;  %v3376_v32 = vrot.slane %v7501_v13, 5  ;;  %v6103_v23 = vrot.slane %v3268_v49, 9 }
 0x1fc   : > { %9006 = vst [vmem:[#allocation20_spill] sm:$0xff] %v7491_v40  ;;  %v2271_v58 = vpop.f32.mrf.mxu3  ;;  %6077 = vmatmul.msk.bf16.gmra.mxu0 %vm1574_vm4, %v6345_v44  ;;  %v1919_v38 = vadd.f32 %v1918_v9, %v1698_v47  ;;  %v3995_v9 = vshrl.u32 %v3946_v21, 16  ;;  %v3998_v44 = vshll.u32 %v3946_v21, 16  ;;  %v4708_v47 = vrot.slane %v7505_v35, 5 }
 0x1fd   : > { %v2821_v21 = vrot.slane %v2819_v33, 5  ;;  %v3378_v19 = vrot.slane %v3376_v32, 4  ;;  %v4606_v33 = vld [vmem:[#allocation2 + $0x60] sm:$0xe] }
 0x1fe   : > { %v7507_v39 = vadd.f32 %v2271_v58, %v1919_v38  ;;  %v4008_v58 = vshrl.u32 %v7271_v14, 16  ;;  %v2812_v38 = vsel %vm6777_vm12, %v2807_v59, %v2811_v60  ;;  %v3997_v1 = vrot.slane %v3995_v9, 4 }
 0x1ff   : > { %v7525_v14 = vrot.slane %v4004_v46, 5  ;;  %v7532_v9 = vunpack.c.l.b16 %v2812_v38  ;;  %v4032_v38 = vshrl.u32 %v7293_v27, 16 }
 0x200   : > { %9008 = vst [vmem:[#allocation22_spill] sm:$0xff] %v7507_v39  ;;  %v4000_v39 = vrot.slane %v3998_v44, 5  ;;  %v3377_v44 = vsel %vm6753_vm9, %v6103_v23, %v3376_v32  ;;  %v2628_v23 = vld [vmem:[#allocation2 + $0x60] sm:$0xf] }
 0x201   : > { %6199 = vmatmul.msk.bf16.gmra.mxu3 %vm1574_vm4, %v6352_v22  ;;  %v2527_v0 = vpop.f32.mrf.mxu0  ;;  %v3949_v22 = vld [vmem:[#allocation2 + $0x24] sm:$0xf]  ;;  %v2827_v3 = vshll.u32 %v2628_v23, 16 }
 0x202   : > { %v7516_v34 = vadd.f32 %v2527_v0, %v7233_v15  ;;  %v4710_v15 = vrot.slane %v4708_v47, 4  ;;  %v1923_v18 = vpop.f32.mrf.mxu2  ;;  %v3379_v0 = vrot.slane %v7518_v53, 5  ;;  %v4019_v60 = vshrl.u32 %v3949_v22, 16 }
 0x203   : > { %v1701_v2 = vpop.f32.mrf.mxu1  ;;  %v4022_v37 = vshll.u32 %v3949_v22, 16  ;;  %v4001_v49 = vor.u32 %v4000_v39, %v3997_v1  ;;  %v6233_v22 = vrot.slane %v4606_v33, 9  ;;  %v3952_v1 = vld [vmem:[#allocation2 + $0x30] sm:$0xf] }
 0x204   : > { %9010 = vst [vmem:[#allocation24_spill] sm:$0xff] %v7516_v34  ;;  %v2274_v40 = vpop.f32.mrf.mxu3  ;;  %v1922_v25 = vadd.f32 %v1921_v57, %v1701_v2  ;;  %v4010_v34 = vrot.slane %v4008_v58, 4  ;;  %v4712_v59 = vsel %vm6753_vm9, %v4710_v15, %v4711_v52  ;;  %v6346_v2 = vld [vmem:[#allocation2 + $0xc0] sm:$0xff]  ;;  %v2822_v57 = vsel %vm6777_vm12, %v2817_v6, %v2821_v21 }
 0x205   : > { %v3380_v46 = vsel %vm6753_vm9, %v3378_v19, %v3379_v0  ;;  %v4021_v21 = vrot.slane %v4019_v60, 4  ;;  %v4024_v15 = vrot.slane %v4022_v37, 5  ;;  %v7548_v32 = vunpack.c.l.b16 %v2822_v57 }
 0x206   : > { %v7529_v42 = vadd.f32 %v2274_v40, %v1922_v25  ;;  %6085 = vmatmul.msk.bf16.gmra.mxu1 %vm1574_vm4, %v3078_v20  ;;  %v4014_v40 = vshll.u32 %v7284_v10, 16  ;;  %v4028_v20 = vshll.u32 %v7293_v27, 16  ;;  %v4011_v6 = vor.u32 %v4010_v34, %v7525_v14 }
 0x207   : > { %6119 = vmatmul.msk.bf16.gmra.mxu2 %vm1574_vm4, %v3477_v29  ;;  %v3453_v52 = vunpack.c.l.b16 %v3377_v44  ;;  %v3454_v19 = vunpack.c.l.b16 %v3380_v46  ;;  %v4709_v10 = vsel %vm6753_vm9, %v6233_v22, %v4708_v47  ;;  %v4002_v27 = vrot.slane %v4001_v49, 4  ;;  %v7555_v46 = vld [vmem:[#allocation2 + $0x70] sm:$0xf] }
 0x208   : > { %9011 = vst [vmem:[#allocation25_spill] sm:$0xff] %v7529_v42  ;;  %v2837_v34 = vshrl.u32 %v7501_v13, 16  ;;  %v4791_v0 = vunpack.c.l.b16 %v4712_v59  ;;  %v4016_v33 = vrot.slane %v4014_v40, 5  ;;  %v4030_v57 = vrot.slane %v4028_v20, 5 }
 0x209   : > { %v2530_v58 = vpop.f32.mrf.mxu0  ;;  %v4034_v44 = vrot.slane %v4032_v38, 4  ;;  %v4025_v47 = vor.u32 %v4024_v15, %v4021_v21  ;;  %v4043_v22 = vshrl.u32 %v3952_v1, 16  ;;  %v2824_v49 = vshrl.u32 %v2628_v23, 16  ;;  %v3969_v21 = vld [vmem:[#allocation2 + $0x74] sm:$0x1] }
 0x20a   : > { %v7545_v29 = vadd.f32 %v2530_v58, %v7258_v43  ;;  %v2833_v43 = vshll.u32 %v7501_v13, 16  ;;  %v1926_v37 = vpop.f32.mrf.mxu2  ;;  %v4012_v58 = vrot.slane %v4011_v6, 4  ;;  %v4046_v17 = vshll.u32 %v3952_v1, 16 }
 0x20b   : > { %v1703_v39 = vpop.f32.mrf.mxu1  ;;  %v2839_v13 = vrot.slane %v2837_v34, 4  ;;  %v4715_v59 = vrot.slane %v7555_v46, 5  ;;  %v3079_v20 = vpack.c.b16 %v7548_v32, %v7532_v9  ;;  %v3478_v38 = vpack.c.b16 %v3454_v19, %v3453_v52 }
 0x20c   : > { %9012 = vst [vmem:[#allocation26_spill] sm:$0xff] %v7545_v29  ;;  %v2276_v25 = vpop.f32.mrf.mxu3  ;;  %6078 = vmatmul.msk.bf16.gmra.mxu0 %vm1574_vm4, %v6346_v2  ;;  %v1924_v60 = vadd.f32 %v1923_v18, %v1703_v39  ;;  %v4790_v29 = vunpack.c.l.b16 %v4709_v10  ;;  %v6353_v2 = vld [vmem:[#allocation2 + $0x60] sm:$0xff]  ;;  %v7559_v35 = vrot.slane %v2833_v43, 5  ;;  %v4035_v6 = vor.u32 %v4034_v44, %v4030_v57 }
 0x20d   : > { %v4007_v1 = vsel %vm6777_vm12, %v4002_v27, %v7525_v14  ;;  %v4038_v10 = vshll.u32 %v7300_v55, 16  ;;  %v2826_v39 = vrot.slane %v2824_v49, 4  ;;  %v4045_v23 = vrot.slane %v4043_v22, 4 }
 0x20e   : > { %v7557_v42 = vadd.f32 %v2276_v25, %v1924_v60  ;;  %v7561_v18 = vpack.c.b16 %v4791_v0, %v4790_v29  ;;  %v4017_v29 = vsel %vm6777_vm12, %v4012_v58, %v4016_v33  ;;  %v4026_v25 = vrot.slane %v4025_v47, 4 }
 0x20f   : > { %v4048_v43 = vrot.slane %v4046_v17, 5  ;;  %v2829_v52 = vrot.slane %v2827_v3, 5  ;;  %v2840_v19 = vor.u32 %v2839_v13, %v7559_v35  ;;  %v4717_v34 = vrot.slane %v4715_v59, 4  ;;  %v4607_v3 = vld [vmem:[#allocation2 + $0x6c] sm:$0xe] }
 0x210   : > { %9013 = vst [vmem:[#allocation27_spill] sm:$0xff] %v7561_v18  ;;  %v4718_v0 = vrot.slane %v3969_v21, 5  ;;  %v4381_v27 = vunpack.c.l.b16 %v4017_v29  ;;  %v4036_v44 = vrot.slane %v4035_v6, 4  ;;  %v4052_v33 = vshll.u32 %v7309_v12, 16 }
 0x211   : > { %6200 = vmatmul.msk.bf16.gmra.mxu3 %vm1574_vm4, %v6353_v2  ;;  %v2532_v40 = vpop.f32.mrf.mxu0  ;;  %v2843_v55 = vshll.u32 %v7518_v53, 16  ;;  %v4031_v17 = vsel %vm6777_vm12, %v4026_v25, %v4030_v57  ;;  %v4056_v58 = vshrl.u32 %v7309_v12, 16  ;;  %v4040_v2 = vrot.slane %v4038_v10, 5 }
 0x212   : > { %v7568_v15 = vadd.f32 %v2532_v40, %v7273_v11  ;;  %v7577_v11 = vld [vmem:[#allocation2 + $0x70] sm:$0xf]  ;;  %v1928_v14 = vpop.f32.mrf.mxu2  ;;  %v4719_v47 = vsel %vm6753_vm9, %v4717_v34, %v4718_v0  ;;  %v4049_v49 = vor.u32 %v4048_v43, %v4045_v23  ;;  %v4380_v53 = vunpack.c.l.b16 %v4007_v1  ;;  %v7600_v23 = vld [vmem:[#allocation2 + $0x74] sm:$0x1]  ;;  %v3269_v0 = vld [vmem:[#allocation2 + $0x6c] sm:$0xe] }
 0x213   : > { %v1706_v9 = vpop.f32.mrf.mxu1  ;;  %v2830_v13 = vor.u32 %v2829_v52, %v2826_v39  ;;  %v2841_v40 = vrot.slane %v2840_v19, 4  ;;  %v4041_v12 = vsel %vm6777_vm12, %v4036_v44, %v4040_v2  ;;  %v7593_v6 = vunpack.c.l.b16 %v4031_v17 }
 0x214   : > { %v2279_v32 = vpop.f32.mrf.mxu3  ;;  %v1927_v60 = vadd.f32 %v1926_v37, %v1706_v9  ;;  %v3383_v37 = vrot.slane %v7577_v11, 5  ;;  %v7595_v21 = vrot.slane %v4052_v33, 5  ;;  %v6234_v29 = vrot.slane %v4607_v3, 9  ;;  %v7607_v9 = vld [vmem:[#allocation2 + $0x3c] sm:$0xf] }
 0x215   : > { %v4412_v25 = vpack.c.b16 %v4381_v27, %v4380_v53  ;;  %v2845_v10 = vrot.slane %v2843_v55, 5  ;;  %v7604_v39 = vrot.slane %v4049_v49, 4  ;;  %v7616_v27 = vld [vmem:[#allocation2 + $0x7c] sm:$0xf]  ;;  %v4793_v44 = vunpack.c.l.b16 %v4719_v47  ;;  %v4608_v47 = vld [vmem:[#allocation2 + $0x78] sm:$0xe] }
 0x216   : > { %v7586_v22 = vadd.f32 %v2279_v32, %v1927_v60  ;;  %6086 = vmatmul.msk.bf16.gmra.mxu1 %vm1574_vm4, %v3079_v20  ;;  %v3385_v1 = vrot.slane %v3383_v37, 4  ;;  %v4716_v32 = vsel %vm6753_vm9, %v6234_v29, %v4715_v59  ;;  %v7614_v60 = vunpack.c.l.b16 %v4041_v12 }
 0x217   : > { %6120 = vmatmul.msk.bf16.gmra.mxu2 %vm1574_vm4, %v3478_v38  ;;  %v7602_v38 = vrot.slane %v4056_v58, 4  ;;  %v2846_v34 = vsel %vm6777_vm12, %v2841_v40, %v2845_v10  ;;  %v3386_v17 = vrot.slane %v7600_v23, 5  ;;  %v2631_v58 = vld [vmem:[#allocation2 + $0x6c] sm:$0xf]  ;;  %v2857_v59 = vshll.u32 %v7577_v11, 16 }
 0x218   : > { %v2861_v3 = vshrl.u32 %v7577_v11, 16  ;;  %v6354_v40 = vld [vmem:[#allocation2 + $0x6c] sm:$0xff]  ;;  %v4722_v11 = vrot.slane %v7616_v27, 5  ;;  %v3056_v29 = vunpack.c.l.b16 %v2846_v34  ;;  %v2851_v10 = vshll.u32 %v2631_v58, 16 }
 0x219   : > { %v2535_v57 = vpop.f32.mrf.mxu0  ;;  %v4059_v49 = vor.u32 %v7602_v38, %v7595_v21  ;;  %v3387_v12 = vsel %vm6753_vm9, %v3385_v1, %v3386_v17  ;;  %v4070_v34 = vshll.u32 %v7607_v9, 16  ;;  %v4076_v17 = vshll.u32 %v7363_v51, 16 }
 0x21a   : > { %v7598_v20 = vadd.f32 %v2535_v57, %v7306_v24  ;;  %v2831_v24 = vrot.slane %v2830_v13, 4  ;;  %v1931_v55 = vpop.f32.mrf.mxu2  ;;  %v4792_v13 = vunpack.c.l.b16 %v4716_v32  ;;  %v6104_v57 = vrot.slane %v3269_v0, 9 }
 0x21b   : > { %v1708_v52 = vpop.f32.mrf.mxu1  ;;  %v6235_v0 = vrot.slane %v4608_v47, 9  ;;  %v7646_v47 = vld [vmem:[#allocation2 + $0x7c] sm:$0xf] }
 0x21c   : > { %v2281_v19 = vpop.f32.mrf.mxu3  ;;  %6211 = vmatmul.msk.bf16.vlgmr.msra.gmra.mxu0 %vm1574_vm4, %v4412_v25  ;;  %v1929_v33 = vadd.f32 %v1928_v14, %v1708_v52  ;;  %v2836_v2 = vsel %vm6777_vm12, %v2831_v24, %v7559_v35  ;;  %v2848_v25 = vshrl.u32 %v2631_v58, 16  ;;  %v3972_v35 = vld [vmem:[#allocation2 + $0x80] sm:$0x1]  ;;  %v7632_v52 = vpack.c.b16 %v4793_v44, %v4792_v13 }
 0x21d   : > { %v3384_v32 = vsel %vm6753_vm9, %v6104_v57, %v3383_v37  ;;  %v2863_v24 = vrot.slane %v2861_v3, 4  ;;  %v3055_v44 = vunpack.c.l.b16 %v2836_v2  ;;  %v4723_v58 = vsel %vm6753_vm9, %v6235_v0, %v4722_v11  ;;  %v5082_v2 = vld [vmem:[%s8968_s5] sm:$0xf] }
 0x21e   : > { %v7627_v14 = vadd.f32 %v2281_v19, %v1929_v33  ;;  %9014 = vst [vmem:[#allocation28_spill] sm:$0xff] %v7632_v52  ;;  %v7637_v19 = vrot.slane %v2857_v59, 5  ;;  %v3456_v33 = vunpack.c.l.b16 %v3387_v12  ;;  %v4724_v13 = vrot.slane %v4722_v11, 4  ;;  %v3974_v11 = vld [vmem:[#allocation2 + $0x88] sm:$0xf] }
 0x21f   : > { %v3455_v59 = vunpack.c.l.b16 %v3384_v32  ;;  %v2850_v57 = vrot.slane %v2848_v25, 4  ;;  %v2853_v3 = vrot.slane %v2851_v10, 5  ;;  %v3080_v43 = vpack.c.b16 %v3056_v29, %v3055_v44 }
 0x220   : > { %v2864_v52 = vor.u32 %v2863_v24, %v7637_v19  ;;  %v5136_v25 = vsel %vm1623_vm3, %v5082_v2, 0  ;;  %v4794_v10 = vunpack.c.l.b16 %v4723_v58  ;;  %v7664_v29 = vrot.slane %v4076_v17, 5 }
 0x221   : > { %6201 = vmatmul.msk.bf16.gmra.mxu3 %vm1574_vm4, %v6354_v40  ;;  %v2537_v38 = vpop.f32.mrf.mxu0  ;;  %v4725_v40 = vrot.slane %v3972_v35, 5  ;;  %v3479_v32 = vpack.c.b16 %v3456_v33, %v3455_v59  ;;  %5145 = vmatpush.bf16.msra.mxu2 %v5136_v25  ;;  %v4729_v44 = vrot.slane %v3974_v11, 5  ;;  %v4413_v17 = vpack.c.b16 %v7614_v60, %v7593_v6  ;;  %v7679_v59 = vld [vmem:[#allocation2 + $0x80] sm:$0x1] }
 0x222   : > { %v7640_v1 = vadd.f32 %v2537_v38, %v7344_v4  ;;  %v4080_v4 = vshrl.u32 %v7363_v51, 16  ;;  %v1933_v38 = vpop.f32.mrf.mxu2  ;;  %v2867_v51 = vshll.u32 %v7600_v23, 16  ;;  %v4055_v23 = vsel %vm6777_vm12, %v7604_v39, %v7595_v21 }
 0x223   : > { %v1711_v53 = vpop.f32.mrf.mxu1  ;;  %v4726_v35 = vsel %vm6753_vm9, %v4724_v13, %v4725_v40  ;;  %v2854_v13 = vor.u32 %v2853_v3, %v2850_v57  ;;  %v2865_v40 = vrot.slane %v2864_v52, 4  ;;  %v4731_v57 = vrot.slane %v4729_v44, 4 }
 0x224   : > { %v2284_v37 = vpop.f32.mrf.mxu3  ;;  %v1932_v12 = vadd.f32 %v1931_v55, %v1711_v53  ;;  %v4795_v0 = vunpack.c.l.b16 %v4726_v35  ;;  %v3390_v55 = vrot.slane %v7646_v47, 5  ;;  %v7661_v53 = vrot.slane %v4059_v49, 4  ;;  %v4609_v49 = vld [vmem:[#allocation2 + $0x84] sm:$0xe] }
 0x225   : > { %v7666_v24 = vrot.slane %v4080_v4, 4  ;;  %v9016_v4 = vshll.u32 %v7321_v7, 16  ;;  %v2869_v52 = vrot.slane %v2867_v51, 5  ;;  %v9017_v2 = vshrl.u32 %v7607_v9, 16  ;;  %v2634_v51 = vld [vmem:[#allocation2 + $0x78] sm:$0xf] }
 0x226   : > { %v7656_v18 = vadd.f32 %v2284_v37, %v1932_v12  ;;  %6087 = vmatmul.msk.bf16.gmra.mxu1 %vm1574_vm4, %v3080_v43  ;;  %v7668_v33 = vpack.c.b16 %v4795_v0, %v4794_v10  ;;  %v3975_v43 = vld [vmem:[#allocation2 + $0x8c] sm:$0x1]  ;;  %v3392_v3 = vrot.slane %v3390_v55, 4  ;;  %v4072_v21 = vrot.slane %v4070_v34, 5 }
 0x227   : > { %6121 = vmatmul.msk.bf16.gmra.mxu2 %vm1574_vm4, %v3479_v32  ;;  %v4064_v12 = vrot.slane %v9016_v4, 5  ;;  %v7685_v11 = vrot.slane %v9017_v2, 4  ;;  %v4083_v7 = vor.u32 %v7666_v24, %v7664_v29  ;;  %v6236_v60 = vrot.slane %v4609_v49, 9 }
 0x228   : > { %9015 = vst [vmem:[#allocation29_spill] sm:$0xff] %v7668_v33  ;;  %v4732_v32 = vrot.slane %v3975_v43, 5  ;;  %v2855_v9 = vrot.slane %v2854_v13, 4  ;;  %v2870_v34 = vsel %vm6777_vm12, %v2865_v40, %v2869_v52  ;;  %v3393_v0 = vrot.slane %v7679_v59, 5  ;;  %v6355_v13 = vld [vmem:[#allocation2 + $0x78] sm:$0xff] }
 0x229   : > { %v2540_v58 = vpop.f32.mrf.mxu0  ;;  %v4065_v6 = vsel %vm6777_vm12, %v7661_v53, %v4064_v12  ;;  %v2885_v4 = vshrl.u32 %v7646_v47, 16  ;;  %v4730_v53 = vsel %vm6753_vm9, %v6236_v60, %v4729_v44  ;;  %v2872_v52 = vshrl.u32 %v2634_v51, 16 }
 0x22a   : > { %v7675_v37 = vadd.f32 %v2540_v58, %v7365_v63  ;;  %v3270_v63 = vld [vmem:[#allocation2 + $0x78] sm:$0xe]  ;;  %v3547_v10 = vpop.f32.mrf.mxu2  ;;  %v3958_v58 = vld [vmem:[#allocation2 + $0x48] sm:$0xf]  ;;  %v4733_v24 = vsel %vm6753_vm9, %v4731_v57, %v4732_v32  ;;  %v3394_v40 = vsel %vm6753_vm9, %v3392_v3, %v3393_v0  ;;  %v2860_v12 = vsel %vm6777_vm12, %v2855_v9, %v7637_v19 }
 0x22b   : > { %v1713_v39 = vpop.f32.mrf.mxu1  ;;  %v6105_v43 = vrot.slane %v3270_v63, 9  ;;  %v4797_v49 = vunpack.c.l.b16 %v4733_v24  ;;  %v4094_v2 = vshll.u32 %v3958_v58, 16  ;;  %v4796_v63 = vunpack.c.l.b16 %v4730_v53  ;;  %v7721_v53 = vld [vmem:[#allocation2 + $0x88] sm:$0xf] }
 0x22c   : > { %v2286_v35 = vpop.f32.mrf.mxu3  ;;  %6212 = vmatmul.msk.bf16.gmra.mxu0 %vm1574_vm4, %v4413_v17  ;;  %v1934_v25 = vadd.f32 %v1933_v38, %v1713_v39  ;;  %v2881_v17 = vshll.u32 %v7646_v47, 16  ;;  %v4091_v47 = vshrl.u32 %v3958_v58, 16  ;;  %v3058_v39 = vunpack.c.l.b16 %v2870_v34 }
 0x22d   : > { %v3391_v57 = vsel %vm6753_vm9, %v6105_v43, %v3390_v55  ;;  %v3458_v3 = vunpack.c.l.b16 %v3394_v40  ;;  %v3057_v19 = vunpack.c.l.b16 %v2860_v12  ;;  %v4073_v9 = vor.u32 %v4072_v21, %v7685_v11 }
 0x22e   : > { %v7702_v38 = vadd.f32 %v2286_v35, %v1934_v25  ;;  %v2875_v35 = vshll.u32 %v2634_v51, 16  ;;  %v7715_v32 = vrot.slane %v2881_v17, 5  ;;  %v2887_v25 = vrot.slane %v2885_v4, 4 }
 0x22f   : > { %v4086_v0 = vshll.u32 %v7368_v48, 16  ;;  %v7719_v58 = vpack.c.b16 %v4797_v49, %v4796_v63  ;;  %v4384_v55 = vunpack.c.l.b16 %v4055_v23  ;;  %v4385_v51 = vunpack.c.l.b16 %v4065_v6 }
 0x230   : > { %v3081_v17 = vpack.c.b16 %v3058_v39, %v3057_v19  ;;  %v4093_v4 = vrot.slane %v4091_v47, 4  ;;  %v4096_v12 = vrot.slane %v4094_v2, 5  ;;  %v2874_v11 = vrot.slane %v2872_v52, 4 }
 0x231   : > { %6202 = vmatmul.msk.bf16.gmra.mxu3 %vm1574_vm4, %v6355_v13  ;;  %v2542_v44 = vpop.f32.mrf.mxu0  ;;  %9018 = vst [vmem:[#allocation30_spill] sm:$0xff] %v7719_v58  ;;  %v3457_v13 = vunpack.c.l.b16 %v3391_v57  ;;  %v2877_v21 = vrot.slane %v2875_v35, 5  ;;  %v2888_v48 = vor.u32 %v2887_v25, %v7715_v32  ;;  %v3397_v23 = vrot.slane %v7721_v53, 5  ;;  %v7739_v25 = vld [vmem:[#allocation2 + $0x8c] sm:$0x1] }
 0x232   : > { %v7713_v60 = vadd.f32 %v2542_v44, %v7386_v16  ;;  %v4084_v16 = vrot.slane %v4083_v7, 4  ;;  %v3549_v40 = vpop.f32.mrf.mxu2  ;;  %v4074_v6 = vrot.slane %v4073_v9, 4  ;;  %v4088_v57 = vrot.slane %v4086_v0, 5 }
 0x233   : > { %v3149_v34 = vpop.f32.mrf.mxu1  ;;  %v3480_v44 = vpack.c.b16 %v3458_v3, %v3457_v13  ;;  %v4414_v7 = vpack.c.b16 %v4385_v51, %v4384_v55  ;;  %v4097_v2 = vor.u32 %v4096_v12, %v4093_v4  ;;  %v2878_v63 = vor.u32 %v2877_v21, %v2874_v11 }
 0x234   : > { %v3834_v24 = vpop.f32.mrf.mxu3  ;;  %v3229_v43 = vadd.f32 %v3149_v34, %v7222_v45  ;;  %v2891_v45 = vshll.u32 %v7679_v59, 16  ;;  %v4079_v52 = vsel %vm6777_vm12, %v4074_v6, %v7664_v29  ;;  %v2889_v3 = vrot.slane %v2888_v48, 4 }
 0x235   : > { %v4100_v59 = vshll.u32 %v7404_v26, 16  ;;  %v3399_v19 = vrot.slane %v3397_v23, 4  ;;  %v4104_v9 = vshrl.u32 %v7404_v26, 16  ;;  %v2905_v13 = vshll.u32 %v7721_v53, 16  ;;  %v7752_v26 = vld [vmem:[#allocation2 + $0x94] sm:$0xf] }
 0x236   : > { %v3627_v49 = vadd.f32 %v3547_v10, %v3229_v43  ;;  %6088 = vmatmul.msk.bf16.gmra.mxu1 %vm1574_vm4, %v3081_v17  ;;  %v4089_v10 = vsel %vm6777_vm12, %v4084_v16, %v4088_v57  ;;  %v2893_v29 = vrot.slane %v2891_v45, 5  ;;  %v3400_v16 = vrot.slane %v7739_v25, 5 }
 0x237   : > { %6122 = vmatmul.msk.bf16.gmra.mxu2 %vm1574_vm4, %v3480_v44  ;;  %v7748_v43 = vunpack.c.l.b16 %v4079_v52  ;;  %v7750_v17 = vunpack.c.l.b16 %v4089_v10  ;;  %v2879_v4 = vrot.slane %v2878_v63, 4  ;;  %v2637_v44 = vld [vmem:[#allocation2 + $0x84] sm:$0xf]  ;;  %v7756_v11 = vrot.slane %v4097_v2, 4 }
 0x238   : > { %v7729_v39 = vadd.f32 %v3834_v24, %v3627_v49  ;;  %v3271_v24 = vld [vmem:[#allocation2 + $0x84] sm:$0xe]  ;;  %v2894_v12 = vsel %vm6777_vm12, %v2889_v3, %v2893_v29  ;;  %v7758_v21 = vrot.slane %v4100_v59, 5  ;;  %v3401_v49 = vsel %vm6753_vm9, %v3399_v19, %v3400_v16 }
 0x239   : > { %v2545_v47 = vpop.f32.mrf.mxu0  ;;  %v6106_v48 = vrot.slane %v3271_v24, 9  ;;  %v4106_v6 = vrot.slane %v4104_v9, 4  ;;  %v2884_v57 = vsel %vm6777_vm12, %v2879_v4, %v7715_v32  ;;  %v4736_v52 = vrot.slane %v7752_v26, 5  ;;  %v6413_v9 = vld [vmem:[#allocation2 + $0x50] sm:$0x1] }
 0x23a   : > { %v7737_v35 = vadd.f32 %v2545_v47, %v7406_v36  ;;  %v2909_v36 = vshrl.u32 %v7721_v53, 16  ;;  %v3552_v51 = vpop.f32.mrf.mxu2  ;;  %v3961_v47 = vld [vmem:[#allocation2 + $0x54] sm:$0xf]  ;;  %v3060_v2 = vunpack.c.l.b16 %v2894_v12  ;;  %v2896_v3 = vshrl.u32 %v2637_v44, 16 }
 0x23b   : > { %v3151_v0 = vpop.f32.mrf.mxu1  ;;  %v3398_v63 = vsel %vm6753_vm9, %v6106_v48, %v3397_v23  ;;  %v3460_v32 = vunpack.c.l.b16 %v3401_v49  ;;  %v2899_v19 = vshll.u32 %v2637_v44, 16  ;;  %v3059_v29 = vunpack.c.l.b16 %v2884_v57  ;;  %v7780_v12 = vld [vmem:[#allocation2 + $0x94] sm:$0xf] }
 0x23c   : > { %9019 = vst [vmem:[#allocation31_spill] sm:$0xff] %v7737_v35  ;;  %v3836_v34 = vpop.f32.mrf.mxu3  ;;  %6213 = vmatmul.msk.bf16.gmra.mxu0 %vm1574_vm4, %v4414_v7  ;;  %v3230_v55 = vadd.f32 %v3151_v0, %v7253_v30  ;;  %v6356_v30 = vld [vmem:[#allocation2 + $0x84] sm:$0xff]  ;;  %v7765_v7 = vrot.slane %v2905_v13, 5  ;;  %v2911_v45 = vrot.slane %v2909_v36, 4  ;;  %v4110_v0 = vshll.u32 %v6413_v9, 16 }
 0x23d   : > { %v4107_v24 = vor.u32 %v4106_v6, %v7758_v21  ;;  %v4118_v13 = vshll.u32 %v3961_v47, 16  ;;  %v7777_v36 = vld [vmem:[#allocation2 + $0x98] sm:$0x1]  ;;  %v3459_v4 = vunpack.c.l.b16 %v3398_v63  ;;  %v4738_v44 = vrot.slane %v4736_v52, 4 }
 0x23e   : > { %v3628_v53 = vadd.f32 %v3549_v40, %v3230_v55  ;;  %v2912_v23 = vor.u32 %v2911_v45, %v7765_v7  ;;  %v2898_v49 = vrot.slane %v2896_v3, 4  ;;  %v4128_v6 = vshrl.u32 %v7443_v8, 16 }
 0x23f   : > { %v3481_v57 = vpack.c.b16 %v3460_v32, %v3459_v4  ;;  %v4739_v45 = vrot.slane %v7777_v36, 5  ;;  %v3404_v9 = vrot.slane %v7780_v12, 5  ;;  %v4120_v32 = vrot.slane %v4118_v13, 5 }
 0x240   : > { %v7768_v10 = vadd.f32 %v3836_v34, %v3628_v53  ;;  %v4115_v34 = vshrl.u32 %v3961_v47, 16  ;;  %v2901_v47 = vrot.slane %v2899_v19, 5  ;;  %v4112_v4 = vrot.slane %v4110_v0, 5  ;;  %v2640_v0 = vld [vmem:[#allocation2 + $0x90] sm:$0xf] }
 0x241   : > { %6203 = vmatmul.msk.bf16.gmra.mxu3 %vm1574_vm4, %v6356_v30  ;;  %v2547_v40 = vpop.f32.mrf.mxu0  ;;  %v3082_v30 = vpack.c.b16 %v3060_v2, %v3059_v29  ;;  %v4108_v2 = vrot.slane %v4107_v24, 4  ;;  %v4415_v29 = vpack.c.b16 %v7750_v17, %v7748_v43  ;;  %v4130_v13 = vrot.slane %v4128_v6, 4 }
 0x242   : > { %v7774_v59 = vadd.f32 %v2547_v40, %v7427_v62  ;;  %v4124_v62 = vshll.u32 %v7443_v8, 16  ;;  %v3554_v48 = vpop.f32.mrf.mxu2  ;;  %v2915_v40 = vshll.u32 %v7739_v25, 16  ;;  %v2913_v8 = vrot.slane %v2912_v23, 4  ;;  %v4610_v23 = vld [vmem:[#allocation2 + $0x90] sm:$0xe] }
 0x243   : > { %v3154_v55 = vpop.f32.mrf.mxu1  ;;  %v4117_v3 = vrot.slane %v4115_v34, 4  ;;  %v7798_v25 = vsel %vm6753_vm9, %v4738_v44, %v4739_v45  ;;  %v2902_v24 = vor.u32 %v2901_v47, %v2898_v49  ;;  %v3272_v44 = vld [vmem:[#allocation2 + $0x90] sm:$0xe]  ;;  %v2929_v47 = vshll.u32 %v7780_v12, 16 }
 0x244   : > { %9020 = vst [vmem:[#allocation32_spill] sm:$0xff] %v7774_v59  ;;  %v3839_v16 = vpop.f32.mrf.mxu3  ;;  %v3231_v53 = vadd.f32 %v3154_v55, %v7263_v54  ;;  %v4103_v54 = vsel %vm6777_vm12, %v7756_v11, %v7758_v21  ;;  %v7804_v55 = vld [vmem:[#allocation2 + $0x98] sm:$0x1]  ;;  %v7806_v11 = vrot.slane %v4124_v62, 5  ;;  %v2917_v34 = vrot.slane %v2915_v40, 5 }
 0x245   : > { %v3407_v17 = vrot.slane %v7804_v55, 5  ;;  %v4121_v62 = vor.u32 %v4120_v32, %v4117_v3  ;;  %v2933_v40 = vshrl.u32 %v7780_v12, 16  ;;  %v6237_v45 = vrot.slane %v4610_v23, 9 }
 0x246   : > { %v3629_v63 = vadd.f32 %v3552_v51, %v3231_v53  ;;  %6089 = vmatmul.msk.bf16.gmra.mxu1 %vm1574_vm4, %v3082_v30  ;;  %v3406_v53 = vrot.slane %v3404_v9, 4  ;;  %v2918_v43 = vsel %vm6777_vm12, %v2913_v8, %v2917_v34  ;;  %v4134_v8 = vshll.u32 %v7453_v50, 16  ;;  %v6357_v34 = vld [vmem:[#allocation2 + $0x90] sm:$0xff] }
 0x247   : > { %6123 = vmatmul.msk.bf16.gmra.mxu2 %vm1574_vm4, %v3481_v57  ;;  %v2920_v3 = vshrl.u32 %v2640_v0, 16  ;;  %v3062_v32 = vunpack.c.l.b16 %v2918_v43  ;;  %v7839_v23 = vrot.slane %v2929_v47, 5 }
 0x248   : > { %v7800_v51 = vadd.f32 %v3839_v16, %v3629_v63  ;;  %v7811_v16 = vunpack.c.l.b16 %v4103_v54  ;;  %v2903_v63 = vrot.slane %v2902_v24, 4  ;;  %v6107_v54 = vrot.slane %v3272_v44, 9 }
 0x249   : > { %v2550_v19 = vpop.f32.mrf.mxu0  ;;  %v4799_v24 = vunpack.c.l.b16 %v7798_v25  ;;  %v2935_v44 = vrot.slane %v2933_v40, 4 }
 0x24a   : > { %v7809_v21 = vadd.f32 %v2550_v19, %v7445_v61  ;;  %v4113_v61 = vsel %vm6777_vm12, %v4108_v2, %v4112_v4  ;;  %v3557_v6 = vpop.f32.mrf.mxu2  ;;  %v4131_v19 = vor.u32 %v4130_v13, %v7806_v11  ;;  %v3408_v2 = vsel %vm6753_vm9, %v3406_v53, %v3407_v17 }
 0x24b   : > { %v3156_v30 = vpop.f32.mrf.mxu1  ;;  %v2908_v12 = vsel %vm6777_vm12, %v2903_v63, %v7765_v7  ;;  %v2923_v4 = vshll.u32 %v2640_v0, 16  ;;  %v3405_v13 = vsel %vm6753_vm9, %v6107_v54, %v3404_v9  ;;  %v3462_v7 = vunpack.c.l.b16 %v3408_v2  ;;  %v7848_v0 = vld [vmem:[#allocation2 + $0xa0] sm:$0xf] }
 0x24c   : > { %9021 = vst [vmem:[#allocation33_spill] sm:$0xff] %v7809_v21  ;;  %v3841_v57 = vpop.f32.mrf.mxu3  ;;  %6214 = vmatmul.msk.bf16.gmra.mxu0 %vm1574_vm4, %v4415_v29  ;;  %v3232_v49 = vadd.f32 %v3156_v30, %v7291_v41  ;;  %v4737_v41 = vsel %vm6753_vm9, %v6237_v45, %v4736_v52  ;;  %v7841_v52 = vld [vmem:[#allocation2 + $0xa0] sm:$0xf]  ;;  %v7846_v30 = vrot.slane %v4121_v62, 4  ;;  %v4389_v43 = vunpack.c.l.b16 %v4113_v61  ;;  %v7850_v45 = vld [vmem:[#allocation2 + $0xa4] sm:$0x1] }
 0x24d   : > { %v4798_v25 = vunpack.c.l.b16 %v4737_v41  ;;  %v2922_v17 = vrot.slane %v2920_v3, 4  ;;  %v3461_v40 = vunpack.c.l.b16 %v3405_v13  ;;  %v2925_v63 = vrot.slane %v2923_v4, 5  ;;  %v3964_v54 = vld [vmem:[#allocation2 + $0x60] sm:$0xf] }
 0x24e   : > { %v3630_v29 = vadd.f32 %v3554_v48, %v3232_v49  ;;  %v4132_v49 = vrot.slane %v4131_v19, 4  ;;  %v2936_v61 = vor.u32 %v2935_v44, %v7839_v23  ;;  %v4136_v3 = vrot.slane %v4134_v8, 5 }
 0x24f   : > { %v3482_v41 = vpack.c.b16 %v3462_v7, %v3461_v40  ;;  %v3411_v19 = vrot.slane %v7848_v0, 5  ;;  %v2939_v4 = vshll.u32 %v7804_v55, 16  ;;  %v4127_v55 = vsel %vm6777_vm12, %v7846_v30, %v7806_v11  ;;  %v9024_v40 = vld [vmem:[#allocation21_spill] sm:$0xff] }
 0x250   : > { %v7834_v50 = vadd.f32 %v3841_v57, %v3630_v29  ;;  %v3061_v57 = vunpack.c.l.b16 %v2908_v12  ;;  %v7852_v29 = vpack.c.b16 %v4799_v24, %v4798_v25  ;;  %v4139_v24 = vshrl.u32 %v3964_v54, 16 }
 0x251   : > { %6204 = vmatmul.msk.bf16.gmra.mxu3 %vm1574_vm4, %v6357_v34  ;;  %v2552_v48 = vpop.f32.mrf.mxu0  ;;  %v4142_v25 = vshll.u32 %v3964_v54, 16  ;;  %v4137_v8 = vsel %vm6777_vm12, %v4132_v49, %v4136_v3  ;;  %v3413_v49 = vrot.slane %v3411_v19, 4 }
 0x252   : > { %v7844_v53 = vadd.f32 %v2552_v48, %v7470_v28  ;;  %9023 = vst [vmem:[#allocation35_spill] sm:$0xff] %v7852_v29  ;;  %v4743_v28 = vrot.slane %v7841_v52, 5  ;;  %v3083_v34 = vpack.c.b16 %v3062_v32, %v3061_v57  ;;  %v3559_v2 = vpop.f32.mrf.mxu2  ;;  %v4746_v48 = vrot.slane %v7850_v45, 5  ;;  %v4611_v29 = vld [vmem:[#allocation2 + $0x9c] sm:$0xe] }
 0x253   : > { %v3159_v9 = vpop.f32.mrf.mxu1  ;;  %v2926_v32 = vor.u32 %v2925_v63, %v2922_v17  ;;  %v2937_v57 = vrot.slane %v2936_v61, 4  ;;  %v4152_v63 = vshrl.u32 %v9024_v40, 16  ;;  %v6238_v54 = vrot.slane %v4611_v29, 9 }
 0x254   : > { %9022 = vst [vmem:[#allocation34_spill] sm:$0xff] %v7844_v53  ;;  %v3844_v47 = vpop.f32.mrf.mxu3  ;;  %v3233_v62 = vadd.f32 %v3159_v9, %v7326_v31  ;;  %v4745_v12 = vrot.slane %v4743_v28, 4  ;;  %v4416_v31 = vpack.c.b16 %v4389_v43, %v7811_v16  ;;  %v7869_v9 = vld [vmem:[#allocation2 + $0xa4] sm:$0x1]  ;;  %v4148_v16 = vshll.u32 %v9024_v40, 16 }
 0x255   : > { %v9025_v43 = vld [vmem:[#allocation19_spill] sm:$0xff]  ;;  %v7882_v61 = vrot.slane %v4139_v24, 4  ;;  %v7884_v3 = vrot.slane %v4142_v25, 5  ;;  %v2927_v11 = vrot.slane %v2926_v32, 4  ;;  %v3414_v30 = vrot.slane %v7869_v9, 5 }
 0x256   : > { %v3631_v13 = vadd.f32 %v3557_v6, %v3233_v62  ;;  %6090 = vmatmul.msk.bf16.gmra.mxu1 %vm1574_vm4, %v3083_v34  ;;  %v4747_v44 = vsel %vm6753_vm9, %v4745_v12, %v4746_v48  ;;  %v3273_v62 = vld [vmem:[#allocation2 + $0x9c] sm:$0xe]  ;;  %v7880_v34 = vunpack.c.l.b16 %v4137_v8  ;;  %v4744_v29 = vsel %vm6753_vm9, %v6238_v54, %v4743_v28 }
 0x257   : > { %6124 = vmatmul.msk.bf16.gmra.mxu2 %vm1574_vm4, %v3482_v41  ;;  %v2643_v48 = vld [vmem:[#allocation2 + $0x9c] sm:$0xf]  ;;  %v2957_v25 = vshrl.u32 %v7848_v0, 16  ;;  %v7895_v40 = vrot.slane %v4148_v16, 5  ;;  %v6108_v32 = vrot.slane %v3273_v62, 9  ;;  %v4154_v58 = vrot.slane %v4152_v63, 4 }
 0x258   : > { %v7867_v7 = vadd.f32 %v3844_v47, %v3631_v13  ;;  %v2941_v47 = vrot.slane %v2939_v4, 5  ;;  %v2953_v13 = vshll.u32 %v7848_v0, 16  ;;  %v9027_v4 = vld [vmem:[#allocation9_spill] sm:$0xff]  ;;  %v6358_v54 = vld [vmem:[#allocation2 + $0x9c] sm:$0xff]  ;;  %v4801_v33 = vunpack.c.l.b16 %v4747_v44 }
 0x259   : > { %v2555_v6 = vpop.f32.mrf.mxu0  ;;  %v3412_v0 = vsel %vm6753_vm9, %v6108_v32, %v3411_v19  ;;  %v9029_v44 = vld [vmem:[#allocation22_spill] sm:$0xff]  ;;  %v4145_v19 = vor.u32 %v7884_v3, %v7882_v61  ;;  %v4155_v32 = vor.u32 %v4154_v58, %v7895_v40  ;;  %v4613_v58 = vld [vmem:[#allocation2 + $0xb4] sm:$0xe] }
 0x25a   : > { %v7877_v17 = vadd.f32 %v2555_v6, %v9025_v43  ;;  %v3562_v6 = vpop.f32.mrf.mxu2  ;;  %v2942_v24 = vsel %vm6777_vm12, %v2937_v57, %v2941_v47  ;;  %v3415_v43 = vsel %vm6753_vm9, %v3413_v49, %v3414_v30  ;;  %v2947_v57 = vshll.u32 %v2643_v48, 16  ;;  %v7906_v47 = vld [vmem:[#allocation2 + $0xac] sm:$0xf]  ;;  %v9032_v61 = vld [vmem:[#allocation10_spill] sm:$0xff] }
 0x25b   : > { %v3161_v41 = vpop.f32.mrf.mxu1  ;;  %v7904_v16 = vrot.slane %v2953_v13, 5  ;;  %v3464_v63 = vunpack.c.l.b16 %v3415_v43  ;;  %v7922_v43 = vld [vmem:[#allocation2 + $0xb0] sm:$0x1] }
 0x25c   : > { %9026 = vst [vmem:[#allocation21_spill] sm:$0xff] %v7877_v17  ;;  %v3846_v12 = vpop.f32.mrf.mxu3  ;;  %6215 = vmatmul.msk.bf16.gmra.mxu0 %vm1574_vm4, %v4416_v31  ;;  %v3234_v8 = vadd.f32 %v3161_v41, %v9027_v4  ;;  %v2932_v31 = vsel %vm6777_vm12, %v2927_v11, %v7839_v23  ;;  %v2944_v41 = vshrl.u32 %v2643_v48, 16  ;;  %v4800_v4 = vunpack.c.l.b16 %v4744_v29  ;;  %v4612_v11 = vld [vmem:[#allocation2 + $0xa8] sm:$0xe]  ;;  %v9031_v48 = vld [vmem:[#allocation23_spill] sm:$0xff] }
 0x25d   : > { %v3064_v17 = vunpack.c.l.b16 %v2942_v24  ;;  %v4390_v29 = vunpack.c.l.b16 %v4127_v55  ;;  %v4158_v13 = vshll.u32 %v9031_v48, 16  ;;  %v7919_v24 = vld [vmem:[#allocation2 + $0xac] sm:$0xf] }
 0x25e   : > { %v3632_v28 = vadd.f32 %v3559_v2, %v3234_v8  ;;  %v2959_v2 = vrot.slane %v2957_v25, 4  ;;  %v7911_v62 = vpack.c.b16 %v4801_v33, %v4800_v4  ;;  %v3063_v8 = vunpack.c.l.b16 %v2932_v31 }
 0x25f   : > { %v4750_v33 = vrot.slane %v7906_v47, 5  ;;  %v2946_v55 = vrot.slane %v2944_v41, 4  ;;  %v2949_v4 = vrot.slane %v2947_v57, 5  ;;  %v7935_v57 = vrot.slane %v4145_v19, 4 }
 0x260   : > { %v7908_v23 = vadd.f32 %v3846_v12, %v3632_v28  ;;  %9028 = vst [vmem:[#allocation19_spill] sm:$0xff] %v7911_v62  ;;  %v3463_v12 = vunpack.c.l.b16 %v3412_v0  ;;  %v2960_v48 = vor.u32 %v2959_v2, %v7904_v16  ;;  %v7928_v62 = vld [vmem:[#allocation2 + $0x6c] sm:$0xf]  ;;  %v7941_v2 = vld [vmem:[#allocation2 + $0xb8] sm:$0xf] }
 0x261   : > { %6205 = vmatmul.msk.bf16.gmra.mxu3 %vm1574_vm4, %v6358_v54  ;;  %v2557_v49 = vpop.f32.mrf.mxu0  ;;  %v4417_v54 = vpack.c.b16 %v7880_v34, %v4390_v29  ;;  %v4752_v21 = vrot.slane %v4750_v33, 4  ;;  %v4753_v34 = vrot.slane %v7922_v43, 5  ;;  %9033 = vst [vmem:[#allocation22_spill] sm:$0xff] %v7941_v2  ;;  %v4163_v29 = vshrl.u32 %v7928_v62, 16 }
 0x262   : > { %v7914_v30 = vadd.f32 %v2557_v49, %v9029_v44  ;;  %v6239_v49 = vrot.slane %v4612_v11, 9  ;;  %v3084_v44 = vpack.c.b16 %v3064_v17, %v3063_v8  ;;  %v3564_v31 = vpop.f32.mrf.mxu2  ;;  %v3483_v0 = vpack.c.b16 %v3464_v63, %v3463_v12  ;;  %v7946_v8 = vld [vmem:[#allocation2 + $0xbc] sm:$0x1] }
 0x263   : > { %v3164_v25 = vpop.f32.mrf.mxu1  ;;  %v7937_v17 = vrot.slane %v4155_v32, 4  ;;  %v7939_v63 = vrot.slane %v4158_v13, 5  ;;  %v2963_v11 = vshll.u32 %v7869_v9, 16  ;;  %9034 = vst [vmem:[#allocation23_spill] sm:$0xff] %v7946_v8  ;;  %v6240_v12 = vrot.slane %v4613_v58, 9 }
 0x264   : > { %9030 = vst [vmem:[#allocation9_spill] sm:$0xff] %v7914_v30  ;;  %v3849_v28 = vpop.f32.mrf.mxu3  ;;  %v3235_v3 = vadd.f32 %v3164_v25, %v9032_v61  ;;  %v8976_v30 = vrot.slane %v7919_v24, 5  ;;  %v4751_v53 = vsel %vm6753_vm9, %v6239_v49, %v4750_v33  ;;  %v4757_v25 = vrot.slane %v7941_v2, 5  ;;  %v9035_v49 = vld [vmem:[#allocation25_spill] sm:$0xff] }
 0x265   : > { %v4802_v33 = vunpack.c.l.b16 %v4751_v53  ;;  %v2961_v9 = vrot.slane %v2960_v48, 4  ;;  %v4760_v53 = vrot.slane %v7946_v8, 5  ;;  %v2981_v48 = vshrl.u32 %v7919_v24, 16  ;;  %v6359_v8 = vld [vmem:[#allocation2 + $0xa8] sm:$0xff] }
 0x266   : > { %v3633_v41 = vadd.f32 %v3562_v6, %v3235_v3  ;;  %6091 = vmatmul.msk.bf16.gmra.mxu1 %vm1574_vm4, %v3084_v44  ;;  %v4754_v6 = vsel %vm6753_vm9, %v4752_v21, %v4753_v34  ;;  %v2950_v3 = vor.u32 %v2949_v4, %v2946_v55  ;;  %v7956_v44 = vld [vmem:[#allocation2 + $0xb0] sm:$0x1]  ;;  %v4758_v21 = vsel %vm6753_vm9, %v6240_v12, %v4757_v25  ;;  %v3274_v55 = vld [vmem:[#allocation2 + $0xa8] sm:$0xe] }
 0x267   : > { %6125 = vmatmul.msk.bf16.gmra.mxu2 %vm1574_vm4, %v3483_v0  ;;  %v4803_v13 = vunpack.c.l.b16 %v4754_v6  ;;  %v3420_v0 = vrot.slane %v8976_v30, 4  ;;  %v2977_v4 = vshll.u32 %v7919_v24, 16  ;;  %v4166_v6 = vshll.u32 %v7928_v62, 16 }
 0x268   : > { %v7950_v19 = vadd.f32 %v3849_v28, %v3633_v41  ;;  %v4759_v28 = vrot.slane %v4757_v25, 4  ;;  %v2965_v41 = vrot.slane %v2963_v11, 5  ;;  %v3421_v12 = vrot.slane %v7956_v44, 5 }
 0x269   : > { %v2560_v32 = vpop.f32.mrf.mxu0  ;;  %v7960_v59 = vpack.c.b16 %v4803_v13, %v4802_v33  ;;  %v4172_v25 = vshll.u32 %v7555_v46, 16  ;;  %v2951_v30 = vrot.slane %v2950_v3, 4  ;;  %v4804_v11 = vunpack.c.l.b16 %v4758_v21 }
 0x26a   : > { %v7954_v61 = vadd.f32 %v2560_v32, %v9035_v49  ;;  %v9038_v32 = vld [vmem:[#allocation12_spill] sm:$0xff]  ;;  %v3567_v13 = vpop.f32.mrf.mxu2  ;;  %v4761_v49 = vsel %vm6753_vm9, %v4759_v28, %v4760_v53  ;;  %v6109_v35 = vrot.slane %v3274_v55, 9  ;;  %v3422_v62 = vsel %vm6753_vm9, %v3420_v0, %v3421_v12 }
 0x26b   : > { %9037 = vst [vmem:[#allocation25_spill] sm:$0xff] %v7960_v59  ;;  %v3166_v58 = vpop.f32.mrf.mxu1  ;;  %v4805_v59 = vunpack.c.l.b16 %v4761_v49  ;;  %v2956_v46 = vsel %vm6777_vm12, %v2951_v30, %v7904_v16  ;;  %v7981_v28 = vrot.slane %v2977_v4, 5  ;;  %v2983_v3 = vrot.slane %v2981_v48, 4  ;;  %v9040_v49 = vld [vmem:[#allocation13_spill] sm:$0xff] }
 0x26c   : > { %9036 = vst [vmem:[#allocation10_spill] sm:$0xff] %v7954_v61  ;;  %v3851_v34 = vpop.f32.mrf.mxu3  ;;  %6216 = vmatmul.msk.bf16.gmra.mxu0 %vm1574_vm4, %v4417_v54  ;;  %v3236_v33 = vadd.f32 %v3166_v58, %v9038_v32  ;;  %v2966_v54 = vsel %vm6777_vm12, %v2961_v9, %v2965_v41  ;;  %v2646_v58 = vld [vmem:[#allocation2 + $0xa8] sm:$0xf]  ;;  %v6414_v32 = vld [vmem:[#allocation2 + $0x70] sm:$0xf]  ;;  %v9039_v0 = vrot.slane %v7919_v24, 5  ;;  %v4161_v16 = vsel %vm6777_vm12, %v7937_v17, %v7939_v63 }
 0x26d   : > { %v4176_v2 = vshrl.u32 %v6414_v32, 16  ;;  %v7983_v53 = vpack.c.b16 %v4805_v59, %v4804_v11  ;;  %v3066_v21 = vunpack.c.l.b16 %v2966_v54  ;;  %v3466_v59 = vunpack.c.l.b16 %v3422_v62  ;;  %v2650_v17 = vld [vmem:[#allocation2 + $0xb8] sm:$0xf] }
 0x26e   : > { %v3634_v61 = vadd.f32 %v3564_v31, %v3236_v33  ;;  %v3419_v41 = vsel %vm6753_vm9, %v6109_v35, %v9039_v0  ;;  %v3065_v55 = vunpack.c.l.b16 %v2956_v46  ;;  %v4151_v24 = vsel %vm6777_vm12, %v7935_v57, %v7895_v40  ;;  %v6415_v0 = vld [vmem:[#allocation2 + $0x74] sm:$0x1] }
 0x26f   : > { %v4168_v4 = vrot.slane %v4166_v6, 5  ;;  %v3465_v33 = vunpack.c.l.b16 %v3419_v41  ;;  %v2984_v12 = vor.u32 %v2983_v3, %v7981_v28  ;;  %v8004_v63 = vrot.slane %v4172_v25, 5 }
 0x270   : > { %v7985_v9 = vadd.f32 %v3851_v34, %v3634_v61  ;;  %v2968_v61 = vshrl.u32 %v2646_v58, 16  ;;  %v2971_v34 = vshll.u32 %v2646_v58, 16  ;;  %v3085_v11 = vpack.c.b16 %v3066_v21, %v3065_v55 }
 0x271   : > { %6206 = vmatmul.msk.bf16.gmra.mxu3 %vm1574_vm4, %v6359_v8  ;;  %v2562_v31 = vpop.f32.mrf.mxu0  ;;  %v4165_v8 = vrot.slane %v4163_v29, 4  ;;  %v4393_v58 = vunpack.c.l.b16 %v4161_v16  ;;  %v3484_v32 = vpack.c.b16 %v3466_v59, %v3465_v33  ;;  %v2987_v40 = vshll.u32 %v7956_v44, 16 }
 0x272   : > { %v7997_v30 = vadd.f32 %v2562_v31, %v7557_v42  ;;  %v4178_v42 = vrot.slane %v4176_v2, 4  ;;  %v3569_v62 = vpop.f32.mrf.mxu2  ;;  %v2970_v46 = vrot.slane %v2968_v61, 4  ;;  %v2973_v31 = vrot.slane %v2971_v34, 5  ;;  %v8016_v34 = vld [vmem:[#allocation2 + $0xbc] sm:$0x1] }
 0x273   : > { %v3169_v35 = vpop.f32.mrf.mxu1  ;;  %v4392_v29 = vunpack.c.l.b16 %v4151_v24  ;;  %v3425_v6 = vrot.slane %v2650_v17, 5  ;;  %v2985_v25 = vrot.slane %v2984_v12, 4  ;;  %v4169_v3 = vor.u32 %v4168_v4, %v4165_v8  ;;  %v3970_v24 = vld [vmem:[#allocation2 + $0x78] sm:$0xf]  ;;  %v3275_v4 = vld [vmem:[#allocation2 + $0xb4] sm:$0xe] }
 0x274   : > { %v3854_v48 = vpop.f32.mrf.mxu3  ;;  %v3237_v54 = vadd.f32 %v3169_v35, %v9040_v49  ;;  %v4179_v2 = vor.u32 %v4178_v42, %v8004_v63  ;;  %v4182_v21 = vshll.u32 %v6415_v0, 16  ;;  %v2989_v61 = vrot.slane %v2987_v40, 5 }
 0x275   : > { %v4418_v44 = vpack.c.b16 %v4393_v58, %v4392_v29  ;;  %v3427_v55 = vrot.slane %v3425_v6, 4  ;;  %v2649_v58 = vld [vmem:[#allocation2 + $0xb4] sm:$0xf]  ;;  %v4187_v40 = vshrl.u32 %v3970_v24, 16  ;;  %v4196_v29 = vshll.u32 %v7616_v27, 16 }
 0x276   : > { %v3635_v57 = vadd.f32 %v3567_v13, %v3237_v54  ;;  %6092 = vmatmul.msk.bf16.gmra.mxu1 %vm1574_vm4, %v3085_v11  ;;  %v2974_v13 = vor.u32 %v2973_v31, %v2970_v46  ;;  %v2990_v8 = vsel %vm6777_vm12, %v2985_v25, %v2989_v61  ;;  %v4180_v12 = vrot.slane %v4179_v2, 4 }
 0x277   : > { %6126 = vmatmul.msk.bf16.gmra.mxu2 %vm1574_vm4, %v3484_v32  ;;  %v4184_v42 = vrot.slane %v4182_v21, 5  ;;  %v3428_v11 = vrot.slane %v8016_v34, 5  ;;  %v3001_v32 = vshll.u32 %v2650_v17, 16  ;;  %v3005_v46 = vshrl.u32 %v2650_v17, 16 }
 0x278   : > { %v8011_v41 = vadd.f32 %v3854_v48, %v3635_v57  ;;  %v4170_v48 = vrot.slane %v4169_v3, 4  ;;  %v2975_v31 = vrot.slane %v2974_v13, 4  ;;  %v4190_v57 = vshll.u32 %v3970_v24, 16 }
 0x279   : > { %v2565_v16 = vpop.f32.mrf.mxu0  ;;  %v6110_v25 = vrot.slane %v3275_v4, 9  ;;  %v3429_v3 = vsel %vm6753_vm9, %v3427_v55, %v3428_v11  ;;  %v4200_v2 = vshrl.u32 %v7616_v27, 16  ;;  %v2992_v61 = vshrl.u32 %v2649_v58, 16 }
 0x27a   : > { %v8014_v59 = vadd.f32 %v2565_v16, %v7586_v22  ;;  %v9041_v22 = vld [vmem:[#allocation15_spill] sm:$0xff]  ;;  %v3572_v54 = vpop.f32.mrf.mxu2  ;;  %v6360_v16 = vld [vmem:[#allocation2 + $0xb4] sm:$0xff]  ;;  %v2980_v21 = vsel %vm6777_vm12, %v2975_v31, %v7981_v28  ;;  %v2995_v17 = vshll.u32 %v2649_v58, 16  ;;  %v3007_v55 = vrot.slane %v3005_v46, 4 }
 0x27b   : > { %v3171_v35 = vpop.f32.mrf.mxu1  ;;  %v3468_v4 = vunpack.c.l.b16 %v3429_v3  ;;  %v4175_v28 = vsel %vm6777_vm12, %v4170_v48, %v8004_v63  ;;  %v8045_v11 = vrot.slane %v4196_v29, 5  ;;  %v2994_v46 = vrot.slane %v2992_v61, 4  ;;  %v2653_v48 = vld [vmem:[#allocation2 + $0xc4] sm:$0xf]  ;;  %v8051_v61 = vld [vmem:[#allocation2 + $0xc8] sm:$0x1] }
 0x27c   : > { %v3856_v33 = vpop.f32.mrf.mxu3  ;;  %6217 = vmatmul.msk.bf16.gmra.mxu0 %vm1574_vm4, %v4418_v44  ;;  %v3238_v49 = vadd.f32 %v3171_v35, %v9041_v22  ;;  %v3068_v44 = vunpack.c.l.b16 %v2990_v8  ;;  %v8035_v35 = vrot.slane %v3001_v32, 5  ;;  %v3067_v8 = vunpack.c.l.b16 %v2980_v21 }
 0x27d   : > { %v4189_v22 = vrot.slane %v4187_v40, 4  ;;  %v2997_v31 = vrot.slane %v2995_v17, 5  ;;  %v3432_v40 = vrot.slane %v2653_v48, 5  ;;  %v4394_v29 = vunpack.c.l.b16 %v4175_v28 }
 0x27e   : > { %v3636_v0 = vadd.f32 %v3569_v62, %v3238_v49  ;;  %v3426_v62 = vsel %vm6753_vm9, %v6110_v25, %v3425_v6  ;;  %v4192_v49 = vrot.slane %v4190_v57, 5  ;;  %v3086_v25 = vpack.c.b16 %v3068_v44, %v3067_v8 }
 0x27f   : > { %v3467_v32 = vunpack.c.l.b16 %v3426_v62  ;;  %v3008_v63 = vor.u32 %v3007_v55, %v8035_v35  ;;  %v3011_v21 = vshll.u32 %v8016_v34, 16  ;;  %v6416_v62 = vld [vmem:[#allocation2 + $0x80] sm:$0x1]  ;;  %v3434_v34 = vrot.slane %v3432_v40, 4 }
 0x280   : > { %v8030_v13 = vadd.f32 %v3856_v33, %v3636_v0  ;;  %v4185_v33 = vsel %vm6777_vm12, %v4180_v12, %v4184_v42  ;;  %v9042_v0 = vld [vmem:[#allocation16_spill] sm:$0xff]  ;;  %v3276_v42 = vld [vmem:[#allocation2 + $0xc0] sm:$0xe]  ;;  %v4193_v44 = vor.u32 %v4192_v49, %v4189_v22  ;;  %v4206_v55 = vshll.u32 %v6416_v62, 16 }
 0x281   : > { %6207 = vmatmul.msk.bf16.gmra.mxu3 %vm1574_vm4, %v6360_v16  ;;  %v2567_v24 = vpop.f32.mrf.mxu0  ;;  %v4395_v12 = vunpack.c.l.b16 %v4185_v33  ;;  %v3009_v8 = vrot.slane %v3008_v63, 4  ;;  %v3029_v62 = vshrl.u32 %v2653_v48, 16 }
 0x282   : > { %v8038_v27 = vadd.f32 %v2567_v24, %v7627_v14  ;;  %v4202_v14 = vrot.slane %v4200_v2, 4  ;;  %v3574_v3 = vpop.f32.mrf.mxu2  ;;  %v3485_v24 = vpack.c.b16 %v3468_v4, %v3467_v32  ;;  %v2998_v2 = vor.u32 %v2997_v31, %v2994_v46 }
 0x283   : > { %v3174_v6 = vpop.f32.mrf.mxu1  ;;  %v4419_v28 = vpack.c.b16 %v4395_v12, %v4394_v29  ;;  %v3435_v32 = vrot.slane %v8051_v61, 5  ;;  %v4194_v31 = vrot.slane %v4193_v44, 4  ;;  %v6361_v44 = vld [vmem:[#allocation2 + $0xc0] sm:$0xff] }
 0x284   : > { %v3859_v58 = vpop.f32.mrf.mxu3  ;;  %v3239_v16 = vadd.f32 %v3174_v6, %v9042_v0  ;;  %v4203_v17 = vor.u32 %v4202_v14, %v8045_v11  ;;  %v3013_v0 = vrot.slane %v3011_v21, 5  ;;  %v2999_v49 = vrot.slane %v2998_v2, 4 }
 0x285   : > { %v4208_v14 = vrot.slane %v4206_v55, 5 }
 0x286   : > { %v3637_v57 = vadd.f32 %v3572_v54, %v3239_v16  ;;  %6093 = vmatmul.msk.bf16.gmra.mxu1 %vm1574_vm4, %v3086_v25  ;;  %v6111_v54 = vrot.slane %v3276_v42, 9  ;;  %v2652_v16 = vld [vmem:[#allocation2 + $0xc0] sm:$0xf]  ;;  %v9043_v25 = vld [vmem:[#allocation17_spill] sm:$0xff]  ;;  %v3025_v42 = vshll.u32 %v2653_v48, 16 }
 0x287   : > { %6127 = vmatmul.msk.bf16.gmra.mxu2 %vm1574_vm4, %v3485_v24  ;;  %v3016_v29 = vshrl.u32 %v2652_v16, 16  ;;  %v3019_v21 = vshll.u32 %v2652_v16, 16  ;;  %v3973_v16 = vld [vmem:[#allocation2 + $0x84] sm:$0xf] }
 0x288   : > { %v8055_v4 = vadd.f32 %v3859_v58, %v3637_v57  ;;  %v4204_v58 = vrot.slane %v4203_v17, 4  ;;  %v3433_v12 = vsel %vm6753_vm9, %v6111_v54, %v3432_v40  ;;  %v3436_v57 = vsel %vm6753_vm9, %v3434_v34, %v3435_v32 }
 0x289   : > { %v2570_v33 = vpop.f32.mrf.mxu0  ;;  %v3004_v17 = vsel %vm6777_vm12, %v2999_v49, %v8035_v35  ;;  %v3469_v48 = vunpack.c.l.b16 %v3433_v12  ;;  %v3018_v35 = vrot.slane %v3016_v29, 4  ;;  %v3021_v32 = vrot.slane %v3019_v21, 5 }
 0x28a   : > { %v8058_v6 = vadd.f32 %v2570_v33, %v7656_v18  ;;  %v3577_v24 = vpop.f32.mrf.mxu2  ;;  %v3014_v18 = vsel %vm6777_vm12, %v3009_v8, %v3013_v0  ;;  %v4199_v33 = vsel %vm6777_vm12, %v4194_v31, %v8045_v11  ;;  %v4209_v40 = vsel %vm6777_vm12, %v4204_v58, %v4208_v14  ;;  %v6417_v11 = vld [vmem:[#allocation2 + $0x88] sm:$0xf] }
 0x28b   : > { %v3176_v46 = vpop.f32.mrf.mxu1  ;;  %v3070_v55 = vunpack.c.l.b16 %v3014_v18  ;;  %v3031_v0 = vrot.slane %v3029_v62, 4  ;;  %v4220_v49 = vshll.u32 %v6417_v11, 16  ;;  %v4224_v31 = vshrl.u32 %v6417_v11, 16 }
 0x28c   : > { %v3861_v22 = vpop.f32.mrf.mxu3  ;;  %6218 = vmatmul.msk.bf16.gmra.mxu0 %vm1574_vm4, %v4419_v28  ;;  %v3240_v63 = vadd.f32 %v3176_v46, %v9043_v25  ;;  %v3027_v28 = vrot.slane %v3025_v42, 5  ;;  %v3069_v46 = vunpack.c.l.b16 %v3004_v17  ;;  %v4396_v14 = vunpack.c.l.b16 %v4199_v33  ;;  %v9044_v25 = vld [vmem:[#allocation20_spill] sm:$0xff] }
 0x28d   : > { %v4211_v42 = vshrl.u32 %v3973_v16, 16  ;;  %v3035_v29 = vshll.u32 %v8051_v61, 16  ;;  %v4214_v62 = vshll.u32 %v3973_v16, 16  ;;  %v4222_v17 = vrot.slane %v4220_v49, 5  ;;  %v9045_v49 = vld [vmem:[#allocation24_spill] sm:$0xff] }
 0x28e   : > { %v3638_v2 = vadd.f32 %v3574_v3, %v3240_v63  ;;  %v3470_v3 = vunpack.c.l.b16 %v3436_v57  ;;  %v3087_v18 = vpack.c.b16 %v3070_v55, %v3069_v46  ;;  %v4397_v57 = vunpack.c.l.b16 %v4209_v40  ;;  %v5259_v40 = vld [vmem:[%s8970_s7] sm:$0xf] }
 0x28f   : > { %6276 = vmatpush.msk.msra.mxu3 %vm1623_vm3, %v5259_v40  ;;  %vm5734_vm3 = vcmask 195584  }
 0x290   : > { %v8077_v8 = vadd.f32 %v3861_v22, %v3638_v2  ;;  %v3486_v2 = vpack.c.b16 %v3470_v3, %v3469_v48  ;;  %v4420_v55 = vpack.c.b16 %v4397_v57, %v4396_v14  ;;  %v3037_v3 = vrot.slane %v3035_v29, 5  ;;  %v6418_v14 = vld [vmem:[#allocation2 + $0x8c] sm:$0x1] }
 0x291   : > { %6208 = vmatmul.msk.bf16.gmra.mxu3 %vm1574_vm4, %v6361_v44  ;;  %v2572_v54 = vpop.f32.mrf.mxu0  ;;  %v3032_v44 = vor.u32 %v3031_v0, %v3027_v28 }
 0x292   : > { %v8081_v34 = vadd.f32 %v2572_v54, %v7702_v38  ;;  %v3579_v12 = vpop.f32.mrf.mxu2  ;;  %v3022_v38 = vor.u32 %v3021_v32, %v3018_v35  ;;  %v4226_v54 = vrot.slane %v4224_v31, 4  ;;  %v4213_v35 = vrot.slane %v4211_v42, 4 }
 0x293   : > { %v3179_v58 = vpop.f32.mrf.mxu1  ;;  %v4216_v32 = vrot.slane %v4214_v62, 5 }
 0x294   : > { %v3864_v22 = vpop.f32.mrf.mxu3  ;;  %v3241_v63 = vadd.f32 %v3179_v58, %v9044_v25  ;;  %v3023_v61 = vrot.slane %v3022_v38, 4  ;;  %v4227_v0 = vor.u32 %v4226_v54, %v4222_v17  ;;  %v4230_v25 = vshll.u32 %v6418_v14, 16 }
 0x295   : > { %v4217_v57 = vor.u32 %v4216_v32, %v4213_v35 }
 0x296   : > { %v3639_v21 = vadd.f32 %v3577_v24, %v3241_v63  ;;  %6094 = vmatmul.msk.bf16.gmra.mxu1 %vm1574_vm4, %v3087_v18  ;;  %v3033_v24 = vrot.slane %v3032_v44, 4  ;;  %v4228_v42 = vrot.slane %v4227_v0, 4 }
 0x297   : > { %6128 = vmatmul.msk.bf16.gmra.mxu2 %vm1574_vm4, %v3486_v2  ;;  %v4218_v54 = vrot.slane %v4217_v57, 4 }
 0x298   : > { %v8087_v33 = vadd.f32 %v3864_v22, %v3639_v21  ;;  %v6362_v22 = vld [vmem:[#allocation2 + $0xcc] sm:$0xff]  ;;  %v3038_v63 = vsel %vm6777_vm12, %v3033_v24, %v3037_v3  ;;  %v4232_v21 = vrot.slane %v4230_v25, 5  ;;  %v9046_v24 = vld [vmem:[#allocation26_spill] sm:$0xff] }
 0x299   : > { %v4488_v11 = vpop.f32.mrf.mxu0  ;;  %v3072_v29 = vunpack.c.l.b16 %v3038_v63  ;;  %v4223_v0 = vsel %vm6777_vm12, %v4218_v54, %v4222_v17 }
 0x29a   : > { %v8093_v48 = vadd.f32 %v4488_v11, %v7729_v39  ;;  %v3582_v58 = vpop.f32.mrf.mxu2  ;;  %v3028_v39 = vsel %vm6777_vm12, %v3023_v61, %v3027_v28  ;;  %v4233_v28 = vsel %vm6777_vm12, %v4228_v42, %v4232_v21  ;;  %v3976_v11 = vld [vmem:[#allocation2 + $0x90] sm:$0xf]  ;;  %v4398_v14 = vunpack.c.l.b16 %v4223_v0 }
 0x29b   : > { %v3181_v16 = vpop.f32.mrf.mxu1  ;;  %v3071_v44 = vunpack.c.l.b16 %v3028_v39 }
 0x29c   : > { %v3866_v46 = vpop.f32.mrf.mxu3  ;;  %6219 = vmatmul.msk.bf16.gmra.mxu0 %vm1574_vm4, %v4420_v55  ;;  %v3242_v31 = vadd.f32 %v3181_v16, %v9045_v49  ;;  %v4248_v55 = vshrl.u32 %v7752_v26, 16  ;;  %v4235_v16 = vshrl.u32 %v3976_v11, 16  ;;  %v4238_v49 = vshll.u32 %v3976_v11, 16 }
 0x29d   : > { %v3088_v35 = vpack.c.b16 %v3072_v29, %v3071_v44  ;;  %v4254_v29 = vshll.u32 %v7777_v36, 16  ;;  %v4268_v36 = vshll.u32 %v7841_v52, 16 }
 0x29e   : > { %v3640_v18 = vadd.f32 %v3579_v12, %v3242_v31  ;;  %v4244_v12 = vshll.u32 %v7752_v26, 16  ;;  %v4240_v57 = vrot.slane %v4238_v49, 5 }
 0x2a0   : > { %v8102_v2 = vadd.f32 %v3866_v46, %v3640_v18  ;;  %v4246_v31 = vrot.slane %v4244_v12, 5  ;;  %v4237_v18 = vrot.slane %v4235_v16, 4  ;;  %v4256_v12 = vrot.slane %v4254_v29, 5 }
 0x2a1   : > { %v4490_v38 = vpop.f32.mrf.mxu0  ;;  %6209 = vmatmul.msk.bf16.gmra.mxu3 %vm1574_vm4, %v6362_v22  ;;  %v4250_v22 = vrot.slane %v4248_v55, 4  ;;  %v6419_v55 = vld [vmem:[%s6625_s27] sm:$0xff] }
 0x2a2   : > { %v8106_v62 = vadd.f32 %v4490_v38, %v7768_v10  ;;  %v3584_v32 = vpop.f32.mrf.mxu2  ;;  %v4399_v10 = vunpack.c.l.b16 %v4233_v28  ;;  %v4241_v54 = vor.u32 %v4240_v57, %v4237_v18 }
 0x2a3   : > { %v3184_v40 = vpop.f32.mrf.mxu1  ;;  %v4251_v17 = vor.u32 %v4250_v22, %v4246_v31  ;;  %v9047_v22 = vld [vmem:[#allocation6_spill] sm:$0xff] }
 0x2a4   : > { %v3869_v61 = vpop.f32.mrf.mxu3  ;;  %v3243_v3 = vadd.f32 %v3184_v40, %v9046_v24  ;;  %v4421_v63 = vpack.c.b16 %v4399_v10, %v4398_v14  ;;  %v3979_v24 = vld [vmem:[#allocation2 + $0x9c] sm:$0xf] }
 0x2a5   : > { %v4252_v28 = vrot.slane %v4251_v17, 4  ;;  %v4262_v14 = vshll.u32 %v3979_v24, 16  ;;  %v6420_v17 = vld [vmem:[%s6625_s27 + $0x8] sm:$0xff] }
 0x2a6   : > { %v3641_v46 = vadd.f32 %v3582_v58, %v3243_v3  ;;  %6095 = vmatmul.msk.bf16.gmra.mxu1 %vm1574_vm4, %v3088_v35  ;;  %v4272_v3 = vshrl.u32 %v7841_v52, 16 }
 0x2a8   : > { %v8116_v25 = vadd.f32 %v3869_v61, %v3641_v46  ;;  %v4242_v61 = vrot.slane %v4241_v54, 4  ;;  %v4259_v46 = vshrl.u32 %v3979_v24, 16  ;;  %v6421_v24 = vld [vmem:[%s6625_s27 + $0x10] sm:$0xff] }
 0x2a9   : > { %v4493_v26 = vpop.f32.mrf.mxu0 }
 0x2aa   : > { %v8119_v39 = vadd.f32 %v4493_v26, %v7800_v51  ;;  %v3587_v44 = vpop.f32.mrf.mxu2  ;;  %v4247_v16 = vsel %vm6777_vm12, %v4242_v61, %v4246_v31  ;;  %v4270_v26 = vrot.slane %v4268_v36, 5 }
 0x2ab   : > { %v3186_v42 = vpop.f32.mrf.mxu1  ;;  %v4400_v18 = vunpack.c.l.b16 %v4247_v16 }
 0x2ac   : > { %v3871_v38 = vpop.f32.mrf.mxu3  ;;  %6220 = vmatmul.msk.bf16.gmra.mxu0 %vm1574_vm4, %v4421_v63  ;;  %v3244_v58 = vadd.f32 %v3186_v42, %v7568_v15  ;;  %v4257_v15 = vsel %vm6777_vm12, %v4252_v28, %v4256_v12  ;;  %v4274_v63 = vrot.slane %v4272_v3, 4  ;;  %v4261_v42 = vrot.slane %v4259_v46, 4 }
 0x2ad   : > { %v4278_v28 = vshll.u32 %v7850_v45, 16  ;;  %v4292_v45 = vshll.u32 %v7906_v47, 16 }
 0x2ae   : > { %v3642_v21 = vadd.f32 %v3584_v32, %v3244_v58  ;;  %v4275_v58 = vor.u32 %v4274_v63, %v4270_v26 }
 0x2b0   : > { %v8124_v11 = vadd.f32 %v3871_v38, %v3642_v21  ;;  %v4264_v38 = vrot.slane %v4262_v14, 5  ;;  %v9048_v14 = vld [vmem:[#allocation7_spill] sm:$0xff] }
 0x2b1   : > { %v4495_v51 = vpop.f32.mrf.mxu0  ;;  %6277 = vmatmul.msk.f32.vlgmr.msra.gmra.mxu3 %vm385_vm1, %v6419_v55  ;;  %v4276_v55 = vrot.slane %v4275_v58, 4 }
 0x2b2   : > { %v8129_v40 = vadd.f32 %v4495_v51, %v7834_v50  ;;  %v3589_v10 = vpop.f32.mrf.mxu2  ;;  %v4401_v50 = vunpack.c.l.b16 %v4257_v15  ;;  %v4265_v12 = vor.u32 %v4264_v38, %v4261_v42  ;;  %v4280_v15 = vrot.slane %v4278_v28, 5  ;;  %v6422_v42 = vld [vmem:[%s6625_s27 + $0x18] sm:$0xff] }
 0x2b3   : > { %v3189_v35 = vpop.f32.mrf.mxu1 }
 0x2b4   : > { %v3874_v32 = vpop.f32.mrf.mxu3  ;;  %v3245_v0 = vadd.f32 %v3189_v35, %v7598_v20  ;;  %v4422_v31 = vpack.c.b16 %v4401_v50, %v4400_v18  ;;  %v4266_v3 = vrot.slane %v4265_v12, 4  ;;  %v3982_v35 = vld [vmem:[#allocation2 + $0xa8] sm:$0xf]  ;;  %v4294_v18 = vrot.slane %v4292_v45, 5  ;;  %v3985_v45 = vld [vmem:[#allocation2 + $0xb4] sm:$0xf] }
 0x2b5   : > { %v4286_v63 = vshll.u32 %v3982_v35, 16 }
 0x2b6   : > { %v3643_v49 = vadd.f32 %v3587_v44, %v3245_v0  ;;  %6244 = vmatmul.msk.bf16.vlgmr.msra.gmra.mxu1 %vm1574_vm4, %v9047_v22  ;;  %v4271_v46 = vsel %vm6777_vm12, %v4266_v3, %v4270_v26  ;;  %v6423_v3 = vld [vmem:[%s6625_s27 + $0x20] sm:$0xff] }
 0x2b7   : > { %v4288_v58 = vrot.slane %v4286_v63, 5 }
 0x2b8   : > { %v8140_v52 = vadd.f32 %v3874_v32, %v3643_v49  ;;  %v4296_v32 = vshrl.u32 %v7906_v47, 16  ;;  %v4283_v49 = vshrl.u32 %v3982_v35, 16 }
 0x2b9   : > { %v4498_v57 = vpop.f32.mrf.mxu0  ;;  %6278 = vmatmul.msk.f32.gmra.mxu3 %vm385_vm1, %v6420_v17  ;;  %v4402_v17 = vunpack.c.l.b16 %v4271_v46 }
 0x2ba   : > { %v8145_v20 = vadd.f32 %v4498_v57, %v7867_v7  ;;  %v3592_v54 = vpop.f32.mrf.mxu2  ;;  %v4298_v57 = vrot.slane %v4296_v32, 4  ;;  %v4285_v38 = vrot.slane %v4283_v49, 4  ;;  %v9049_v32 = vld [vmem:[#allocation22_spill] sm:$0xff] }
 0x2bb   : > { %v3191_v44 = vpop.f32.mrf.mxu1 }
 0x2bc   : > { %v3876_v29 = vpop.f32.mrf.mxu3  ;;  %6221 = vmatmul.msk.bf16.gmra.mxu0 %vm1574_vm4, %v4422_v31  ;;  %v3246_v21 = vadd.f32 %v3191_v44, %v7640_v1  ;;  %v4281_v1 = vsel %vm6777_vm12, %v4276_v55, %v4280_v15  ;;  %v4299_v44 = vor.u32 %v4298_v57, %v4294_v18  ;;  %v4289_v55 = vor.u32 %v4288_v58, %v4285_v38  ;;  %v9051_v57 = vld [vmem:[#allocation8_spill] sm:$0xff] }
 0x2bd   : > { %v6424_v38 = vld [vmem:[%s6625_s27 + $0x28] sm:$0xff] }
 0x2be   : > { %v3644_v51 = vadd.f32 %v3589_v10, %v3246_v21  ;;  %v4290_v35 = vrot.slane %v4289_v55, 4  ;;  %v9053_v55 = vld [vmem:[#allocation23_spill] sm:$0xff] }
 0x2c0   : > { %v8150_v61 = vadd.f32 %v3876_v29, %v3644_v51  ;;  %v4302_v51 = vshll.u32 %v7922_v43, 16  ;;  %v4316_v43 = vshll.u32 %v9049_v32, 16  ;;  %v4295_v49 = vsel %vm6777_vm12, %v4290_v35, %v4294_v18 }
 0x2c1   : > { %v4500_v7 = vpop.f32.mrf.mxu0  ;;  %6279 = vmatmul.msk.f32.gmra.mxu3 %vm385_vm1, %v6421_v24 }
 0x2c2   : > { %v8155_v36 = vadd.f32 %v4500_v7, %v7908_v23  ;;  %v3594_v50 = vpop.f32.mrf.mxu2  ;;  %v4403_v23 = vunpack.c.l.b16 %v4281_v1  ;;  %v4300_v7 = vrot.slane %v4299_v44, 4  ;;  %v4304_v24 = vrot.slane %v4302_v51, 5 }
 0x2c3   : > { %v3194_v0 = vpop.f32.mrf.mxu1 }
 0x2c4   : > { %v3879_v10 = vpop.f32.mrf.mxu3  ;;  %v3247_v16 = vadd.f32 %v3194_v0, %v7675_v37  ;;  %v4423_v26 = vpack.c.b16 %v4403_v23, %v4402_v17  ;;  %v4320_v0 = vshrl.u32 %v9049_v32, 16  ;;  %v4318_v17 = vrot.slane %v4316_v43, 5  ;;  %v8201_v32 = vld [vmem:[#allocation2 + $0xc4] sm:$0xf]  ;;  %v6425_v43 = vld [vmem:[%s6625_s27 + $0x30] sm:$0xff] }
 0x2c6   : > { %v3645_v22 = vadd.f32 %v3592_v54, %v3247_v16  ;;  %6245 = vmatmul.msk.bf16.gmra.mxu1 %vm1574_vm4, %v9048_v14  ;;  %v4310_v14 = vshll.u32 %v3985_v45, 16 }
 0x2c8   : > { %v8166_v47 = vadd.f32 %v3879_v10, %v3645_v22  ;;  %v4307_v22 = vshrl.u32 %v3985_v45, 16  ;;  %v3988_v45 = vld [vmem:[#allocation2 + $0xc0] sm:$0xf] }
 0x2c9   : > { %v4503_v31 = vpop.f32.mrf.mxu0  ;;  %6280 = vmatmul.msk.f32.gmra.mxu3 %vm385_vm1, %v6422_v42  ;;  %v4404_v42 = vunpack.c.l.b16 %v4295_v49 }
 0x2ca   : > { %v8171_v37 = vadd.f32 %v4503_v31, %v7950_v19  ;;  %v3597_v28 = vpop.f32.mrf.mxu2  ;;  %v4322_v31 = vrot.slane %v4320_v0, 4  ;;  %v4309_v44 = vrot.slane %v4307_v22, 4  ;;  %v9054_v22 = vld [vmem:[#allocation33_spill] sm:$0xff] }
 0x2cb   : > { %v3196_v29 = vpop.f32.mrf.mxu1 }
 0x2cc   : > { %v3881_v21 = vpop.f32.mrf.mxu3  ;;  %6222 = vmatmul.msk.bf16.gmra.mxu0 %vm1574_vm4, %v4423_v26  ;;  %v3248_v54 = vadd.f32 %v3196_v29, %v7713_v60  ;;  %v4305_v60 = vsel %vm6777_vm12, %v4300_v7, %v4304_v24  ;;  %v4312_v29 = vrot.slane %v4310_v14, 5  ;;  %v4323_v18 = vor.u32 %v4322_v31, %v4318_v17 }
 0x2cd   : > { %v4326_v7 = vshll.u32 %v9053_v55, 16 }
 0x2ce   : > { %v3646_v12 = vadd.f32 %v3594_v50, %v3248_v54  ;;  %v9050_v50 = vld [vmem:[#allocation31_spill] sm:$0xff] }
 0x2d0   : > { %v8176_v15 = vadd.f32 %v3881_v21, %v3646_v12 }
 0x2d1   : > { %v4505_v19 = vpop.f32.mrf.mxu0  ;;  %6281 = vmatmul.msk.f32.gmra.mxu3 %vm385_vm1, %v6423_v3  ;;  %v4324_v3 = vrot.slane %v4323_v18, 4 }
 0x2d2   : > { %v8181_v1 = vadd.f32 %v4505_v19, %v7985_v9  ;;  %v3599_v23 = vpop.f32.mrf.mxu2  ;;  %v4405_v9 = vunpack.c.l.b16 %v4305_v60  ;;  %v4313_v19 = vor.u32 %v4312_v29, %v4309_v44  ;;  %v4328_v60 = vrot.slane %v4326_v7, 5 }
 0x2d3   : > { %v3199_v10 = vpop.f32.mrf.mxu1 }
 0x2d4   : > { %v3884_v16 = vpop.f32.mrf.mxu3  ;;  %v3249_v46 = vadd.f32 %v3199_v10, %v9050_v50  ;;  %v4424_v58 = vpack.c.b16 %v4405_v9, %v4404_v42  ;;  %v4314_v0 = vrot.slane %v4313_v19, 4  ;;  %v4331_v10 = vshrl.u32 %v3988_v45, 16 }
 0x2d5   : > { %v4334_v50 = vshll.u32 %v3988_v45, 16 }
 0x2d6   : > { %v3647_v63 = vadd.f32 %v3597_v28, %v3249_v46  ;;  %6246 = vmatmul.msk.bf16.gmra.mxu1 %vm1574_vm4, %v9051_v57  ;;  %v9052_v28 = vld [vmem:[#allocation32_spill] sm:$0xff]  ;;  %v4340_v46 = vshll.u32 %v8201_v32, 16  ;;  %v4319_v57 = vsel %vm6777_vm12, %v4314_v0, %v4318_v17  ;;  %v4333_v42 = vrot.slane %v4331_v10, 4 }
 0x2d7   : > { %v4336_v44 = vrot.slane %v4334_v50, 5 }
 0x2d8   : > { %v8192_v26 = vadd.f32 %v3884_v16, %v3647_v63  ;;  %v4329_v16 = vsel %vm6777_vm12, %v4324_v3, %v4328_v60  ;;  %v4342_v29 = vrot.slane %v4340_v46, 5  ;;  %v9056_v3 = vld [vmem:[#allocation34_spill] sm:$0xff]  ;;  %v3991_v46 = vld [vmem:[#allocation2 + $0xcc] sm:$0xf] }
 0x2d9   : > { %6282 = vmatmul.msk.f32.gmra.mxu3 %vm385_vm1, %v6424_v38  ;;  %v4407_v31 = vunpack.c.l.b16 %v4329_v16  ;;  %v4337_v17 = vor.u32 %v4336_v44, %v4333_v42 }
 0x2da   : > { %v3602_v12 = vpop.f32.mrf.mxu2 }
 0x2db   : > { %v3201_v21 = vpop.f32.mrf.mxu1  ;;  %v4338_v0 = vrot.slane %v4337_v17, 4 }
 0x2dc   : > { %v3886_v54 = vpop.f32.mrf.mxu3  ;;  %6223 = vmatmul.msk.bf16.gmra.mxu0 %vm1574_vm4, %v4424_v58  ;;  %v3250_v51 = vadd.f32 %v3201_v21, %v9052_v28  ;;  %v9055_v58 = vld [vmem:[#allocation11_spill] sm:$0xff]  ;;  %v4406_v21 = vunpack.c.l.b16 %v4319_v57 }
 0x2dd   : > { %v4343_v57 = vsel %vm6777_vm12, %v4338_v0, %v4342_v29 }
 0x2de   : > { %v3648_v24 = vadd.f32 %v3599_v23, %v3250_v51  ;;  %v4344_v23 = vshrl.u32 %v8201_v32, 16  ;;  %v6426_v51 = vld [vmem:[%s6625_s27 + $0x38] sm:$0xff]  ;;  %v4425_v55 = vpack.c.b16 %v4407_v31, %v4406_v21 }
 0x2e0   : > { %v8199_v35 = vadd.f32 %v3886_v54, %v3648_v24  ;;  %v4346_v18 = vrot.slane %v4344_v23, 4  ;;  %v8214_v54 = vld [vmem:[#allocation2 + $0xc8] sm:$0x1]  ;;  %v8225_v23 = vld [vmem:[#allocation2 + $0xd0] sm:$0xf] }
 0x2e1   : > { %6283 = vmatmul.msk.f32.gmra.mxu3 %vm385_vm1, %v6425_v43  ;;  %v4368_v31 = vshrl.u32 %v8225_v23, 16 }
 0x2e2   : > { %v3604_v63 = vpop.f32.mrf.mxu2  ;;  %v4347_v7 = vor.u32 %v4346_v18, %v4342_v29  ;;  %v9057_v18 = vld [vmem:[#allocation21_spill] sm:$0xff] }
 0x2e3   : > { %v3204_v49 = vpop.f32.mrf.mxu1  ;;  %v4370_v17 = vrot.slane %v4368_v31, 4 }
 0x2e4   : > { %v3889_v9 = vpop.f32.mrf.mxu3  ;;  %v3251_v14 = vadd.f32 %v3204_v49, %v9054_v22  ;;  %v4348_v10 = vrot.slane %v4347_v7, 4  ;;  %v6427_v49 = vld [vmem:[%s6625_s27 + $0x40] sm:$0xff]  ;;  %v4358_v22 = vshll.u32 %v3991_v46, 16  ;;  %v4408_v7 = vunpack.c.l.b16 %v4343_v57 }
 0x2e6   : > { %v3649_v38 = vadd.f32 %v3602_v12, %v3251_v14  ;;  %6247 = vmatmul.msk.bf16.gmra.mxu1 %vm1574_vm4, %v9055_v58  ;;  %v4350_v12 = vshll.u32 %v8214_v54, 16  ;;  %v4364_v14 = vshll.u32 %v8225_v23, 16  ;;  %v4360_v44 = vrot.slane %v4358_v22, 5 }
 0x2e8   : > { %v8216_v28 = vadd.f32 %v3889_v9, %v3649_v38  ;;  %v4352_v16 = vrot.slane %v4350_v12, 5  ;;  %v4355_v9 = vshrl.u32 %v3991_v46, 16 }
 0x2e9   : > { %6284 = vmatmul.msk.f32.gmra.mxu3 %vm385_vm1, %v6426_v51 }
 0x2ea   : > { %v3607_v45 = vpop.f32.mrf.mxu2  ;;  %v4357_v58 = vrot.slane %v4355_v9, 4 }
 0x2eb   : > { %v3206_v19 = vpop.f32.mrf.mxu1 }
 0x2ec   : > { %v3891_v24 = vpop.f32.mrf.mxu3  ;;  %6224 = vmatmul.msk.bf16.gmra.mxu0 %vm1574_vm4, %v4425_v55  ;;  %v3252_v60 = vadd.f32 %v3206_v19, %v9056_v3  ;;  %v4366_v55 = vrot.slane %v4364_v14, 5  ;;  %v8236_v19 = vld [vmem:[#allocation2 + $0xd4] sm:$0x1]  ;;  %v4361_v3 = vor.u32 %v4360_v44, %v4357_v58 }
 0x2ed   : > { %v4374_v0 = vshll.u32 %v8236_v19, 16  ;;  %v6429_v44 = vld [vmem:[%s6625_s27 + $0x50] sm:$0xff] }
 0x2ee   : > { %v3650_v43 = vadd.f32 %v3604_v63, %v3252_v60  ;;  %v4353_v63 = vsel %vm6777_vm12, %v4348_v10, %v4352_v16  ;;  %v6428_v10 = vld [vmem:[%s6625_s27 + $0x48] sm:$0xff]  ;;  %v4362_v9 = vrot.slane %v4361_v3, 4  ;;  %v9060_v3 = vld [vmem:[#allocation10_spill] sm:$0xff] }
 0x2ef   : > { %v4409_v12 = vunpack.c.l.b16 %v4353_v63  ;;  %v4376_v57 = vrot.slane %v4374_v0, 5 }
 0x2f0   : > { %v8223_v50 = vadd.f32 %v3891_v24, %v3650_v43  ;;  %v9058_v24 = vld [vmem:[#allocation14_spill] sm:$0xff]  ;;  %v4371_v43 = vor.u32 %v4370_v17, %v4366_v55  ;;  %v4614_v17 = vld [vmem:[#allocation2 + $0xc0] sm:$0xe] }
 0x2f1   : > { %6285 = vmatmul.msk.f32.gmra.mxu3 %vm385_vm1, %v6427_v49  ;;  %v4426_v16 = vpack.c.b16 %v4409_v12, %v4408_v7 }
 0x2f2   : > { %v3609_v51 = vpop.f32.mrf.mxu2  ;;  %v4372_v14 = vrot.slane %v4371_v43, 4 }
 0x2f3   : > { %v3209_v42 = vpop.f32.mrf.mxu1 }
 0x2f4   : > { %v3894_v38 = vpop.f32.mrf.mxu3  ;;  %v3253_v21 = vadd.f32 %v3209_v42, %v9057_v18  ;;  %v4367_v42 = vsel %vm6777_vm12, %v4362_v9, %v4366_v55  ;;  %v4377_v58 = vsel %vm6777_vm12, %v4372_v14, %v4376_v57  ;;  %v4764_v18 = vrot.slane %v8201_v32, 5  ;;  %v9061_v32 = vld [vmem:[#allocation18_spill] sm:$0xff] }
 0x2f5   : > { %v4767_v55 = vrot.slane %v8214_v54, 5 }
 0x2f6   : > { %v3651_v29 = vadd.f32 %v3607_v45, %v3253_v21  ;;  %6248 = vmatmul.msk.bf16.gmra.mxu1 %vm1574_vm4, %v9058_v24  ;;  %v9059_v45 = vld [vmem:[#allocation9_spill] sm:$0xff]  ;;  %v4410_v21 = vunpack.c.l.b16 %v4367_v42  ;;  %v4766_v24 = vrot.slane %v4764_v18, 4 }
 0x2f8   : > { %v8240_v60 = vadd.f32 %v3894_v38, %v3651_v29  ;;  %v4411_v29 = vunpack.c.l.b16 %v4377_v58  ;;  %v4768_v0 = vsel %vm6753_vm9, %v4766_v24, %v4767_v55  ;;  %v6431_v58 = vld [vmem:[%s6625_s27 + $0x60] sm:$0xff] }
 0x2f9   : > { %6286 = vmatmul.msk.f32.gmra.mxu3 %vm385_vm1, %v6428_v10 }
 0x2fa   : > { %v3612_v63 = vpop.f32.mrf.mxu2  ;;  %v4427_v9 = vpack.c.b16 %v4411_v29, %v4410_v21 }
 0x2fb   : > { %v3211_v46 = vpop.f32.mrf.mxu1 }
 0x2fc   : > { %v3896_v49 = vpop.f32.mrf.mxu3  ;;  %6225 = vmatmul.msk.bf16.gmra.mxu0 %vm1574_vm4, %v4426_v16  ;;  %v3254_v22 = vadd.f32 %v3211_v46, %v9059_v45  ;;  %v4807_v46 = vunpack.c.l.b16 %v4768_v0 }
 0x2fe   : > { %v3652_v31 = vadd.f32 %v3609_v51, %v3254_v22  ;;  %v6241_v51 = vrot.slane %v4614_v17, 9  ;;  %v6430_v22 = vld [vmem:[%s6625_s27 + $0x58] sm:$0xff] }
 0x300   : > { %v8249_v38 = vadd.f32 %v3896_v49, %v3652_v31  ;;  %v4765_v5 = vsel %vm6753_vm9, %v6241_v51, %v4764_v18  ;;  %v6432_v51 = vld [vmem:[%s6625_s27 + $0x68] sm:$0xff] }
 0x301   : > { %6287 = vmatmul.msk.f32.gmra.mxu3 %vm385_vm1, %v6429_v44  ;;  %v4806_v16 = vunpack.c.l.b16 %v4765_v5 }
 0x302   : > { %v3614_v49 = vpop.f32.mrf.mxu2 }
 0x303   : > { %v3214_v7 = vpop.f32.mrf.mxu1  ;;  %v8266_v54 = vpack.c.b16 %v4807_v46, %v4806_v16 }
 0x304   : > { %v3899_v12 = vpop.f32.mrf.mxu3  ;;  %v3255_v43 = vadd.f32 %v3214_v7, %v9060_v3 }
 0x306   : > { %v3653_v10 = vadd.f32 %v3612_v63, %v3255_v43  ;;  %6249 = vmatmul.msk.bf16.gmra.mxu1 %vm1574_vm4, %v9061_v32 }
 0x308   : > { %v8264_v45 = vadd.f32 %v3899_v12, %v3653_v10  ;;  %v9062_v12 = vld [vmem:[#allocation27_spill] sm:$0xff] }
 0x309   : > { %6288 = vmatmul.msk.f32.gmra.mxu3 %vm385_vm1, %v6430_v22 }
 0x30a   : > { %v3617_v44 = vpop.f32.mrf.mxu2 }
 0x30b   : > { %v3216_v14 = vpop.f32.mrf.mxu1 }
 0x30c   : > { %v3901_v57 = vpop.f32.mrf.mxu3  ;;  %6226 = vmatmul.msk.bf16.gmra.mxu0 %vm1574_vm4, %v4427_v9  ;;  %v3256_v63 = vadd.f32 %v3216_v14, %v7997_v30 }
 0x30e   : > { %v3654_v31 = vadd.f32 %v3614_v49, %v3256_v63  ;;  %v9063_v49 = vld [vmem:[#allocation28_spill] sm:$0xff]  ;;  %v9064_v63 = vld [vmem:[#allocation29_spill] sm:$0xff] }
 0x310   : > { %v8272_v42 = vadd.f32 %v3901_v57, %v3654_v31  ;;  %v6435_v57 = vld [vmem:[%s6625_s27 + $0x80] sm:$0xff] }
 0x311   : > { %6289 = vmatmul.msk.f32.gmra.mxu3 %vm385_vm1, %v6431_v58  ;;  %v8306_v58 = vld [vmem:[%s8967_s4] ss:$0 sm:$0xff] }
 0x312   : > { %v3619_v30 = vpop.f32.mrf.mxu2 }
 0x313   : > { %v3219_v18 = vpop.f32.mrf.mxu1 }
 0x314   : > { %v3904_v21 = vpop.f32.mrf.mxu3  ;;  %v3257_v17 = vadd.f32 %v3219_v18, %v8014_v59  ;;  %v6433_v59 = vld [vmem:[%s6625_s27 + $0x70] sm:$0xff] }
 0x316   : > { %v3655_v7 = vadd.f32 %v3617_v44, %v3257_v17  ;;  %6250 = vmatmul.msk.bf16.gmra.mxu1 %vm1574_vm4, %v9062_v12  ;;  %v6436_v44 = vld [vmem:[%s6625_s27 + $0x88] sm:$0xff] }
 0x318   : > { %v8279_v29 = vadd.f32 %v3904_v21, %v3655_v7 }
 0x319   : > { %6290 = vmatmul.msk.f32.gmra.mxu3 %vm385_vm1, %v6432_v51  ;;  %v6437_v51 = vld [vmem:[%s6625_s27 + $0x90] sm:$0xff] }
 0x31a   : > { %v3622_v32 = vpop.f32.mrf.mxu2 }
 0x31b   : > { %v3221_v24 = vpop.f32.mrf.mxu1 }
 0x31c   : > { %v3258_v55 = vadd.f32 %v3221_v24, %v8038_v27  ;;  %v3906_v3 = vpop.f32.mrf.mxu3  ;;  %v6434_v27 = vld [vmem:[%s6625_s27 + $0x78] sm:$0xff] }
 0x31e   : > { %v3656_v43 = vadd.f32 %v3619_v30, %v3258_v55  ;;  %v9065_v55 = vld [vmem:[#allocation30_spill] sm:$0xff] }
 0x320   : > { %v8284_v5 = vadd.f32 %v3906_v3, %v3656_v43  ;;  %v6438_v43 = vld [vmem:[%s6625_s27 + $0x98] sm:$0xff] }
 0x321   : > { %6291 = vmatmul.msk.f32.gmra.mxu3 %vm385_vm1, %v6433_v59 }
 0x323   : > { %v3224_v0 = vpop.f32.mrf.mxu1 }
 0x324   : > { %v3259_v10 = vadd.f32 %v3224_v0, %v8058_v6  ;;  %v3909_v16 = vpop.f32.mrf.mxu3 }
 0x326   : > { %v3657_v46 = vadd.f32 %v3622_v32, %v3259_v10  ;;  %6251 = vmatmul.msk.bf16.gmra.mxu1 %vm1574_vm4, %v9063_v49  ;;  %v6439_v49 = vld [vmem:[%s6625_s27 + $0xa0] sm:$0xff] }
 0x328   : > { %v8291_v9 = vadd.f32 %v3909_v16, %v3657_v46 }
 0x329   : > { %6292 = vmatmul.msk.f32.gmra.mxu3 %vm385_vm1, %v6434_v27 }
 0x32b   : > { %v3226_v22 = vpop.f32.mrf.mxu1 }
 0x32c   : > { %v8296_v14 = vadd.f32 %v3226_v22, %v8081_v34 }
 0x331   : > { %6293 = vmatmul.msk.f32.gmra.mxu3 %vm385_vm1, %v6435_v57  ;;  %v9066_v57 = vld [vmem:[#allocation35_spill] sm:$0xff] }
 0x333   : > { %v4886_v6 = vpop.f32.mrf.mxu1 }
 0x334   : > { %v4966_v31 = vadd.f32 %v4886_v6, %v8093_v48  ;;  %v4508_v48 = vpop.f32.mrf.mxu0 }
 0x336   : > { %6252 = vmatmul.msk.bf16.gmra.mxu1 %vm1574_vm4, %v9064_v63  ;;  %v5002_v18 = vadd.f32 %v8306_v58, %v4966_v31  ;;  %v6440_v63 = vld [vmem:[%s6625_s27 + $0xa8] sm:$0xff] }
 0x338   : > { %v5034_v7 = vmax.f32 %v5002_v18, 0.0 }
 0x339   : > { %6294 = vmatmul.msk.f32.gmra.mxu3 %vm385_vm1, %v6436_v44 }
 0x33b   : > { %v4888_v34 = vpop.f32.mrf.mxu1 }
 0x33c   : > { %v4967_v21 = vadd.f32 %v4888_v34, %v8106_v62  ;;  %v4510_v62 = vpop.f32.mrf.mxu0 }
 0x33e   : > { %v5003_v17 = vadd.f32 %v8306_v58, %v4967_v21 }
 0x340   : > { %v5035_v12 = vmax.f32 %v5003_v17, 0.0 }
 0x341   : > { %6295 = vmatmul.msk.f32.gmra.mxu3 %vm385_vm1, %v6437_v51 }
 0x342   : > { %v5066_v30 = vpack.c.bf16 %v5035_v12, %v5034_v7  ;;  %v6441_v7 = vld [vmem:[%s6625_s27 + $0xb0] sm:$0xff] }
 0x343   : > { %v4891_v24 = vpop.f32.mrf.mxu1 }
 0x344   : > { %6260 = vmatmul.msk.bf16.vlgmr.msra.gmra.mxu2 %vm1574_vm4, %v5066_v30  ;;  %v4968_v3 = vadd.f32 %v4891_v24, %v8119_v39  ;;  %v4513_v22 = vpop.f32.mrf.mxu0  ;;  %v8340_v30 = vpop.f32.mrf.mxu3 }
 0x346   : > { %6253 = vmatmul.msk.bf16.gmra.mxu1 %vm1574_vm4, %v9065_v55  ;;  %v5004_v0 = vadd.f32 %v8306_v58, %v4968_v3 }
 0x348   : > { %v5036_v16 = vmax.f32 %v5004_v0, 0.0 }
 0x349   : > { %6296 = vmatmul.msk.f32.gmra.mxu3 %vm385_vm1, %v6438_v43 }
 0x34b   : > { %v4893_v59 = vpop.f32.mrf.mxu1 }
 0x34c   : > { %v4969_v10 = vadd.f32 %v4893_v59, %v8129_v40  ;;  %v4515_v18 = vpop.f32.mrf.mxu0 }
 0x34e   : > { %v5005_v32 = vadd.f32 %v8306_v58, %v4969_v10 }
 0x350   : > { %v5037_v46 = vmax.f32 %v5005_v32, 0.0 }
 0x351   : > { %6297 = vmatmul.msk.f32.gmra.mxu3 %vm385_vm1, %v6439_v49 }
 0x352   : > { %v5067_v27 = vpack.c.bf16 %v5037_v46, %v5036_v16 }
 0x353   : > { %v4896_v39 = vpop.f32.mrf.mxu1 }
 0x354   : > { %6261 = vmatmul.msk.bf16.gmra.mxu2 %vm1574_vm4, %v5067_v27  ;;  %v4970_v6 = vadd.f32 %v4896_v39, %v8145_v20  ;;  %v9067_v20 = vld [vmem:[#allocation19_spill] sm:$0xff]  ;;  %v4518_v55 = vpop.f32.mrf.mxu0  ;;  %v9068_v27 = vld [vmem:[#allocation25_spill] sm:$0xff] }
 0x356   : > { %6254 = vmatmul.msk.bf16.gmra.mxu1 %vm1574_vm4, %v9066_v57  ;;  %v5006_v31 = vadd.f32 %v8306_v58, %v4970_v6  ;;  %v4577_v57 = vadd.f32 %v4510_v62, %v8030_v13  ;;  %v4579_v62 = vadd.f32 %v4515_v18, %v8077_v8 }
 0x358   : > { %v5038_v21 = vmax.f32 %v5006_v31, 0.0 }
 0x359   : > { %6298 = vmatmul.msk.f32.gmra.mxu3 %vm385_vm1, %v6440_v63 }
 0x35b   : > { %v4898_v40 = vpop.f32.mrf.mxu1 }
 0x35c   : > { %v4971_v44 = vadd.f32 %v4898_v40, %v8155_v36  ;;  %v6442_v36 = vld [vmem:[%s6625_s27 + $0xb8] sm:$0xff]  ;;  %v4520_v46 = vpop.f32.mrf.mxu0 }
 0x35e   : > { %v5007_v34 = vadd.f32 %v8306_v58, %v4971_v44 }
 0x360   : > { %v5039_v17 = vmax.f32 %v5007_v34, 0.0 }
 0x361   : > { %6299 = vmatmul.msk.f32.gmra.mxu3 %vm385_vm1, %v6441_v7 }
 0x362   : > { %v5068_v12 = vpack.c.bf16 %v5039_v17, %v5038_v21 }
 0x363   : > { %v4901_v51 = vpop.f32.mrf.mxu1 }
 0x364   : > { %6262 = vmatmul.msk.bf16.gmra.mxu2 %vm1574_vm4, %v5068_v12  ;;  %v4972_v24 = vadd.f32 %v4901_v51, %v8171_v37  ;;  %v4576_v37 = vadd.f32 %v4508_v48, %v8011_v41  ;;  %v4523_v40 = vpop.f32.mrf.mxu0  ;;  %v4578_v41 = vadd.f32 %v4513_v22, %v8055_v4  ;;  %v4771_v4 = vrot.slane %v8225_v23, 5 }
 0x365   : > { %v4580_v22 = vadd.f32 %v4518_v55, %v8087_v33 }
 0x366   : > { %6255 = vmatmul.msk.bf16.gmra.mxu1 %vm1574_vm4, %v9067_v20  ;;  %v5008_v43 = vadd.f32 %v8306_v58, %v4972_v24  ;;  %v4773_v18 = vrot.slane %v4771_v4, 4 }
 0x368   : > { %v5040_v10 = vmax.f32 %v5008_v43, 0.0 }
 0x369   : > { %6300 = vmatmul.msk.f32.gmra.mxu3 %vm385_vm1, %v6442_v36 }
 0x36b   : > { %v4903_v3 = vpop.f32.mrf.mxu1 }
 0x36c   : > { %v4973_v59 = vadd.f32 %v4903_v3, %v8181_v1  ;;  %v4525_v48 = vpop.f32.mrf.mxu0 }
 0x36e   : > { %v5009_v0 = vadd.f32 %v8306_v58, %v4973_v59 }
 0x370   : > { %v5041_v32 = vmax.f32 %v5009_v0, 0.0  ;;  %v4774_v0 = vrot.slane %v8236_v19, 5 }
 0x372   : > { %v5069_v16 = vpack.c.bf16 %v5041_v32, %v5040_v10  ;;  %v4581_v32 = vadd.f32 %v4520_v46, %v8102_v2 }
 0x373   : > { %v4906_v49 = vpop.f32.mrf.mxu1 }
 0x374   : > { %6263 = vmatmul.msk.bf16.gmra.mxu2 %vm1574_vm4, %v5069_v16  ;;  %v4974_v39 = vadd.f32 %v4906_v49, %v4576_v37  ;;  %v4528_v3 = vpop.f32.mrf.mxu0  ;;  %v4775_v37 = vsel %vm6753_vm9, %v4773_v18, %v4774_v0  ;;  %v8392_v18 = vpop.f32.mrf.mxu2 }
 0x376   : > { %6256 = vmatmul.msk.bf16.gmra.mxu1 %vm1574_vm4, %v9068_v27  ;;  %v5010_v1 = vadd.f32 %v8306_v58, %v4974_v39  ;;  %v4809_v39 = vunpack.c.l.b16 %v4775_v37 }
 0x378   : > { %v5042_v44 = vmax.f32 %v5010_v1, 0.0 }
 0x37b   : > { %v4908_v6 = vpop.f32.mrf.mxu1 }
 0x37c   : > { %v4975_v63 = vadd.f32 %v4908_v6, %v4577_v57  ;;  %v4530_v16 = vpop.f32.mrf.mxu0 }
 0x37e   : > { %v5011_v31 = vadd.f32 %v8306_v58, %v4975_v63  ;;  %v4582_v63 = vadd.f32 %v4523_v40, %v8116_v25 }
 0x380   : > { %v5043_v34 = vmax.f32 %v5011_v31, 0.0  ;;  %v4583_v31 = vadd.f32 %v4525_v48, %v8124_v11  ;;  %v4584_v48 = vadd.f32 %v4528_v3, %v8140_v52 }
 0x382   : > { %v5070_v21 = vpack.c.bf16 %v5043_v34, %v5042_v44  ;;  %v5380_v44 = vpop.f32.mrf.mxu3  ;;  %v6443_v34 = vld [vmem:[%s6625_s27 + $0xc0] sm:$0xff] }
 0x383   : > { %v4911_v17 = vpop.f32.mrf.mxu1  ;;  %6301 = vmatmul.msk.f32.gmra.mxu3 %vm385_vm1, %v6443_v34 }
 0x384   : > { %6264 = vmatmul.msk.bf16.gmra.mxu2 %vm1574_vm4, %v5070_v21  ;;  %v4976_v13 = vadd.f32 %v4911_v17, %v4578_v41  ;;  %v4533_v1 = vpop.f32.mrf.mxu0 }
 0x385   : > { %v4586_v37 = vadd.f32 %v4533_v1, %v8166_v47 }
 0x386   : > { %6257 = vmatmul.msk.bf16.gmra.mxu1 %vm1574_vm4, %v7983_v53  ;;  %v5012_v12 = vadd.f32 %v8306_v58, %v4976_v13  ;;  %v4615_v53 = vld [vmem:[#allocation2 + $0xcc] sm:$0xe] }
 0x387   : > { %v6242_v8 = vrot.slane %v4615_v53, 9 }
 0x388   : > { %v5044_v24 = vmax.f32 %v5012_v12, 0.0 }
 0x389   : > { %v4772_v23 = vsel %vm6753_vm9, %v6242_v8, %v4771_v4 }
 0x38a   : > { %v4808_v27 = vunpack.c.l.b16 %v4772_v23  ;;  %v5383_v12 = vpop.f32.mrf.mxu3  ;;  %v8405_v23 = vld [vmem:[%s8971_s8] ss:$0 sm:$0xff] }
 0x38b   : > { %v4913_v7 = vpop.f32.mrf.mxu1 }
 0x38c   : > { %v4977_v51 = vadd.f32 %v4913_v7, %v4579_v62  ;;  %v4825_v2 = vpack.c.b16 %v4809_v39, %v4808_v27  ;;  %v4535_v62 = vpop.f32.mrf.mxu0  ;;  %v8410_v27 = vadd.f32 %v8405_v23, %v5380_v44 }
 0x38d   : > { %v4587_v39 = vadd.f32 %v4535_v62, %v8176_v15  ;;  %v6448_v62 = vld [vmem:[%s6625_s27 + $0xe8] sm:$0xff] }
 0x38e   : > { %v5013_v20 = vadd.f32 %v8306_v58, %v4977_v51  ;;  %v6444_v51 = vld [vmem:[%s6625_s27 + $0xc8] sm:$0xff] }
 0x38f   : > { %6302 = vmatmul.msk.f32.gmra.mxu3 %vm385_vm1, %v6444_v51 }
 0x390   : > { %v5045_v36 = vmax.f32 %v5013_v20, 0.0 }
 0x392   : > { %v5071_v43 = vpack.c.bf16 %v5045_v36, %v5044_v24  ;;  %v4585_v36 = vadd.f32 %v4530_v16, %v8150_v61 }
 0x393   : > { %v4916_v59 = vpop.f32.mrf.mxu1 }
 0x394   : > { %6265 = vmatmul.msk.bf16.gmra.mxu2 %vm1574_vm4, %v5071_v43  ;;  %v4978_v10 = vadd.f32 %v4916_v59, %v4580_v22  ;;  %v4538_v24 = vpop.f32.mrf.mxu0  ;;  %v5386_v43 = vpop.f32.mrf.mxu3  ;;  %v6445_v59 = vld [vmem:[%s6625_s27 + $0xd0] sm:$0xff] }
 0x396   : > { %6258 = vmatmul.msk.bf16.gmra.mxu1 %vm1574_vm4, %v8266_v54  ;;  %v5014_v33 = vadd.f32 %v8306_v58, %v4978_v10 }
 0x397   : > { %6303 = vmatmul.msk.f32.gmra.mxu3 %vm385_vm1, %v6445_v59 }
 0x398   : > { %v5046_v19 = vmax.f32 %v5014_v33, 0.0 }
 0x39b   : > { %v4918_v49 = vpop.f32.mrf.mxu1 }
 0x39c   : > { %v4979_v55 = vadd.f32 %v4918_v49, %v4581_v32  ;;  %v5389_v3 = vpop.f32.mrf.mxu3  ;;  %v6446_v32 = vld [vmem:[%s6625_s27 + $0xd8] sm:$0xff]  ;;  %v4540_v61 = vpop.f32.mrf.mxu0  ;;  %v8400_v49 = vld [vmem:[%s8969_s6] ss:$0 sm:$0xff] }
 0x39e   : > { %v5015_v54 = vadd.f32 %v8306_v58, %v4979_v55 }
 0x39f   : > { %6304 = vmatmul.msk.f32.gmra.mxu3 %vm385_vm1, %v6446_v32  ;;  %v8448_v32 = vadd.f32 %v8405_v23, %v5389_v3 }
 0x3a0   : > { %v5047_v57 = vmax.f32 %v5015_v54, 0.0 }
 0x3a2   : > { %v5072_v6 = vpack.c.bf16 %v5047_v57, %v5046_v19 }
 0x3a3   : > { %v4921_v46 = vpop.f32.mrf.mxu1 }
 0x3a4   : > { %6266 = vmatmul.msk.bf16.gmra.mxu2 %vm1574_vm4, %v5072_v6  ;;  %v4980_v56 = vadd.f32 %v4921_v46, %v4582_v63  ;;  %v5392_v57 = vpop.f32.mrf.mxu3  ;;  %v6447_v6 = vld [vmem:[%s6625_s27 + $0xe0] sm:$0xff]  ;;  %v4543_v63 = vpop.f32.mrf.mxu0 }
 0x3a6   : > { %6259 = vmatmul.msk.bf16.gmra.mxu1 %vm1574_vm4, %v4825_v2  ;;  %v5016_v17 = vadd.f32 %v8306_v58, %v4980_v56 }
 0x3a7   : > { %6305 = vmatmul.msk.f32.gmra.mxu3 %vm385_vm1, %v6447_v6 }
 0x3a8   : > { %v5048_v7 = vmax.f32 %v5016_v17, 0.0 }
 0x3ab   : > { %v4923_v21 = vpop.f32.mrf.mxu1 }
 0x3ac   : > { %v4981_v41 = vadd.f32 %v4923_v21, %v4583_v31  ;;  %v8423_v21 = vadd.f32 %v8405_v23, %v5383_v12  ;;  %v4545_v51 = vpop.f32.mrf.mxu0 }
 0x3ae   : > { %v5017_v13 = vadd.f32 %v8306_v58, %v4981_v41 }
 0x3b0   : > { %v5049_v25 = vmax.f32 %v5017_v13, 0.0  ;;  %v5395_v13 = vpop.f32.mrf.mxu3  ;;  %6306 = vmatmul.msk.f32.gmra.mxu3 %vm385_vm1, %v6448_v62 }
 0x3b2   : > { %v5073_v40 = vpack.c.bf16 %v5049_v25, %v5048_v7 }
 0x3b3   : > { %v4926_v11 = vpop.f32.mrf.mxu1 }
 0x3b4   : > { %6267 = vmatmul.msk.bf16.gmra.mxu2 %vm1574_vm4, %v5073_v40  ;;  %v4982_v20 = vadd.f32 %v4926_v11, %v4584_v48  ;;  %v4588_v40 = vadd.f32 %v4538_v24, %v8192_v26 }
 0x3b6   : > { %v5018_v53 = vadd.f32 %v8306_v58, %v4982_v20  ;;  %v8435_v20 = vadd.f32 %v8405_v23, %v5386_v43 }
 0x3b8   : > { %v5050_v0 = vmax.f32 %v5018_v53, 0.0  ;;  %v6449_v53 = vld [vmem:[%s6625_s27 + $0xf0] sm:$0xff] }
 0x3bb   : > { %v4928_v4 = vpop.f32.mrf.mxu1 }
 0x3bc   : > { %v4983_v22 = vadd.f32 %v4928_v4, %v4585_v36  ;;  %v4589_v36 = vadd.f32 %v4540_v61, %v8199_v35  ;;  %v5398_v4 = vpop.f32.mrf.mxu3  ;;  %6307 = vmatmul.msk.f32.gmra.mxu3 %vm385_vm1, %v6449_v53  ;;  %v4548_v61 = vpop.f32.mrf.mxu0 }
 0x3be   : > { %v5019_v8 = vadd.f32 %v8306_v58, %v4983_v22 }
 0x3c0   : > { %v5051_v10 = vmax.f32 %v5019_v8, 0.0 }
 0x3c2   : > { %v5074_v52 = vpack.c.bf16 %v5051_v10, %v5050_v0 }
 0x3c3   : > { %v4931_v16 = vpop.f32.mrf.mxu1 }
 0x3c4   : > { %6268 = vmatmul.msk.bf16.gmra.mxu2 %vm1574_vm4, %v5074_v52  ;;  %v4984_v55 = vadd.f32 %v4931_v16, %v4586_v37 }
 0x3c6   : > { %v5020_v46 = vadd.f32 %v8306_v58, %v4984_v55  ;;  %v6450_v55 = vld [vmem:[%s6625_s27 + $0xf8] sm:$0xff]  ;;  %s323_s27 = sand.u32 1, %s6505_s10  }
 0x3c7   : > { %v5147_v33 = vpop.f32.mrf.mxu2  ;;  %s5849_s14 = sshll.u32 %s323_s27, 8  ;;  %s5768_s13 = scalar_lea.sflag [#allocation4], %s323_s27 }
 0x3c8   : > { %v5148_v54 = vadd.f32 %v8400_v49, %v5147_v33  ;;  %v5052_v31 = vmax.f32 %v5020_v46, 0.0  ;;  %v5401_v33 = vpop.f32.mrf.mxu3  ;;  %6308 = vmatmul.msk.f32.gmra.mxu3 %vm385_vm1, %v6450_v55  ;;  %v8460_v46 = vadd.f32 %v8405_v23, %v5392_v57  ;;  %vm5636_vm1 = vcmask 130048   ;;  %s8592_s16 = scalar_lea.vmem [#allocation3], %s5849_s14 }
 0x3c9   : > { %s5780_s24 = sshll.u32 %s8592_s16, 4  ;;  %s5781_s24 = int_to_ptr.vmem [resolvable:$true] %s5780_s24 }
 0x3ca   : > { %v5227_v19 = vmax.f32 %v5148_v54, 0.0 }
 0x3cb   : > { %v4933_v2 = vpop.f32.mrf.mxu1 }
 0x3cc   : > { %v8417_v47 = vadd.f32 %v8410_v27, %v5227_v19  ;;  %v4985_v1 = vadd.f32 %v4933_v2, %v4587_v39  ;;  %5540 = vrot.lane.b32.xlu0 %v5227_v19, %s6516_s29  ;;  %v4590_v19 = vadd.f32 %v4543_v63, %v8216_v28 }
 0x3ce   : > { %v5021_v56 = vadd.f32 %v8306_v58, %v4985_v1  ;;  %v4591_v1 = vadd.f32 %v4545_v51, %v8223_v50  ;;  %v8471_v50 = vadd.f32 %v8405_v23, %v5395_v13  ;;  %v8481_v13 = vadd.f32 %v8405_v23, %v5398_v4 }
 0x3cf   : > { %v5149_v15 = vpop.f32.mrf.mxu2 }
 0x3d0   : > { %v5053_v44 = vmax.f32 %v5021_v56, 0.0  ;;  %v5150_v34 = vadd.f32 %v8400_v49, %v5149_v15  ;;  %v4550_v15 = vpop.f32.mrf.mxu0 }
 0x3d2   : > { %v5075_v17 = vpack.c.bf16 %v5053_v44, %v5052_v31  ;;  %v5228_v41 = vmax.f32 %v5150_v34, 0.0 }
 0x3d3   : > { %v4936_v7 = vpop.f32.mrf.mxu1 }
 0x3d4   : > { %v8428_v25 = vadd.f32 %v8423_v21, %v5228_v41  ;;  %5542 = vrot.lane.b32.xlu0 %v5228_v41, %s6516_s29  ;;  %6269 = vmatmul.msk.bf16.gmra.mxu2 %vm1574_vm4, %v5075_v17  ;;  %v4986_v11 = vadd.f32 %v4936_v7, %v4588_v40 }
 0x3d6   : > { %v5022_v8 = vadd.f32 %v8306_v58, %v4986_v11 }
 0x3d7   : > { %v5152_v12 = vpop.f32.mrf.mxu2 }
 0x3d8   : > { %v5153_v48 = vadd.f32 %v8400_v49, %v5152_v12  ;;  %v5054_v10 = vmax.f32 %v5022_v8, 0.0  ;;  %v4553_v11 = vpop.f32.mrf.mxu0 }
 0x3da   : > { %v5229_v59 = vmax.f32 %v5153_v48, 0.0  ;;  %v4592_v48 = vadd.f32 %v4548_v61, %v8240_v60 }
 0x3db   : > { %v4938_v22 = vpop.f32.mrf.mxu1 }
 0x3dc   : > { %v8442_v26 = vadd.f32 %v8435_v20, %v5229_v59  ;;  %v4987_v24 = vadd.f32 %v4938_v22, %v4589_v36  ;;  %5544 = vrot.lane.b32.xlu1 %v5229_v59, %s6516_s29  ;;  %v4593_v22 = vadd.f32 %v4550_v15, %v8249_v38  ;;  %v8492_v38 = vadd.f32 %v8405_v23, %v5401_v33 }
 0x3de   : > { %v5023_v43 = vadd.f32 %v8306_v58, %v4987_v24 }
 0x3df   : > { %v5154_v0 = vpop.f32.mrf.mxu2 }
 0x3e0   : > { %v5055_v35 = vmax.f32 %v5023_v43, 0.0  ;;  %v5155_v52 = vadd.f32 %v8400_v49, %v5154_v0 }
 0x3e2   : > { %v5076_v16 = vpack.c.bf16 %v5055_v35, %v5054_v10  ;;  %v5230_v37 = vmax.f32 %v5155_v52, 0.0  ;;  %v4555_v35 = vpop.f32.mrf.mxu0 }
 0x3e3   : > { %v4941_v54 = vpop.f32.mrf.mxu1  ;;  %v4595_v33 = vadd.f32 %v4555_v35, %v8272_v42 }
 0x3e4   : > { %v8453_v39 = vadd.f32 %v8448_v32, %v5230_v37  ;;  %5546 = vrot.lane.b32.xlu1 %v5230_v37, %s6516_s29  ;;  %6270 = vmatmul.msk.bf16.gmra.mxu2 %vm1574_vm4, %v5076_v16  ;;  %v4988_v3 = vadd.f32 %v4941_v54, %v4590_v19 }
 0x3e6   : > { %v5024_v44 = vadd.f32 %v8306_v58, %v4988_v3 }
 0x3e7   : > { %v5157_v6 = vpop.f32.mrf.mxu2 }
 0x3e8   : > { %v5158_v2 = vadd.f32 %v8400_v49, %v5157_v6  ;;  %v5056_v41 = vmax.f32 %v5024_v44, 0.0  ;;  %v4594_v6 = vadd.f32 %v4553_v11, %v8264_v45 }
 0x3ea   : > { %v5231_v56 = vmax.f32 %v5158_v2, 0.0 }
 0x3eb   : > { %v4943_v31 = vpop.f32.mrf.mxu1 }
 0x3ec   : > { %v8465_v34 = vadd.f32 %v8460_v46, %v5231_v56  ;;  %v4989_v17 = vadd.f32 %v4943_v31, %v4591_v1  ;;  %5548 = vrot.lane.b32.xlu2 %v5231_v56, %s6516_s29  ;;  %v4558_v56 = vpop.f32.mrf.mxu0 }
 0x3ee   : > { %v5025_v28 = vadd.f32 %v8306_v58, %v4989_v17 }
 0x3ef   : > { %v5159_v63 = vpop.f32.mrf.mxu2 }
 0x3f0   : > { %v5057_v62 = vmax.f32 %v5025_v28, 0.0  ;;  %v5160_v57 = vadd.f32 %v8400_v49, %v5159_v63 }
 0x3f2   : > { %v5077_v7 = vpack.c.bf16 %v5057_v62, %v5056_v41  ;;  %v5232_v40 = vmax.f32 %v5160_v57, 0.0 }
 0x3f3   : > { %v4946_v51 = vpop.f32.mrf.mxu1 }
 0x3f4   : > { %v8474_v12 = vadd.f32 %v8471_v50, %v5232_v40  ;;  %5550 = vrot.lane.b32.xlu2 %v5232_v40, %s6516_s29  ;;  %6271 = vmatmul.msk.bf16.gmra.mxu2 %vm1574_vm4, %v5077_v7  ;;  %v4990_v59 = vadd.f32 %v4946_v51, %v4592_v48  ;;  %v4560_v7 = vpop.f32.mrf.mxu0  ;;  %v4596_v51 = vadd.f32 %v4558_v56, %v8279_v29 }
 0x3f5   : > { %v5641_v56 = vsel %vm5636_vm1, %v8465_v34, %v8460_v46  ;;  %v5404_v34 = vpop.f32.mrf.mxu3 }
 0x3f6   : > { %v5026_v43 = vadd.f32 %v8306_v58, %v4990_v59  ;;  %v4597_v59 = vadd.f32 %v4560_v7, %v8284_v5 }
 0x3f7   : > { %v5162_v36 = vpop.f32.mrf.mxu2 }
 0x3f8   : > { %v5163_v53 = vadd.f32 %v8400_v49, %v5162_v36  ;;  %v5058_v61 = vmax.f32 %v5026_v43, 0.0 }
 0x3fa   : > { %v5233_v8 = vmax.f32 %v5163_v53, 0.0 }
 0x3fb   : > { %v4948_v24 = vpop.f32.mrf.mxu1 }
 0x3fc   : > { %v8486_v0 = vadd.f32 %v8481_v13, %v5233_v8  ;;  %v4991_v10 = vadd.f32 %v4948_v24, %v4593_v22  ;;  %5552 = vrot.lane.b32.xlu0 %v5233_v8, %s6516_s29  ;;  %v4563_v43 = vpop.f32.mrf.mxu0 }
 0x3fe   : > { %v5027_v60 = vadd.f32 %v8306_v58, %v4991_v10  ;;  %v5637_v10 = vsel %vm5636_vm1, %v8417_v47, %v8410_v27  ;;  %v5638_v27 = vsel %vm5636_vm1, %v8428_v25, %v8423_v21  ;;  %v4598_v47 = vadd.f32 %v4563_v43, %v8291_v9 }
 0x3ff   : > { %v5164_v52 = vpop.f32.mrf.mxu2 }
 0x400   : > { %v5059_v16 = vmax.f32 %v5027_v60, 0.0  ;;  %v5165_v4 = vadd.f32 %v8400_v49, %v5164_v52 }
 0x402   : > { %v5078_v37 = vpack.c.bf16 %v5059_v16, %v5058_v61  ;;  %v5234_v55 = vmax.f32 %v5165_v4, 0.0 }
 0x403   : > { %v4951_v54 = vpop.f32.mrf.mxu1 }
 0x404   : > { %v8495_v19 = vadd.f32 %v8492_v38, %v5234_v55  ;;  %5554 = vrot.lane.b32.xlu1 %v5234_v55, %s6516_s29  ;;  %6272 = vmatmul.msk.bf16.gmra.mxu2 %vm1574_vm4, %v5078_v37  ;;  %v4992_v2 = vadd.f32 %v4951_v54, %v4594_v6  ;;  %v3658_v37 = vadd.f32 %v8392_v18, %v8296_v14  ;;  %v4565_v55 = vpop.f32.mrf.mxu0 }
 0x406   : > { %v5028_v44 = vadd.f32 %v8306_v58, %v4992_v2  ;;  %v3945_v6 = vadd.f32 %v8340_v30, %v3658_v37  ;;  %v5639_v30 = vsel %vm5636_vm1, %v8442_v26, %v8435_v20 }
 0x407   : > { %v5167_v3 = vpop.f32.mrf.mxu2 }
 0x408   : > { %v8501_v1 = vadd.f32 %v8400_v49, %v5167_v3  ;;  %v5060_v63 = vmax.f32 %v5028_v44, 0.0  ;;  %v4599_v14 = vadd.f32 %v4565_v55, %v3945_v6 }
 0x40a   : > { %v5235_v15 = vmax.f32 %v8501_v1, 0.0 }
 0x40b   : > { %v4953_v31 = vpop.f32.mrf.mxu1 }
 0x40c   : > { %v4993_v17 = vadd.f32 %v4953_v31, %v4595_v33  ;;  %5556 = vrot.lane.b32.xlu2 %v5235_v15, %s6516_s29 }
 0x40e   : > { %v5029_v45 = vadd.f32 %v8306_v58, %v4993_v17 }
 0x40f   : > { %v5169_v28 = vpop.f32.mrf.mxu2 }
 0x410   : > { %v5061_v41 = vmax.f32 %v5029_v45, 0.0  ;;  %v8511_v62 = vadd.f32 %v8400_v49, %v5169_v28 }
 0x412   : > { %v5079_v57 = vpack.c.bf16 %v5061_v41, %v5060_v63  ;;  %v5236_v42 = vmax.f32 %v8511_v62, 0.0  ;;  %v5642_v63 = vsel %vm5636_vm1, %v8474_v12, %v8471_v50 }
 0x413   : > { %v4956_v40 = vpop.f32.mrf.mxu1 }
 0x414   : > { %5558 = vrot.lane.b32.xlu0 %v5236_v42, %s6516_s29  ;;  %6273 = vmatmul.msk.bf16.gmra.mxu2 %vm1574_vm4, %v5079_v57  ;;  %v4994_v48 = vadd.f32 %v4956_v40, %v4596_v51  ;;  %v8581_v57 = vpop.f32.mrf.mxu3 }
 0x416   : > { %v5030_v8 = vadd.f32 %v8306_v58, %v4994_v48 }
 0x417   : > { %v5172_v11 = vpop.f32.mrf.mxu2 }
 0x418   : > { %v8520_v36 = vadd.f32 %v8400_v49, %v5172_v11  ;;  %v5062_v5 = vmax.f32 %v5030_v8, 0.0 }
 0x41a   : > { %v5237_v53 = vmax.f32 %v8520_v36, 0.0 }
 0x41b   : > { %v4958_v22 = vpop.f32.mrf.mxu1 }
 0x41c   : > { %v4995_v24 = vadd.f32 %v4958_v22, %v4597_v59  ;;  %5560 = vrot.lane.b32.xlu1 %v5237_v53, %s6516_s29  ;;  %v8600_v51 = vpop.f32.mrf.mxu3 }
 0x41e   : > { %v5031_v29 = vadd.f32 %v8306_v58, %v4995_v24 }
 0x41f   : > { %v5174_v60 = vpop.f32.mrf.mxu2 }
 0x420   : > { %v5063_v35 = vmax.f32 %v5031_v29, 0.0  ;;  %v8533_v52 = vadd.f32 %v8400_v49, %v5174_v60 }
 0x422   : > { %v5080_v61 = vpack.c.bf16 %v5063_v35, %v5062_v5  ;;  %v5238_v16 = vmax.f32 %v8533_v52, 0.0  ;;  %v5643_v35 = vsel %vm5636_vm1, %v8486_v0, %v8481_v13  ;;  %v5644_v0 = vsel %vm5636_vm1, %v8495_v19, %v8492_v38 }
 0x423   : > { %v4961_v4 = vpop.f32.mrf.mxu1  ;;  %v5405_v38 = vadd.f32 %v8405_v23, %v5404_v34 }
 0x424   : > { %5562 = vrot.lane.b32.xlu2 %v5238_v16, %s6516_s29  ;;  %6274 = vmatmul.msk.bf16.gmra.mxu2 %vm1574_vm4, %v5080_v61  ;;  %v4996_v3 = vadd.f32 %v4961_v4, %v4598_v47  ;;  %v5413_v61 = vpop.f32.mrf.mxu3 }
 0x426   : > { %v5032_v21 = vadd.f32 %v8306_v58, %v4996_v3 }
 0x427   : > { %v5177_v54 = vpop.f32.mrf.mxu2 }
 0x428   : > { %v8548_v2 = vadd.f32 %v8400_v49, %v5177_v54  ;;  %v5064_v44 = vmax.f32 %v5032_v21, 0.0 }
 0x42a   : > { %v5239_v18 = vmax.f32 %v8548_v2, 0.0 }
 0x42b   : > { %v4963_v33 = vpop.f32.mrf.mxu1 }
 0x42c   : > { %v4997_v25 = vadd.f32 %v4963_v33, %v4599_v14  ;;  %5564 = vrot.lane.b32.xlu0 %v5239_v18, %s6516_s29  ;;  %v8638_v21 = vpop.f32.mrf.mxu3 }
 0x42e   : > { %v5033_v9 = vadd.f32 %v8306_v58, %v4997_v25  ;;  %v5640_v58 = vsel %vm5636_vm1, %v8453_v39, %v8448_v32 }
 0x42f   : > { %v5179_v31 = vpop.f32.mrf.mxu2 }
 0x430   : > { %v5065_v17 = vmax.f32 %v5033_v9, 0.0  ;;  %v8563_v46 = vadd.f32 %v8400_v49, %v5179_v31 }
 0x432   : > { %v5081_v45 = vpack.c.bf16 %v5065_v17, %v5064_v44  ;;  %v5240_v28 = vmax.f32 %v8563_v46, 0.0 }
 0x434   : > { %5566 = vrot.lane.b32.xlu1 %v5240_v28, %s6516_s29  ;;  %6275 = vmatmul.msk.bf16.gmra.mxu2 %vm1574_vm4, %v5081_v45  ;;  %v8653_v44 = vpop.f32.mrf.mxu3 }
 0x437   : > { %v5182_v20 = vpop.f32.mrf.mxu2 }
 0x438   : > { %v8577_v26 = vadd.f32 %v8400_v49, %v5182_v20 }
 0x43a   : > { %v5241_v41 = vmax.f32 %v8577_v26, 0.0 }
 0x43c   : > { %5568 = vrot.lane.b32.xlu2 %v5241_v41, %s6516_s29 }
 0x43e   : > { %v5541_v50 = vpop.permute.xlu0 %5540 }
 0x43f   : > { %v5670_v32 = vsel %vm5669_vm2, %v5637_v10, %v5541_v50  ;;  %v5184_v39 = vpop.f32.mrf.mxu2 }
 0x440   : > { %v5702_v12 = vmax.f32 %v5670_v32, 0.0  ;;  %v8590_v7 = vadd.f32 %v8400_v49, %v5184_v39 }
 0x442   : > { %5735 = vst.msk [vmem:[%s8592_s16] sm:$0xff] %vm5734_vm3, %v5702_v12  ;;  %v5242_v40 = vmax.f32 %v8590_v7, 0.0 }
 0x444   : > { %5570 = vrot.lane.b32.xlu0 %v5242_v40, %s6516_s29 }
 0x446   : > { %v5543_v11 = vpop.permute.xlu0 %5542  ;;  %v5549_v48 = vpop.permute.xlu2 %5548 }
 0x447   : > { %v5671_v59 = vsel %vm5669_vm2, %v5638_v27, %v5543_v11  ;;  %v5674_v22 = vsel %vm5669_vm2, %v5641_v56, %v5549_v48  ;;  %v5187_v8 = vpop.f32.mrf.mxu2 }
 0x448   : > { %v5703_v24 = vmax.f32 %v5671_v59, 0.0  ;;  %v5706_v43 = vmax.f32 %v5674_v22, 0.0  ;;  %v8605_v29 = vadd.f32 %v8400_v49, %v5187_v8  ;;  %v5414_v59 = vadd.f32 %v8405_v23, %v5413_v61 }
 0x449   : > { %v5408_v61 = vadd.f32 %v8405_v23, %v8581_v57 }
 0x44a   : > { %5736 = vst.msk [vmem:[%s8592_s16 + $0x8] sm:$0xff] %vm5734_vm3, %v5703_v24  ;;  %v5243_v10 = vmax.f32 %v8605_v29, 0.0 }
 0x44b   : > { %5739 = vst.msk [vmem:[%s8592_s16 + $0x20] sm:$0xff] %vm5734_vm3, %v5706_v43 }
 0x44c   : > { %5572 = vrot.lane.b32.xlu1 %v5243_v10, %s6516_s29 }
 0x44e   : > { %v5545_v60 = vpop.permute.xlu1 %5544  ;;  %v5551_v5 = vpop.permute.xlu2 %5550 }
 0x44f   : > { %v5672_v4 = vsel %vm5669_vm2, %v5639_v30, %v5545_v60  ;;  %v5675_v37 = vsel %vm5669_vm2, %v5642_v63, %v5551_v5  ;;  %v5189_v27 = vpop.f32.mrf.mxu2  ;;  %v5484_v30 = vadd.f32 %v5405_v38, %v5235_v15  ;;  %v5422_v15 = vpop.f32.mrf.mxu3 }
 0x450   : > { %v5704_v47 = vmax.f32 %v5672_v4, 0.0  ;;  %v5707_v55 = vmax.f32 %v5675_v37, 0.0  ;;  %v8621_v54 = vadd.f32 %v8400_v49, %v5189_v27 }
 0x451   : > { %v5645_v45 = vsel %vm5636_vm1, %v5484_v30, %v5405_v38 }
 0x452   : > { %5737 = vst.msk [vmem:[%s8592_s16 + $0x10] sm:$0xff] %vm5734_vm3, %v5704_v47  ;;  %v5244_v6 = vmax.f32 %v8621_v54, 0.0 }
 0x453   : > { %5740 = vst.msk [vmem:[%s8592_s16 + $0x28] sm:$0xff] %vm5734_vm3, %v5707_v55 }
 0x454   : > { %5574 = vrot.lane.b32.xlu2 %v5244_v6, %s6516_s29 }
 0x456   : > { %v5547_v13 = vpop.permute.xlu1 %5546 }
 0x457   : > { %v5673_v3 = vsel %vm5669_vm2, %v5640_v58, %v5547_v13  ;;  %v5192_v14 = vpop.f32.mrf.mxu2  ;;  %v8680_v8 = vpop.f32.mrf.mxu3 }
 0x458   : > { %v5705_v56 = vmax.f32 %v5673_v3, 0.0  ;;  %v8636_v33 = vadd.f32 %v8400_v49, %v5192_v14  ;;  %v5411_v3 = vadd.f32 %v8405_v23, %v8600_v51  ;;  %v5423_v51 = vadd.f32 %v8405_v23, %v5422_v15 }
 0x45a   : > { %5738 = vst.msk [vmem:[%s8592_s16 + $0x18] sm:$0xff] %vm5734_vm3, %v5705_v56  ;;  %v5245_v25 = vmax.f32 %v8636_v33, 0.0  ;;  %v5486_v30 = vadd.f32 %v5411_v3, %v5237_v53 }
 0x45c   : > { %5576 = vrot.lane.b32.xlu0 %v5245_v25, %s6516_s29 }
 0x45f   : > { %v5194_v19 = vpop.f32.mrf.mxu2  ;;  %v8701_v13 = vpop.f32.mrf.mxu3 }
 0x460   : > { %v8648_v9 = vadd.f32 %v8400_v49, %v5194_v19 }
 0x462   : > { %v5246_v31 = vmax.f32 %v8648_v9, 0.0 }
 0x464   : > { %5578 = vrot.lane.b32.xlu1 %v5246_v31, %s6516_s29 }
 0x466   : > { %v5557_v17 = vpop.permute.xlu2 %5556 }
 0x467   : > { %v5678_v34 = vsel %vm5669_vm2, %v5645_v45, %v5557_v17  ;;  %v5197_v63 = vpop.f32.mrf.mxu2  ;;  %v5431_v45 = vpop.f32.mrf.mxu3 }
 0x468   : > { %v5710_v58 = vmax.f32 %v5678_v34, 0.0  ;;  %v8661_v20 = vadd.f32 %v8400_v49, %v5197_v63  ;;  %v5647_v63 = vsel %vm5636_vm1, %v5486_v30, %v5411_v3 }
 0x46a   : > { %5743 = vst.msk [vmem:[%s8592_s16 + $0x40] sm:$0xff] %vm5734_vm3, %v5710_v58  ;;  %v5247_v1 = vmax.f32 %v8661_v20, 0.0 }
 0x46c   : > { %5580 = vrot.lane.b32.xlu2 %v5247_v1, %s6516_s29 }
 0x46e   : > { %v5553_v50 = vpop.permute.xlu0 %5552 }
 0x46f   : > { %v5676_v32 = vsel %vm5669_vm2, %v5643_v35, %v5553_v50  ;;  %v5199_v39 = vpop.f32.mrf.mxu2  ;;  %v5487_v35 = vadd.f32 %v5414_v59, %v5238_v16  ;;  %v8740_v15 = vpop.f32.mrf.mxu3 }
 0x470   : > { %v5708_v12 = vmax.f32 %v5676_v32, 0.0  ;;  %v8671_v11 = vadd.f32 %v8400_v49, %v5199_v39  ;;  %v5490_v32 = vadd.f32 %v5423_v51, %v5241_v41 }
 0x471   : > { %v5648_v27 = vsel %vm5636_vm1, %v5487_v35, %v5414_v59 }
 0x472   : > { %5741 = vst.msk [vmem:[%s8592_s16 + $0x30] sm:$0xff] %vm5734_vm3, %v5708_v12  ;;  %v5248_v48 = vmax.f32 %v8671_v11, 0.0  ;;  %v5417_v12 = vadd.f32 %v8405_v23, %v8638_v21  ;;  %v5420_v21 = vadd.f32 %v8405_v23, %v8653_v44 }
 0x474   : > { %5582 = vrot.lane.b32.xlu0 %v5248_v48, %s6516_s29 }
 0x476   : > { %v5555_v22 = vpop.permute.xlu1 %5554 }
 0x477   : > { %v5677_v24 = vsel %vm5669_vm2, %v5644_v0, %v5555_v22  ;;  %v5202_v43 = vpop.f32.mrf.mxu2  ;;  %v5485_v0 = vadd.f32 %v5408_v61, %v5236_v42  ;;  %v5651_v22 = vsel %vm5636_vm1, %v5490_v32, %v5423_v51 }
 0x478   : > { %v5709_v60 = vmax.f32 %v5677_v24, 0.0  ;;  %v8684_v5 = vadd.f32 %v8400_v49, %v5202_v43 }
 0x479   : > { %v5646_v56 = vsel %vm5636_vm1, %v5485_v0, %v5408_v61  ;;  %v5432_v0 = vadd.f32 %v8405_v23, %v5431_v45  ;;  %v5426_v45 = vadd.f32 %v8405_v23, %v8680_v8  ;;  %v5429_v8 = vadd.f32 %v8405_v23, %v8701_v13 }
 0x47a   : > { %5742 = vst.msk [vmem:[%s8592_s16 + $0x38] sm:$0xff] %vm5734_vm3, %v5709_v60  ;;  %v5249_v4 = vmax.f32 %v8684_v5, 0.0  ;;  %v5488_v60 = vadd.f32 %v5417_v12, %v5239_v18 }
 0x47c   : > { %5584 = vrot.lane.b32.xlu1 %v5249_v4, %s6516_s29 }
 0x47e   : > { %v5563_v37 = vpop.permute.xlu2 %5562 }
 0x47f   : > { %v5681_v47 = vsel %vm5669_vm2, %v5648_v27, %v5563_v37  ;;  %v5204_v55 = vpop.f32.mrf.mxu2  ;;  %v5649_v37 = vsel %vm5636_vm1, %v5488_v60, %v5417_v12  ;;  %v8760_v27 = vpop.f32.mrf.mxu3 }
 0x480   : > { %v5713_v52 = vmax.f32 %v5681_v47, 0.0  ;;  %v8699_v16 = vadd.f32 %v8400_v49, %v5204_v55 }
 0x482   : > { %5746 = vst.msk [vmem:[%s8592_s16 + $0x58] sm:$0xff] %vm5734_vm3, %v5713_v52  ;;  %v5250_v57 = vmax.f32 %v8699_v16, 0.0  ;;  %v5489_v52 = vadd.f32 %v5420_v21, %v5240_v28 }
 0x484   : > { %5586 = vrot.lane.b32.xlu2 %v5250_v57, %s6516_s29 }
 0x486   : > { %v5559_v14 = vpop.permute.xlu0 %5558 }
 0x487   : > { %v5679_v38 = vsel %vm5669_vm2, %v5646_v56, %v5559_v14  ;;  %v5207_v19 = vpop.f32.mrf.mxu2  ;;  %v5650_v14 = vsel %vm5636_vm1, %v5489_v52, %v5420_v21  ;;  %v5440_v28 = vpop.f32.mrf.mxu3  ;;  %v5435_v52 = vadd.f32 %v8405_v23, %v8740_v15 }
 0x488   : > { %v5711_v62 = vmax.f32 %v5679_v38, 0.0  ;;  %v8716_v42 = vadd.f32 %v8400_v49, %v5207_v19  ;;  %v5441_v60 = vadd.f32 %v8405_v23, %v5440_v28 }
 0x48a   : > { %5744 = vst.msk [vmem:[%s8592_s16 + $0x48] sm:$0xff] %vm5734_vm3, %v5711_v62  ;;  %v5251_v17 = vmax.f32 %v8716_v42, 0.0  ;;  %v5493_v62 = vadd.f32 %v5432_v0, %v5244_v6 }
 0x48c   : > { %5588 = vrot.lane.b32.xlu0 %v5251_v17, %s6516_s29 }
 0x48e   : > { %v5561_v34 = vpop.permute.xlu1 %5560 }
 0x48f   : > { %v5680_v58 = vsel %vm5669_vm2, %v5647_v63, %v5561_v34  ;;  %v5209_v50 = vpop.f32.mrf.mxu2  ;;  %v5654_v34 = vsel %vm5636_vm1, %v5493_v62, %v5432_v0  ;;  %v5443_v32 = vpop.f32.mrf.mxu3 }
 0x490   : > { %v5712_v36 = vmax.f32 %v5680_v58, 0.0  ;;  %v8730_v53 = vadd.f32 %v8400_v49, %v5209_v50  ;;  %v5491_v50 = vadd.f32 %v5426_v45, %v5242_v40  ;;  %v5444_v9 = vadd.f32 %v8405_v23, %v5443_v32 }
 0x492   : > { %5745 = vst.msk [vmem:[%s8592_s16 + $0x50] sm:$0xff] %vm5734_vm3, %v5712_v36  ;;  %v5252_v39 = vmax.f32 %v8730_v53, 0.0 }
 0x494   : > { %5590 = vrot.lane.b32.xlu1 %v5252_v39, %s6516_s29 }
 0x496   : > { %v5569_v59 = vpop.permute.xlu2 %5568 }
 0x497   : > { %v5684_v24 = vsel %vm5669_vm2, %v5651_v22, %v5569_v59  ;;  %v5212_v26 = vpop.f32.mrf.mxu2  ;;  %v5652_v59 = vsel %vm5636_vm1, %v5491_v50, %v5426_v45  ;;  %v5446_v13 = vpop.f32.mrf.mxu3 }
 0x498   : > { %v5716_v41 = vmax.f32 %v5684_v24, 0.0  ;;  %v8747_v43 = vadd.f32 %v8400_v49, %v5212_v26  ;;  %v5492_v26 = vadd.f32 %v5429_v8, %v5243_v10 }
 0x49a   : > { %5749 = vst.msk [vmem:[%s8592_s16 + $0x70] sm:$0xff] %vm5734_vm3, %v5716_v41  ;;  %v5253_v35 = vmax.f32 %v8747_v43, 0.0 }
 0x49c   : > { %5592 = vrot.lane.b32.xlu2 %v5253_v35, %s6516_s29 }
 0x49e   : > { %v5565_v61 = vpop.permute.xlu0 %5564 }
 0x49f   : > { %v5682_v47 = vsel %vm5669_vm2, %v5649_v37, %v5565_v61  ;;  %v5214_v2 = vpop.f32.mrf.mxu2  ;;  %v5653_v61 = vsel %vm5636_vm1, %v5492_v26, %v5429_v8 }
 0x4a0   : > { %v5714_v18 = vmax.f32 %v5682_v47, 0.0  ;;  %v8764_v55 = vadd.f32 %v8400_v49, %v5214_v2  ;;  %v5496_v2 = vadd.f32 %v5441_v60, %v5247_v1  ;;  %v5494_v1 = vadd.f32 %v5435_v52, %v5245_v25 }
 0x4a2   : > { %5747 = vst.msk [vmem:[%s8592_s16 + $0x60] sm:$0xff] %vm5734_vm3, %v5714_v18  ;;  %v5254_v44 = vmax.f32 %v8764_v55, 0.0 }
 0x4a4   : > { %5594 = vrot.lane.b32.xlu0 %v5254_v44, %s6516_s29 }
 0x4a6   : > { %v5567_v3 = vpop.permute.xlu1 %5566 }
 0x4a7   : > { %v5683_v56 = vsel %vm5669_vm2, %v5650_v14, %v5567_v3  ;;  %v5217_v38 = vpop.f32.mrf.mxu2  ;;  %v5657_v3 = vsel %vm5636_vm1, %v5496_v2, %v5441_v60 }
 0x4a8   : > { %v5715_v19 = vmax.f32 %v5683_v56, 0.0  ;;  %v8778_v46 = vadd.f32 %v8400_v49, %v5217_v38  ;;  %v5438_v56 = vadd.f32 %v8405_v23, %v8760_v27 }
 0x4aa   : > { %5748 = vst.msk [vmem:[%s8592_s16 + $0x68] sm:$0xff] %vm5734_vm3, %v5715_v19  ;;  %v5255_v30 = vmax.f32 %v8778_v46, 0.0  ;;  %v5655_v19 = vsel %vm5636_vm1, %v5494_v1, %v5435_v52  ;;  %v5495_v45 = vadd.f32 %v5438_v56, %v5246_v31 }
 0x4ac   : > { %5596 = vrot.lane.b32.xlu1 %v5255_v30, %s6516_s29 }
 0x4ae   : > { %v5575_v51 = vpop.permute.xlu2 %5574 }
 0x4af   : > { %v5687_v63 = vsel %vm5669_vm2, %v5654_v34, %v5575_v51  ;;  %v5219_v58 = vpop.f32.mrf.mxu2  ;;  %v5656_v51 = vsel %vm5636_vm1, %v5495_v45, %v5438_v56 }
 0x4b0   : > { %v5719_v54 = vmax.f32 %v5687_v63, 0.0  ;;  %v8793_v6 = vadd.f32 %v8400_v49, %v5219_v58 }
 0x4b2   : > { %5752 = vst.msk [vmem:[%s8592_s16 + $0x88] sm:$0xff] %vm5734_vm3, %v5719_v54  ;;  %v5256_v36 = vmax.f32 %v8793_v6, 0.0 }
 0x4b4   : > { %5598 = vrot.lane.b32.xlu2 %v5256_v36, %s6516_s29 }
 0x4b6   : > { %v5571_v12 = vpop.permute.xlu0 %5570 }
 0x4b7   : > { %v5685_v22 = vsel %vm5669_vm2, %v5652_v59, %v5571_v12  ;;  %v5222_v24 = vpop.f32.mrf.mxu2  ;;  %v5497_v12 = vadd.f32 %v5444_v9, %v5248_v48 }
 0x4b8   : > { %v5717_v7 = vmax.f32 %v5685_v22, 0.0  ;;  %v8808_v40 = vadd.f32 %v8400_v49, %v5222_v24 }
 0x4b9   : > { %v5658_v22 = vsel %vm5636_vm1, %v5497_v12, %v5444_v9 }
 0x4ba   : > { %5750 = vst.msk [vmem:[%s8592_s16 + $0x78] sm:$0xff] %vm5734_vm3, %v5717_v7  ;;  %v5257_v41 = vmax.f32 %v8808_v40, 0.0 }
 0x4bc   : > { %5600 = vrot.lane.b32.xlu0 %v5257_v41, %s6516_s29 }
 0x4be   : > { %v5573_v21 = vpop.permute.xlu1 %5572 }
 0x4bf   : > { %v5686_v37 = vsel %vm5669_vm2, %v5653_v61, %v5573_v21  ;;  %v5224_v47 = vpop.f32.mrf.mxu2 }
 0x4c0   : > { %v5718_v29 = vmax.f32 %v5686_v37, 0.0  ;;  %v8822_v10 = vadd.f32 %v8400_v49, %v5224_v47  ;;  %v5449_v49 = vpop.f32.mrf.mxu3 }
 0x4c1   : > { %v5450_v33 = vadd.f32 %v8405_v23, %v5449_v49 }
 0x4c2   : > { %5751 = vst.msk [vmem:[%s8592_s16 + $0x80] sm:$0xff] %vm5734_vm3, %v5718_v29  ;;  %v5258_v18 = vmax.f32 %v8822_v10, 0.0 }
 0x4c3   : > { %v5499_v63 = vadd.f32 %v5450_v33, %v5250_v57  ;;  %v5447_v57 = vadd.f32 %v8405_v23, %v5446_v13 }
 0x4c4   : > { %5602 = vrot.lane.b32.xlu1 %v5258_v18, %s6516_s29 }
 0x4c5   : > { %v5660_v54 = vsel %vm5636_vm1, %v5499_v63, %v5450_v33  ;;  %v5498_v7 = vadd.f32 %v5447_v57, %v5249_v4 }
 0x4c6   : > { %v5581_v0 = vpop.permute.xlu2 %5580 }
 0x4c7   : > { %v5690_v14 = vsel %vm5669_vm2, %v5657_v3, %v5581_v0  ;;  %v5659_v26 = vsel %vm5636_vm1, %v5498_v7, %v5447_v57 }
 0x4c8   : > { %v5722_v20 = vmax.f32 %v5690_v14, 0.0  ;;  %v5452_v62 = vpop.f32.mrf.mxu3 }
 0x4c9   : > { %v5453_v5 = vadd.f32 %v8405_v23, %v5452_v62 }
 0x4ca   : > { %5755 = vst.msk [vmem:[%s8592_s16 + $0xa0] sm:$0xff] %vm5734_vm3, %v5722_v20 }
 0x4cb   : > { %v5500_v52 = vadd.f32 %v5453_v5, %v5251_v17 }
 0x4cd   : > { %v5661_v0 = vsel %vm5636_vm1, %v5500_v52, %v5453_v5 }
 0x4ce   : > { %v5577_v38 = vpop.permute.xlu0 %5576 }
 0x4cf   : > { %v5688_v15 = vsel %vm5669_vm2, %v5655_v19, %v5577_v38 }
 0x4d0   : > { %v5720_v28 = vmax.f32 %v5688_v15, 0.0  ;;  %v5455_v58 = vpop.f32.mrf.mxu3 }
 0x4d1   : > { %v5456_v43 = vadd.f32 %v8405_v23, %v5455_v58 }
 0x4d2   : > { %5753 = vst.msk [vmem:[%s8592_s16 + $0x90] sm:$0xff] %vm5734_vm3, %v5720_v28 }
 0x4d3   : > { %v5501_v14 = vadd.f32 %v5456_v43, %v5252_v39 }
 0x4d5   : > { %v5662_v1 = vsel %vm5636_vm1, %v5501_v14, %v5456_v43 }
 0x4d6   : > { %v5579_v25 = vpop.permute.xlu1 %5578 }
 0x4d7   : > { %v5689_v27 = vsel %vm5669_vm2, %v5656_v51, %v5579_v25 }
 0x4d8   : > { %v5721_v34 = vmax.f32 %v5689_v27, 0.0  ;;  %v5458_v16 = vpop.f32.mrf.mxu3 }
 0x4d9   : > { %v5459_v11 = vadd.f32 %v8405_v23, %v5458_v16 }
 0x4da   : > { %5754 = vst.msk [vmem:[%s8592_s16 + $0x98] sm:$0xff] %vm5734_vm3, %v5721_v34 }
 0x4db   : > { %v5502_v61 = vadd.f32 %v5459_v11, %v5253_v35 }
 0x4dd   : > { %v5663_v37 = vsel %vm5636_vm1, %v5502_v61, %v5459_v11 }
 0x4de   : > { %v5587_v31 = vpop.permute.xlu2 %5586 }
 0x4df   : > { %v5693_v50 = vsel %vm5669_vm2, %v5660_v54, %v5587_v31 }
 0x4e0   : > { %v5725_v8 = vmax.f32 %v5693_v50, 0.0  ;;  %v5461_v60 = vpop.f32.mrf.mxu3 }
 0x4e1   : > { %v5462_v53 = vadd.f32 %v8405_v23, %v5461_v60 }
 0x4e2   : > { %5758 = vst.msk [vmem:[%s8592_s16 + $0xb8] sm:$0xff] %vm5734_vm3, %v5725_v8 }
 0x4e3   : > { %v5503_v45 = vadd.f32 %v5462_v53, %v5254_v44 }
 0x4e6   : > { %v5583_v59 = vpop.permute.xlu0 %5582 }
 0x4e7   : > { %v5691_v32 = vsel %vm5669_vm2, %v5658_v22, %v5583_v59 }
 0x4e8   : > { %v5723_v24 = vmax.f32 %v5691_v32, 0.0  ;;  %v5464_v2 = vpop.f32.mrf.mxu3 }
 0x4e9   : > { %v5465_v6 = vadd.f32 %v8405_v23, %v5464_v2 }
 0x4ea   : > { %5756 = vst.msk [vmem:[%s8592_s16 + $0xa8] sm:$0xff] %vm5734_vm3, %v5723_v24 }
 0x4eb   : > { %v5504_v27 = vadd.f32 %v5465_v6, %v5255_v30 }
 0x4ed   : > { %v5665_v55 = vsel %vm5636_vm1, %v5504_v27, %v5465_v6 }
 0x4ee   : > { %v5585_v48 = vpop.permute.xlu1 %5584 }
 0x4ef   : > { %v5692_v13 = vsel %vm5669_vm2, %v5659_v26, %v5585_v48 }
 0x4f0   : > { %v5724_v21 = vmax.f32 %v5692_v13, 0.0  ;;  %v5467_v20 = vpop.f32.mrf.mxu3 }
 0x4f1   : > { %v5468_v42 = vadd.f32 %v8405_v23, %v5467_v20 }
 0x4f2   : > { %5757 = vst.msk [vmem:[%s8592_s16 + $0xb0] sm:$0xff] %vm5734_vm3, %v5724_v21 }
 0x4f3   : > { %v5505_v19 = vadd.f32 %v5468_v42, %v5256_v36  ;;  %v5664_v36 = vsel %vm5636_vm1, %v5503_v45, %v5462_v53 }
 0x4f5   : > { %v5666_v15 = vsel %vm5636_vm1, %v5505_v19, %v5468_v42 }
 0x4f6   : > { %v5593_v4 = vpop.permute.xlu2 %5592 }
 0x4f7   : > { %v5696_v47 = vsel %vm5669_vm2, %v5663_v37, %v5593_v4 }
 0x4f8   : > { %v5728_v29 = vmax.f32 %v5696_v47, 0.0  ;;  %v5470_v58 = vpop.f32.mrf.mxu3 }
 0x4f9   : > { %v5471_v9 = vadd.f32 %v8405_v23, %v5470_v58 }
 0x4fa   : > { %5761 = vst.msk [vmem:[%s8592_s16 + $0xd0] sm:$0xff] %vm5734_vm3, %v5728_v29 }
 0x4fb   : > { %v5506_v31 = vadd.f32 %v5471_v9, %v5257_v41 }
 0x4fd   : > { %v5667_v50 = vsel %vm5636_vm1, %v5506_v31, %v5471_v9 }
 0x4fe   : > { %v5589_v35 = vpop.permute.xlu0 %5588 }
 0x4ff   : > { %v5694_v3 = vsel %vm5669_vm2, %v5661_v0, %v5589_v35 }
 0x500   : > { %v5726_v49 = vmax.f32 %v5694_v3, 0.0  ;;  %v5473_v46 = vpop.f32.mrf.mxu3 }
 0x501   : > { %v5474_v30 = vadd.f32 %v8405_v23, %v5473_v46 }
 0x502   : > { %5759 = vst.msk [vmem:[%s8592_s16 + $0xc0] sm:$0xff] %vm5734_vm3, %v5726_v49 }
 0x503   : > { %v5507_v40 = vadd.f32 %v5474_v30, %v5258_v18 }
 0x505   : > { %v5668_v41 = vsel %vm5636_vm1, %v5507_v40, %v5474_v30 }
 0x506   : > { %v5591_v17 = vpop.permute.xlu1 %5590 }
 0x507   : > { %v5695_v56 = vsel %vm5669_vm2, %v5662_v1, %v5591_v17 }
 0x508   : > { %v5727_v38 = vmax.f32 %v5695_v56, 0.0 }
 0x50a   : > { %5760 = vst.msk [vmem:[%s8592_s16 + $0xc8] sm:$0xff] %vm5734_vm3, %v5727_v38 }
 0x50e   : > { %v5599_v39 = vpop.permute.xlu2 %5598 }
 0x50f   : > { %v5699_v28 = vsel %vm5669_vm2, %v5666_v15, %v5599_v39 }
 0x510   : > { %v5731_v62 = vmax.f32 %v5699_v28, 0.0 }
 0x512   : > { %5764 = vst.msk [vmem:[%s8592_s16 + $0xe8] sm:$0xff] %vm5734_vm3, %v5731_v62 }
 0x516   : > { %v5595_v33 = vpop.permute.xlu0 %5594 }
 0x517   : > { %v5697_v25 = vsel %vm5669_vm2, %v5664_v36, %v5595_v33 }
 0x518   : > { %v5729_v51 = vmax.f32 %v5697_v25, 0.0 }
 0x51a   : > { %5762 = vst.msk [vmem:[%s8592_s16 + $0xd8] sm:$0xff] %vm5734_vm3, %v5729_v51 }
 0x51e   : > { %v5597_v34 = vpop.permute.xlu1 %5596 }
 0x51f   : > { %v5698_v44 = vsel %vm5669_vm2, %v5665_v55, %v5597_v34 }
 0x520   : > { %v5730_v63 = vmax.f32 %v5698_v44, 0.0 }
 0x522   : > { %5763 = vst.msk [vmem:[%s8592_s16 + $0xe0] sm:$0xff] %vm5734_vm3, %v5730_v63 }
 0x52e   : > { %v5601_v54 = vpop.permute.xlu0 %5600 }
 0x52f   : > { %v5700_v8 = vsel %vm5669_vm2, %v5667_v50, %v5601_v54 }
 0x530   : > { %v5732_v12 = vmax.f32 %v5700_v8, 0.0 }
 0x532   : > { %5765 = vst.msk [vmem:[%s8592_s16 + $0xf0] sm:$0xff] %vm5734_vm3, %v5732_v12 }
 0x536   : > { %v5603_v23 = vpop.permute.xlu1 %5602 }
 0x537   : > { %v5701_v16 = vsel %vm5669_vm2, %v5668_v41, %v5603_v23 }
 0x538   : > { %v5733_v57 = vmax.f32 %v5701_v16, 0.0 }
 0x53a   : > { %5766 = vst.msk [vmem:[%s8592_s16 + $0xf8] sm:$0xff] %vm5734_vm3, %v5733_v57 }
 0x53b   : > { %6478 = shalt.err (!%p6475_p3)
}
 0x53c   : > { %s6517_s27 = smov 128   ;;  %s6518_s16 = smov 8  }
 0x53d   : > { %6364 = dma.vmem_to_hbm [thread:$0]  (%p6607_p5), %s5781_s24, 4096, %s5783_s25, %s5768_s13, %s6517_s27, %s6517_s27, %s6518_s16  }
 0x53e PF: > { %p6370_p4 = scmp.ge.s32.totalorder %s6513_s12, 2  ;;  %s5797_s23 = sand.u32 1, %s6501_s30  }
 0x53f   : > { %s5798_s29 = scalar_lea.sflag [#allocation4], %s5797_s23 }
 0x540   : > { %p6367_p7 = pnand %p6370_p4, %p6611_p6 }
 0x542   : > { %p6368_p8 = pneg %p6367_p7 }
 0x544   : > { %6496 = dma.done.wait (%p6368_p8), %s5798_s29, 4096  }
 0x545   : > { %6498 = vsyncadd (%p6368_p8), %s5798_s29, 4294963200  ;;  %p19_p9 = scmp.ge.s32.totalorder %s6594_s15, 4   ;;  %s9069_s30 = smov %s6505_s10 }
 0x546   : > { %s9070_s10 = smov %s6509_s11  ;;  %s9071_s11 = smov %s6605_s18 }
 0x547   : > { %s9072_s12 = smov %s6594_s15  ;;  %21 = sbr.rel (!%p19_p9) target bundleno = 3 (0x3), region = 101 }
 0x54c   :  { %5804 = vsyncpa [#allocation4], 1 }
 0x54d   :  { %5806 = vsyncpa [#allocation4 + $0x1], 1 }

</bundles_post_ra>
